<compile_context>
chip_gen: v7x
topology: tpu7x:2x2x1
jax: 0.10.0
libtpu: 0.0.40
codegen_flags: <defaults>
</compile_context>

<pallas_src>
import jax
import jax.numpy as jnp
from jax import lax
from jax.experimental import pallas as pl
from jax.experimental.pallas import tpu as pltpu

C1, C2, F1 = 32, 64, 128  # channel / feature sizes fixed by CNNModel


# ---------------------------------------------------------------------------
# Wrapper-side glue: tiny mod-4 pool-grouped im2col for conv1 only (~18 KB).
# ---------------------------------------------------------------------------
def build_conv1_patches(x_nchw):
    """(B, Cin, H, W) -> (B, H*W, 9*Cin) f32, rows grouped by (y%4, x%4)."""
    B, Cin, H, W = x_nchw.shape
    P, Q = H // 4, W // 4
    xp = jnp.pad(x_nchw, ((0, 0), (0, 0), (1, 1), (1, 1)))
    cols = [xp[:, :, dy:dy + H, dx:dx + W] for dy in range(3) for dx in range(3)]
    t = jnp.stack(cols, axis=1)                  # (B, 9, Cin, H, W)
    t = t.transpose(0, 3, 4, 1, 2)               # (B, H, W, 9, Cin)
    K = 9 * Cin
    t = t.reshape(B, H, W, K)
    # regroup rows: (y, x) -> phase (y%4, x%4), then interior (y//4, x//4)
    t = t.reshape(B, P, 4, Q, 4, K)              # (B, p, r, q, s, K)
    t = t.transpose(0, 2, 4, 1, 3, 5)            # (B, r, s, p, q, K)
    return t.reshape(B, 16 * P * Q, K)


# ---------------------------------------------------------------------------
# One-time parameter preparation (conv weights as matrices, fc1 rows permuted
# to fold PyTorch's (C, H, W) flatten order, bf16 for MXU operands).
# ---------------------------------------------------------------------------
def prepare_params(params):
    Cin = params["cw1"].shape[1]
    fc_in = params["fw1"].shape[0]
    PQ = fc_in // C2
    return {
        "w1": jnp.transpose(params["cw1"], (2, 3, 1, 0))
                 .reshape(9 * Cin, C1).astype(jnp.bfloat16),
        "b1": params["cb1"].reshape(1, C1).astype(jnp.float32),
        "w2": jnp.transpose(params["cw2"], (2, 3, 1, 0))
                 .reshape(9 * C1, C2).astype(jnp.bfloat16),
        "b2": params["cb2"].reshape(1, C2).astype(jnp.float32),
        # fc1 rows reordered from PyTorch's c*PQ + spatial to spatial*C2 + c:
        "fw1": params["fw1"].reshape(C2, PQ, F1).transpose(1, 0, 2)
                 .reshape(PQ * C2, F1).astype(jnp.bfloat16),
        "fb1": params["fb1"].reshape(1, F1).astype(jnp.float32),
        "fw2": params["fw2"].astype(jnp.bfloat16),
        "fb2": params["fb2"].reshape(1, -1).astype(jnp.float32),
    }


# ---------------------------------------------------------------------------
# The fused Pallas kernel.
# ---------------------------------------------------------------------------
def fused_forward(patches, prep, H, W, num_classes):
    B = patches.shape[0]
    K1 = patches.shape[-1]
    P, Q = H // 4, W // 4          # pooled2 spatial grid
    PQ = P * Q
    Qp = Q + 2                     # padded parity-plane width

    def kernel(p1_ref, w1_ref, b1_ref, w2_ref, b2c_ref,
               fw1_ref, fb1_ref, fw2_ref, fb2_ref,
               o_ref, a1p_ref, im2_ref, xflat_ref):
        # ---- conv1: ONE MXU matmul over all H*W output positions ---------
        acc1 = jnp.dot(p1_ref[0].astype(jnp.bfloat16), w1_ref[...],
                       preferred_element_type=jnp.float32)     # (16*PQ, C1)
        b1 = b1_ref[...]                                        # (1, C1)

        # ---- maxpool1: 4-way max over whole phase blocks (PQ rows each);
        #      bias+ReLU hoisted after the max; result stored as zero-padded
        #      row/col parity planes of pooled1, kept resident in VMEM ------
        a1p_ref[...] = jnp.zeros(a1p_ref.shape, a1p_ref.dtype)
        for alpha in range(2):                 # pooled1 row parity
            for beta in range(2):              # pooled1 col parity
                m = None
                for a in range(2):             # pool window row
                    for b in range(2):         # pool window col
                        pid = (2 * alpha + a) * 4 + (2 * beta + b)
                        blk = acc1[pid * PQ:(pid + 1) * PQ, :]  # (PQ, C1)
                        m = blk if m is None else jnp.maximum(m, blk)
                run = jnp.maximum(m + b1, 0.0)                  # (PQ, C1)
                for i in range(P):             # insert interior rows (padded stride)
                    d = (1 + i) * Qp + 1
                    a1p_ref[alpha, beta, d:d + Q, :] = run[i * Q:(i + 1) * Q, :]

        # ---- conv2 im2col gathered entirely in VMEM (static copies only) --
        for pr in range(2):                    # pool2 window row
            for pc in range(2):                # pool2 window col
                ph = pr * 2 + pc
                for dy in range(3):
                    for dx in range(3):
                        t = dy * 3 + dx
                        er = pr + dy - 1
                        ec = pc + dx - 1
                        ra, rg = er % 2, er // 2
                        ca, cg = ec % 2, ec // 2
                        for i in range(P):
                            src = (1 + rg + i) * Qp + (1 + cg)
                            dst = ph * PQ + i * Q
                            im2_ref[dst:dst + Q, t * C1:(t + 1) * C1] = (
                                a1p_ref[ra, ca, src:src + Q, :])

        # ---- conv2: single (4*PQ, 9*C1)@(9*C1, C2) matmul; pool2 = max over
        #      the 4 contiguous phase row-blocks; bias+ReLU hoisted ----------
        acc2 = jnp.dot(im2_ref[...].astype(jnp.bfloat16), w2_ref[...],
                       preferred_element_type=jnp.float32)      # (4*PQ, C2)
        pm = jnp.maximum(jnp.maximum(acc2[0 * PQ:1 * PQ], acc2[1 * PQ:2 * PQ]),
                         jnp.maximum(acc2[2 * PQ:3 * PQ], acc2[3 * PQ:4 * PQ]))
        pooled2 = jnp.maximum(pm + b2c_ref[...], 0.0)           # (PQ, C2)

        # ---- flatten (spatial-major, channel-minor; fc1 rows pre-permuted) -
        for r in range(PQ):
            xflat_ref[:, r * C2:(r + 1) * C2] = pooled2[r:r + 1, :]

        # ---- fc1 + ReLU + fc2 ---------------------------------------------
        h1 = jnp.dot(xflat_ref[...].astype(jnp.bfloat16), fw1_ref[...],
                     preferred_element_type=jnp.float32)        # (1, F1)
        h1 = jnp.maximum(h1 + fb1_ref[...], 0.0)
        logits = jnp.dot(h1.astype(jnp.bfloat16), fw2_ref[...],
                         preferred_element_type=jnp.float32) + fb2_ref[...]
        o_ref[0] = logits.astype(o_ref.dtype)

    out = pl.pallas_call(
        kernel,
        out_shape=jax.ShapeDtypeStruct((B, 1, num_classes), jnp.float32),
        grid=(B,),
        in_specs=[
            pl.BlockSpec((1, 16 * PQ, K1), lambda i: (i, 0, 0)),   # patches
            pl.BlockSpec((K1, C1), lambda i: (0, 0)),              # conv1 w
            pl.BlockSpec((1, C1), lambda i: (0, 0)),               # conv1 b
            pl.BlockSpec((9 * C1, C2), lambda i: (0, 0)),          # conv2 w
            pl.BlockSpec((1, C2), lambda i: (0, 0)),               # conv2 b
            pl.BlockSpec((PQ * C2, F1), lambda i: (0, 0)),         # fc1 w (permuted)
            pl.BlockSpec((1, F1), lambda i: (0, 0)),               # fc1 b
            pl.BlockSpec((F1, num_classes), lambda i: (0, 0)),     # fc2 w
            pl.BlockSpec((1, num_classes), lambda i: (0, 0)),      # fc2 b
        ],
        out_specs=pl.BlockSpec((1, 1, num_classes), lambda i: (i, 0, 0)),
        scratch_shapes=[
            pltpu.VMEM((2, 2, (P + 2) * Qp, C1), jnp.float32),  # pooled1 parity planes (padded)
            pltpu.VMEM((4 * PQ, 9 * C1), jnp.float32),          # conv2 im2col
            pltpu.VMEM((1, PQ * C2), jnp.float32),              # flattened fc input
        ],
        compiler_params=pltpu.CompilerParams(
            dimension_semantics=("parallel",)),
    )(patches, prep["w1"], prep["b1"], prep["w2"], prep["b2"],
      prep["fw1"], prep["fb1"], prep["fw2"], prep["fb2"])
    return out.reshape(B, num_classes)


def cnn_forward(x_nchw, prep):
    B, Cin, H, W = x_nchw.shape
    assert H % 4 == 0 and W % 4 == 0, "spatial dims must be divisible by 4"
    patches = build_conv1_patches(x_nchw)           # tiny (B, H*W, 9*Cin)
    num_classes = prep["fw2"].shape[1]
    return fused_forward(patches, prep, H, W, num_classes)


# ---------------------------------------------------------------------------
# Pure-JAX reference for validation (f32 throughout).
# ---------------------------------------------------------------------------
def reference_forward(x_nchw, params):
    dn = ("NCHW", "OIHW", "NCHW")
    y = lax.conv_general_dilated(x_nchw, params["cw1"], (1, 1), ((1, 1), (1, 1)),
                                 dimension_numbers=dn)
    y = jnp.maximum(y + params["cb1"][None, :, None, None], 0.0)
    y = lax.reduce_window(y, -jnp.inf, lax.max, (1, 1, 2, 2), (1, 1, 2, 2), "VALID")
    y = lax.conv_general_dilated(y, params["cw2"], (1, 1), ((1, 1), (1, 1)),
                                 dimension_numbers=dn)
    y = jnp.maximum(y + params["cb2"][None, :, None, None], 0.0)
    y = lax.reduce_window(y, -jnp.inf, lax.max, (1, 1, 2, 2), (1, 1, 2, 2), "VALID")
    y = y.reshape(y.shape[0], -1)
    y = jnp.maximum(y @ params["fw1"] + params["fb1"], 0.0)
    return y @ params["fw2"] + params["fb2"]


# ---------------------------------------------------------------------------
# Deterministic synthetic parameters (shapes per CNNModel.__init__).
# ---------------------------------------------------------------------------
def init_params(key, input_channels, input_height, input_width, num_classes):
    fc_in = C2 * (input_height // 4) * (input_width // 4)
    ks = jax.random.split(key, 8)

    def w(k, shape, fan_in):
        return (jax.random.normal(k, shape, jnp.float32) / jnp.sqrt(fan_in)).astype(jnp.float32)

    return {
        "cw1": w(ks[0], (C1, input_channels, 3, 3), 9 * input_channels),
        "cb1": w(ks[1], (C1,), 9 * input_channels),
        "cw2": w(ks[2], (C2, C1, 3, 3), 9 * C1),
        "cb2": w(ks[3], (C2,), 9 * C1),
        # Linear weights stored as (in_features, out_features); fc1 rows are in
        # PyTorch's (C, H, W) flatten order.
        "fw1": w(ks[4], (fc_in, F1), fc_in),
        "fb1": w(ks[5], (F1,), fc_in),
        "fw2": w(ks[6], (F1, num_classes), F1),
        "fb2": w(ks[7], (num_classes,), F1),
    }


if __name__ == "__main__":
    B, C, H, W, NUM_CLASSES = 2, 1, 16, 16, 10
    key = jax.random.PRNGKey(0)
    kx, kp = jax.random.split(key)
    x = jax.random.normal(kx, (B, C, H, W), jnp.float32)
    params = init_params(kp, C, H, W, NUM_CLASSES)
    prep = prepare_params(params)                   # one-time, outside jit

    out = jax.jit(cnn_forward)(x, prep)
    out = jax.block_until_ready(out)

    ref = reference_forward(x, params)
    assert out.shape == (B, NUM_CLASSES)
    # bf16 MXU operands (f32 accumulation) through 4 layers -> ~1% tolerance.
    assert jnp.allclose(out, ref, rtol=5e-2, atol=5e-2), (out, ref)
    print("KERNEL_OK")
</pallas_src>

<mosaic_0001>
module attributes {stable_mosaic.version = 11 : i64} {
  func.func @kernel(%arg0: i32, %arg1: memref<1x256x9xf32, #tpu.memory_space<vmem>>, %arg2: memref<9x32xbf16, #tpu.memory_space<vmem>>, %arg3: memref<1x32xf32, #tpu.memory_space<vmem>>, %arg4: memref<288x64xbf16, #tpu.memory_space<vmem>>, %arg5: memref<1x64xf32, #tpu.memory_space<vmem>>, %arg6: memref<1024x128xbf16, #tpu.memory_space<vmem>>, %arg7: memref<1x128xf32, #tpu.memory_space<vmem>>, %arg8: memref<128x10xbf16, #tpu.memory_space<vmem>>, %arg9: memref<1x10xf32, #tpu.memory_space<vmem>>, %arg10: memref<1x1x10xf32, #tpu.memory_space<vmem>>, %arg11: memref<2x2x36x32xf32, #tpu.memory_space<vmem>>, %arg12: memref<64x288xf32, #tpu.memory_space<vmem>>, %arg13: memref<1x1024xf32, #tpu.memory_space<vmem>>) attributes {dimension_semantics = [#tpu.dimension_semantics<parallel>], iteration_bounds = array<i64: 2>, scalar_prefetch = 0 : i64, scratch_operands = 3 : i64, tpu.core_type = #tpu.core_type<tc>, window_params = [{transform_indices = @transform_0, window_bounds = array<i64: 1, 256, 9>}, {pipeline_mode = #tpu.pipeline_mode<synchronous>, transform_indices = @transform_1, window_bounds = array<i64: 9, 32>}, {pipeline_mode = #tpu.pipeline_mode<synchronous>, transform_indices = @transform_2, window_bounds = array<i64: 1, 32>}, {pipeline_mode = #tpu.pipeline_mode<synchronous>, transform_indices = @transform_3, window_bounds = array<i64: 288, 64>}, {pipeline_mode = #tpu.pipeline_mode<synchronous>, transform_indices = @transform_4, window_bounds = array<i64: 1, 64>}, {pipeline_mode = #tpu.pipeline_mode<synchronous>, transform_indices = @transform_5, window_bounds = array<i64: 1024, 128>}, {pipeline_mode = #tpu.pipeline_mode<synchronous>, transform_indices = @transform_6, window_bounds = array<i64: 1, 128>}, {pipeline_mode = #tpu.pipeline_mode<synchronous>, transform_indices = @transform_7, window_bounds = array<i64: 128, 10>}, {pipeline_mode = #tpu.pipeline_mode<synchronous>, transform_indices = @transform_8, window_bounds = array<i64: 1, 10>}, {transform_indices = @transform_9, window_bounds = array<i64: 1, 1, 10>}]} {
    %c0 = arith.constant 0 : index
    %c0_0 = arith.constant 0 : index
    %c0_1 = arith.constant 0 : index
    %0 = vector.load %arg1[%c0, %c0_0, %c0_1] : memref<1x256x9xf32, #tpu.memory_space<vmem>>, vector<1x256x9xf32>
    %1 = vector.shape_cast %0 : vector<1x256x9xf32> to vector<256x9xf32>
    %2 = arith.truncf %1 : vector<256x9xf32> to vector<256x9xbf16>
    %c0_2 = arith.constant 0 : index
    %c0_3 = arith.constant 0 : index
    %3 = vector.load %arg2[%c0_2, %c0_3] : memref<9x32xbf16, #tpu.memory_space<vmem>>, vector<9x32xbf16>
    %cst = arith.constant dense<0.000000e+00> : vector<256x32xf32>
    %4 = tpu.matmul %2, %3, %cst {dimension_numbers = #tpu.dot_dimension_numbers<[1], [0], [0], [1], [0, 0, 1, 1], [], []>} : vector<256x9xbf16>, vector<9x32xbf16>, vector<256x32xf32> -> vector<256x32xf32>
    %c0_4 = arith.constant 0 : index
    %c0_5 = arith.constant 0 : index
    %5 = vector.load %arg3[%c0_4, %c0_5] : memref<1x32xf32, #tpu.memory_space<vmem>>, vector<1x32xf32>
    %cst_6 = arith.constant 0.000000e+00 : f32
    %6 = vector.broadcast %cst_6 : f32 to vector<2x2x36x32xf32>
    %c0_7 = arith.constant 0 : index
    %c0_8 = arith.constant 0 : index
    %c0_9 = arith.constant 0 : index
    %c0_10 = arith.constant 0 : index
    %7 = vector.load %arg11[%c0_7, %c0_8, %c0_9, %c0_10] : memref<2x2x36x32xf32, #tpu.memory_space<vmem>>, vector<2x2x36x32xf32>
    tpu.vector_store %arg11[%c0_7, %c0_8, %c0_9, %c0_10], %6 {strides = array<i32>} : memref<2x2x36x32xf32, #tpu.memory_space<vmem>>, vector<2x2x36x32xf32>,
    %8 = vector.extract_strided_slice %4 {offsets = [0, 0], sizes = [16, 32], strides = [1, 1]} : vector<256x32xf32> to vector<16x32xf32>
    %9 = vector.extract_strided_slice %4 {offsets = [16, 0], sizes = [16, 32], strides = [1, 1]} : vector<256x32xf32> to vector<16x32xf32>
    %10 = arith.maximumf %8, %9 : vector<16x32xf32>
    %11 = vector.extract_strided_slice %4 {offsets = [64, 0], sizes = [16, 32], strides = [1, 1]} : vector<256x32xf32> to vector<16x32xf32>
    %12 = arith.maximumf %10, %11 : vector<16x32xf32>
    %13 = vector.extract_strided_slice %4 {offsets = [80, 0], sizes = [16, 32], strides = [1, 1]} : vector<256x32xf32> to vector<16x32xf32>
    %14 = arith.maximumf %12, %13 : vector<16x32xf32>
    %15 = vector.broadcast %5 : vector<1x32xf32> to vector<16x32xf32>
    %16 = arith.addf %14, %15 : vector<16x32xf32>
    %cst_11 = arith.constant 0.000000e+00 : f32
    %17 = vector.broadcast %cst_11 : f32 to vector<16x32xf32>
    %18 = arith.maximumf %16, %17 : vector<16x32xf32>
    %19 = vector.extract_strided_slice %18 {offsets = [0, 0], sizes = [4, 32], strides = [1, 1]} : vector<16x32xf32> to vector<4x32xf32>
    %c0_12 = arith.constant 0 : index
    %c0_13 = arith.constant 0 : index
    %c7 = arith.constant 7 : index
    %c0_14 = arith.constant 0 : index
    %20 = vector.load %arg11[%c0_12, %c0_13, %c7, %c0_14] : memref<2x2x36x32xf32, #tpu.memory_space<vmem>>, vector<1x1x4x32xf32>
    %21 = vector.shape_cast %20 : vector<1x1x4x32xf32> to vector<4x32xf32>
    %22 = vector.shape_cast %19 : vector<4x32xf32> to vector<1x1x4x32xf32>
    tpu.vector_store %arg11[%c0_12, %c0_13, %c7, %c0_14], %22 {strides = array<i32>} : memref<2x2x36x32xf32, #tpu.memory_space<vmem>>, vector<1x1x4x32xf32>,
    %23 = vector.extract_strided_slice %18 {offsets = [4, 0], sizes = [4, 32], strides = [1, 1]} : vector<16x32xf32> to vector<4x32xf32>
    %c0_15 = arith.constant 0 : index
    %c0_16 = arith.constant 0 : index
    %c13 = arith.constant 13 : index
    %c0_17 = arith.constant 0 : index
    %24 = vector.load %arg11[%c0_15, %c0_16, %c13, %c0_17] : memref<2x2x36x32xf32, #tpu.memory_space<vmem>>, vector<1x1x4x32xf32>
    %25 = vector.shape_cast %24 : vector<1x1x4x32xf32> to vector<4x32xf32>
    %26 = vector.shape_cast %23 : vector<4x32xf32> to vector<1x1x4x32xf32>
    tpu.vector_store %arg11[%c0_15, %c0_16, %c13, %c0_17], %26 {strides = array<i32>} : memref<2x2x36x32xf32, #tpu.memory_space<vmem>>, vector<1x1x4x32xf32>,
    %27 = vector.extract_strided_slice %18 {offsets = [8, 0], sizes = [4, 32], strides = [1, 1]} : vector<16x32xf32> to vector<4x32xf32>
    %c0_18 = arith.constant 0 : index
    %c0_19 = arith.constant 0 : index
    %c19 = arith.constant 19 : index
    %c0_20 = arith.constant 0 : index
    %28 = vector.load %arg11[%c0_18, %c0_19, %c19, %c0_20] : memref<2x2x36x32xf32, #tpu.memory_space<vmem>>, vector<1x1x4x32xf32>
    %29 = vector.shape_cast %28 : vector<1x1x4x32xf32> to vector<4x32xf32>
    %30 = vector.shape_cast %27 : vector<4x32xf32> to vector<1x1x4x32xf32>
    tpu.vector_store %arg11[%c0_18, %c0_19, %c19, %c0_20], %30 {strides = array<i32>} : memref<2x2x36x32xf32, #tpu.memory_space<vmem>>, vector<1x1x4x32xf32>,
    %31 = vector.extract_strided_slice %18 {offsets = [12, 0], sizes = [4, 32], strides = [1, 1]} : vector<16x32xf32> to vector<4x32xf32>
    %c0_21 = arith.constant 0 : index
    %c0_22 = arith.constant 0 : index
    %c25 = arith.constant 25 : index
    %c0_23 = arith.constant 0 : index
    %32 = vector.load %arg11[%c0_21, %c0_22, %c25, %c0_23] : memref<2x2x36x32xf32, #tpu.memory_space<vmem>>, vector<1x1x4x32xf32>
    %33 = vector.shape_cast %32 : vector<1x1x4x32xf32> to vector<4x32xf32>
    %34 = vector.shape_cast %31 : vector<4x32xf32> to vector<1x1x4x32xf32>
    tpu.vector_store %arg11[%c0_21, %c0_22, %c25, %c0_23], %34 {strides = array<i32>} : memref<2x2x36x32xf32, #tpu.memory_space<vmem>>, vector<1x1x4x32xf32>,
    %35 = vector.extract_strided_slice %4 {offsets = [32, 0], sizes = [16, 32], strides = [1, 1]} : vector<256x32xf32> to vector<16x32xf32>
    %36 = vector.extract_strided_slice %4 {offsets = [48, 0], sizes = [16, 32], strides = [1, 1]} : vector<256x32xf32> to vector<16x32xf32>
    %37 = arith.maximumf %35, %36 : vector<16x32xf32>
    %38 = vector.extract_strided_slice %4 {offsets = [96, 0], sizes = [16, 32], strides = [1, 1]} : vector<256x32xf32> to vector<16x32xf32>
    %39 = arith.maximumf %37, %38 : vector<16x32xf32>
    %40 = vector.extract_strided_slice %4 {offsets = [112, 0], sizes = [16, 32], strides = [1, 1]} : vector<256x32xf32> to vector<16x32xf32>
    %41 = arith.maximumf %39, %40 : vector<16x32xf32>
    %42 = vector.broadcast %5 : vector<1x32xf32> to vector<16x32xf32>
    %43 = arith.addf %41, %42 : vector<16x32xf32>
    %cst_24 = arith.constant 0.000000e+00 : f32
    %44 = vector.broadcast %cst_24 : f32 to vector<16x32xf32>
    %45 = arith.maximumf %43, %44 : vector<16x32xf32>
    %46 = vector.extract_strided_slice %45 {offsets = [0, 0], sizes = [4, 32], strides = [1, 1]} : vector<16x32xf32> to vector<4x32xf32>
    %c0_25 = arith.constant 0 : index
    %c1 = arith.constant 1 : index
    %c7_26 = arith.constant 7 : index
    %c0_27 = arith.constant 0 : index
    %47 = vector.load %arg11[%c0_25, %c1, %c7_26, %c0_27] : memref<2x2x36x32xf32, #tpu.memory_space<vmem>>, vector<1x1x4x32xf32>
    %48 = vector.shape_cast %47 : vector<1x1x4x32xf32> to vector<4x32xf32>
    %49 = vector.shape_cast %46 : vector<4x32xf32> to vector<1x1x4x32xf32>
    tpu.vector_store %arg11[%c0_25, %c1, %c7_26, %c0_27], %49 {strides = array<i32>} : memref<2x2x36x32xf32, #tpu.memory_space<vmem>>, vector<1x1x4x32xf32>,
    %50 = vector.extract_strided_slice %45 {offsets = [4, 0], sizes = [4, 32], strides = [1, 1]} : vector<16x32xf32> to vector<4x32xf32>
    %c0_28 = arith.constant 0 : index
    %c1_29 = arith.constant 1 : index
    %c13_30 = arith.constant 13 : index
    %c0_31 = arith.constant 0 : index
    %51 = vector.load %arg11[%c0_28, %c1_29, %c13_30, %c0_31] : memref<2x2x36x32xf32, #tpu.memory_space<vmem>>, vector<1x1x4x32xf32>
    %52 = vector.shape_cast %51 : vector<1x1x4x32xf32> to vector<4x32xf32>
    %53 = vector.shape_cast %50 : vector<4x32xf32> to vector<1x1x4x32xf32>
    tpu.vector_store %arg11[%c0_28, %c1_29, %c13_30, %c0_31], %53 {strides = array<i32>} : memref<2x2x36x32xf32, #tpu.memory_space<vmem>>, vector<1x1x4x32xf32>,
    %54 = vector.extract_strided_slice %45 {offsets = [8, 0], sizes = [4, 32], strides = [1, 1]} : vector<16x32xf32> to vector<4x32xf32>
    %c0_32 = arith.constant 0 : index
    %c1_33 = arith.constant 1 : index
    %c19_34 = arith.constant 19 : index
    %c0_35 = arith.constant 0 : index
    %55 = vector.load %arg11[%c0_32, %c1_33, %c19_34, %c0_35] : memref<2x2x36x32xf32, #tpu.memory_space<vmem>>, vector<1x1x4x32xf32>
    %56 = vector.shape_cast %55 : vector<1x1x4x32xf32> to vector<4x32xf32>
    %57 = vector.shape_cast %54 : vector<4x32xf32> to vector<1x1x4x32xf32>
    tpu.vector_store %arg11[%c0_32, %c1_33, %c19_34, %c0_35], %57 {strides = array<i32>} : memref<2x2x36x32xf32, #tpu.memory_space<vmem>>, vector<1x1x4x32xf32>,
    %58 = vector.extract_strided_slice %45 {offsets = [12, 0], sizes = [4, 32], strides = [1, 1]} : vector<16x32xf32> to vector<4x32xf32>
    %c0_36 = arith.constant 0 : index
    %c1_37 = arith.constant 1 : index
    %c25_38 = arith.constant 25 : index
    %c0_39 = arith.constant 0 : index
    %59 = vector.load %arg11[%c0_36, %c1_37, %c25_38, %c0_39] : memref<2x2x36x32xf32, #tpu.memory_space<vmem>>, vector<1x1x4x32xf32>
    %60 = vector.shape_cast %59 : vector<1x1x4x32xf32> to vector<4x32xf32>
    %61 = vector.shape_cast %58 : vector<4x32xf32> to vector<1x1x4x32xf32>
    tpu.vector_store %arg11[%c0_36, %c1_37, %c25_38, %c0_39], %61 {strides = array<i32>} : memref<2x2x36x32xf32, #tpu.memory_space<vmem>>, vector<1x1x4x32xf32>,
    %62 = vector.extract_strided_slice %4 {offsets = [128, 0], sizes = [16, 32], strides = [1, 1]} : vector<256x32xf32> to vector<16x32xf32>
    %63 = vector.extract_strided_slice %4 {offsets = [144, 0], sizes = [16, 32], strides = [1, 1]} : vector<256x32xf32> to vector<16x32xf32>
    %64 = arith.maximumf %62, %63 : vector<16x32xf32>
    %65 = vector.extract_strided_slice %4 {offsets = [192, 0], sizes = [16, 32], strides = [1, 1]} : vector<256x32xf32> to vector<16x32xf32>
    %66 = arith.maximumf %64, %65 : vector<16x32xf32>
    %67 = vector.extract_strided_slice %4 {offsets = [208, 0], sizes = [16, 32], strides = [1, 1]} : vector<256x32xf32> to vector<16x32xf32>
    %68 = arith.maximumf %66, %67 : vector<16x32xf32>
    %69 = vector.broadcast %5 : vector<1x32xf32> to vector<16x32xf32>
    %70 = arith.addf %68, %69 : vector<16x32xf32>
    %cst_40 = arith.constant 0.000000e+00 : f32
    %71 = vector.broadcast %cst_40 : f32 to vector<16x32xf32>
    %72 = arith.maximumf %70, %71 : vector<16x32xf32>
    %73 = vector.extract_strided_slice %72 {offsets = [0, 0], sizes = [4, 32], strides = [1, 1]} : vector<16x32xf32> to vector<4x32xf32>
    %c1_41 = arith.constant 1 : index
    %c0_42 = arith.constant 0 : index
    %c7_43 = arith.constant 7 : index
    %c0_44 = arith.constant 0 : index
    %74 = vector.load %arg11[%c1_41, %c0_42, %c7_43, %c0_44] : memref<2x2x36x32xf32, #tpu.memory_space<vmem>>, vector<1x1x4x32xf32>
    %75 = vector.shape_cast %74 : vector<1x1x4x32xf32> to vector<4x32xf32>
    %76 = vector.shape_cast %73 : vector<4x32xf32> to vector<1x1x4x32xf32>
    tpu.vector_store %arg11[%c1_41, %c0_42, %c7_43, %c0_44], %76 {strides = array<i32>} : memref<2x2x36x32xf32, #tpu.memory_space<vmem>>, vector<1x1x4x32xf32>,
    %77 = vector.extract_strided_slice %72 {offsets = [4, 0], sizes = [4, 32], strides = [1, 1]} : vector<16x32xf32> to vector<4x32xf32>
    %c1_45 = arith.constant 1 : index
    %c0_46 = arith.constant 0 : index
    %c13_47 = arith.constant 13 : index
    %c0_48 = arith.constant 0 : index
    %78 = vector.load %arg11[%c1_45, %c0_46, %c13_47, %c0_48] : memref<2x2x36x32xf32, #tpu.memory_space<vmem>>, vector<1x1x4x32xf32>
    %79 = vector.shape_cast %78 : vector<1x1x4x32xf32> to vector<4x32xf32>
    %80 = vector.shape_cast %77 : vector<4x32xf32> to vector<1x1x4x32xf32>
    tpu.vector_store %arg11[%c1_45, %c0_46, %c13_47, %c0_48], %80 {strides = array<i32>} : memref<2x2x36x32xf32, #tpu.memory_space<vmem>>, vector<1x1x4x32xf32>,
    %81 = vector.extract_strided_slice %72 {offsets = [8, 0], sizes = [4, 32], strides = [1, 1]} : vector<16x32xf32> to vector<4x32xf32>
    %c1_49 = arith.constant 1 : index
    %c0_50 = arith.constant 0 : index
    %c19_51 = arith.constant 19 : index
    %c0_52 = arith.constant 0 : index
    %82 = vector.load %arg11[%c1_49, %c0_50, %c19_51, %c0_52] : memref<2x2x36x32xf32, #tpu.memory_space<vmem>>, vector<1x1x4x32xf32>
    %83 = vector.shape_cast %82 : vector<1x1x4x32xf32> to vector<4x32xf32>
    %84 = vector.shape_cast %81 : vector<4x32xf32> to vector<1x1x4x32xf32>
    tpu.vector_store %arg11[%c1_49, %c0_50, %c19_51, %c0_52], %84 {strides = array<i32>} : memref<2x2x36x32xf32, #tpu.memory_space<vmem>>, vector<1x1x4x32xf32>,
    %85 = vector.extract_strided_slice %72 {offsets = [12, 0], sizes = [4, 32], strides = [1, 1]} : vector<16x32xf32> to vector<4x32xf32>
    %c1_53 = arith.constant 1 : index
    %c0_54 = arith.constant 0 : index
    %c25_55 = arith.constant 25 : index
    %c0_56 = arith.constant 0 : index
    %86 = vector.load %arg11[%c1_53, %c0_54, %c25_55, %c0_56] : memref<2x2x36x32xf32, #tpu.memory_space<vmem>>, vector<1x1x4x32xf32>
    %87 = vector.shape_cast %86 : vector<1x1x4x32xf32> to vector<4x32xf32>
    %88 = vector.shape_cast %85 : vector<4x32xf32> to vector<1x1x4x32xf32>
    tpu.vector_store %arg11[%c1_53, %c0_54, %c25_55, %c0_56], %88 {strides = array<i32>} : memref<2x2x36x32xf32, #tpu.memory_space<vmem>>, vector<1x1x4x32xf32>,
    %89 = vector.extract_strided_slice %4 {offsets = [160, 0], sizes = [16, 32], strides = [1, 1]} : vector<256x32xf32> to vector<16x32xf32>
    %90 = vector.extract_strided_slice %4 {offsets = [176, 0], sizes = [16, 32], strides = [1, 1]} : vector<256x32xf32> to vector<16x32xf32>
    %91 = arith.maximumf %89, %90 : vector<16x32xf32>
    %92 = vector.extract_strided_slice %4 {offsets = [224, 0], sizes = [16, 32], strides = [1, 1]} : vector<256x32xf32> to vector<16x32xf32>
    %93 = arith.maximumf %91, %92 : vector<16x32xf32>
    %94 = vector.extract_strided_slice %4 {offsets = [240, 0], sizes = [16, 32], strides = [1, 1]} : vector<256x32xf32> to vector<16x32xf32>
    %95 = arith.maximumf %93, %94 : vector<16x32xf32>
    %96 = vector.broadcast %5 : vector<1x32xf32> to vector<16x32xf32>
    %97 = arith.addf %95, %96 : vector<16x32xf32>
    %cst_57 = arith.constant 0.000000e+00 : f32
    %98 = vector.broadcast %cst_57 : f32 to vector<16x32xf32>
    %99 = arith.maximumf %97, %98 : vector<16x32xf32>
    %100 = vector.extract_strided_slice %99 {offsets = [0, 0], sizes = [4, 32], strides = [1, 1]} : vector<16x32xf32> to vector<4x32xf32>
    %c1_58 = arith.constant 1 : index
    %c1_59 = arith.constant 1 : index
    %c7_60 = arith.constant 7 : index
    %c0_61 = arith.constant 0 : index
    %101 = vector.load %arg11[%c1_58, %c1_59, %c7_60, %c0_61] : memref<2x2x36x32xf32, #tpu.memory_space<vmem>>, vector<1x1x4x32xf32>
    %102 = vector.shape_cast %101 : vector<1x1x4x32xf32> to vector<4x32xf32>
    %103 = vector.shape_cast %100 : vector<4x32xf32> to vector<1x1x4x32xf32>
    tpu.vector_store %arg11[%c1_58, %c1_59, %c7_60, %c0_61], %103 {strides = array<i32>} : memref<2x2x36x32xf32, #tpu.memory_space<vmem>>, vector<1x1x4x32xf32>,
    %104 = vector.extract_strided_slice %99 {offsets = [4, 0], sizes = [4, 32], strides = [1, 1]} : vector<16x32xf32> to vector<4x32xf32>
    %c1_62 = arith.constant 1 : index
    %c1_63 = arith.constant 1 : index
    %c13_64 = arith.constant 13 : index
    %c0_65 = arith.constant 0 : index
    %105 = vector.load %arg11[%c1_62, %c1_63, %c13_64, %c0_65] : memref<2x2x36x32xf32, #tpu.memory_space<vmem>>, vector<1x1x4x32xf32>
    %106 = vector.shape_cast %105 : vector<1x1x4x32xf32> to vector<4x32xf32>
    %107 = vector.shape_cast %104 : vector<4x32xf32> to vector<1x1x4x32xf32>
    tpu.vector_store %arg11[%c1_62, %c1_63, %c13_64, %c0_65], %107 {strides = array<i32>} : memref<2x2x36x32xf32, #tpu.memory_space<vmem>>, vector<1x1x4x32xf32>,
    %108 = vector.extract_strided_slice %99 {offsets = [8, 0], sizes = [4, 32], strides = [1, 1]} : vector<16x32xf32> to vector<4x32xf32>
    %c1_66 = arith.constant 1 : index
    %c1_67 = arith.constant 1 : index
    %c19_68 = arith.constant 19 : index
    %c0_69 = arith.constant 0 : index
    %109 = vector.load %arg11[%c1_66, %c1_67, %c19_68, %c0_69] : memref<2x2x36x32xf32, #tpu.memory_space<vmem>>, vector<1x1x4x32xf32>
    %110 = vector.shape_cast %109 : vector<1x1x4x32xf32> to vector<4x32xf32>
    %111 = vector.shape_cast %108 : vector<4x32xf32> to vector<1x1x4x32xf32>
    tpu.vector_store %arg11[%c1_66, %c1_67, %c19_68, %c0_69], %111 {strides = array<i32>} : memref<2x2x36x32xf32, #tpu.memory_space<vmem>>, vector<1x1x4x32xf32>,
    %112 = vector.extract_strided_slice %99 {offsets = [12, 0], sizes = [4, 32], strides = [1, 1]} : vector<16x32xf32> to vector<4x32xf32>
    %c1_70 = arith.constant 1 : index
    %c1_71 = arith.constant 1 : index
    %c25_72 = arith.constant 25 : index
    %c0_73 = arith.constant 0 : index
    %113 = vector.load %arg11[%c1_70, %c1_71, %c25_72, %c0_73] : memref<2x2x36x32xf32, #tpu.memory_space<vmem>>, vector<1x1x4x32xf32>
    %114 = vector.shape_cast %113 : vector<1x1x4x32xf32> to vector<4x32xf32>
    %115 = vector.shape_cast %112 : vector<4x32xf32> to vector<1x1x4x32xf32>
    tpu.vector_store %arg11[%c1_70, %c1_71, %c25_72, %c0_73], %115 {strides = array<i32>} : memref<2x2x36x32xf32, #tpu.memory_space<vmem>>, vector<1x1x4x32xf32>,
    %c1_74 = arith.constant 1 : index
    %c1_75 = arith.constant 1 : index
    %c0_76 = arith.constant 0 : index
    %c0_77 = arith.constant 0 : index
    %116 = vector.load %arg11[%c1_74, %c1_75, %c0_76, %c0_77] : memref<2x2x36x32xf32, #tpu.memory_space<vmem>>, vector<1x1x4x32xf32>
    %117 = vector.shape_cast %116 : vector<1x1x4x32xf32> to vector<4x32xf32>
    %c0_78 = arith.constant 0 : index
    %c0_79 = arith.constant 0 : index
    %118 = vector.load %arg12[%c0_78, %c0_79] : memref<64x288xf32, #tpu.memory_space<vmem>>, vector<4x32xf32>
    tpu.vector_store %arg12[%c0_78, %c0_79], %117 {strides = array<i32>} : memref<64x288xf32, #tpu.memory_space<vmem>>, vector<4x32xf32>,
    %c1_80 = arith.constant 1 : index
    %c1_81 = arith.constant 1 : index
    %c6 = arith.constant 6 : index
    %c0_82 = arith.constant 0 : index
    %119 = vector.load %arg11[%c1_80, %c1_81, %c6, %c0_82] : memref<2x2x36x32xf32, #tpu.memory_space<vmem>>, vector<1x1x4x32xf32>
    %120 = vector.shape_cast %119 : vector<1x1x4x32xf32> to vector<4x32xf32>
    %c4 = arith.constant 4 : index
    %c0_83 = arith.constant 0 : index
    %121 = vector.load %arg12[%c4, %c0_83] : memref<64x288xf32, #tpu.memory_space<vmem>>, vector<4x32xf32>
    tpu.vector_store %arg12[%c4, %c0_83], %120 {strides = array<i32>} : memref<64x288xf32, #tpu.memory_space<vmem>>, vector<4x32xf32>,
    %c1_84 = arith.constant 1 : index
    %c1_85 = arith.constant 1 : index
    %c12 = arith.constant 12 : index
    %c0_86 = arith.constant 0 : index
    %122 = vector.load %arg11[%c1_84, %c1_85, %c12, %c0_86] : memref<2x2x36x32xf32, #tpu.memory_space<vmem>>, vector<1x1x4x32xf32>
    %123 = vector.shape_cast %122 : vector<1x1x4x32xf32> to vector<4x32xf32>
    %c8 = arith.constant 8 : index
    %c0_87 = arith.constant 0 : index
    %124 = vector.load %arg12[%c8, %c0_87] : memref<64x288xf32, #tpu.memory_space<vmem>>, vector<4x32xf32>
    tpu.vector_store %arg12[%c8, %c0_87], %123 {strides = array<i32>} : memref<64x288xf32, #tpu.memory_space<vmem>>, vector<4x32xf32>,
    %c1_88 = arith.constant 1 : index
    %c1_89 = arith.constant 1 : index
    %c18 = arith.constant 18 : index
    %c0_90 = arith.constant 0 : index
    %125 = vector.load %arg11[%c1_88, %c1_89, %c18, %c0_90] : memref<2x2x36x32xf32, #tpu.memory_space<vmem>>, vector<1x1x4x32xf32>
    %126 = vector.shape_cast %125 : vector<1x1x4x32xf32> to vector<4x32xf32>
    %c12_91 = arith.constant 12 : index
    %c0_92 = arith.constant 0 : index
    %127 = vector.load %arg12[%c12_91, %c0_92] : memref<64x288xf32, #tpu.memory_space<vmem>>, vector<4x32xf32>
    tpu.vector_store %arg12[%c12_91, %c0_92], %126 {strides = array<i32>} : memref<64x288xf32, #tpu.memory_space<vmem>>, vector<4x32xf32>,
    %c1_93 = arith.constant 1 : index
    %c0_94 = arith.constant 0 : index
    %c1_95 = arith.constant 1 : index
    %c0_96 = arith.constant 0 : index
    %128 = vector.load %arg11[%c1_93, %c0_94, %c1_95, %c0_96] : memref<2x2x36x32xf32, #tpu.memory_space<vmem>>, vector<1x1x4x32xf32>
    %129 = vector.shape_cast %128 : vector<1x1x4x32xf32> to vector<4x32xf32>
    %c0_97 = arith.constant 0 : index
    %c32 = arith.constant 32 : index
    %130 = vector.load %arg12[%c0_97, %c32] : memref<64x288xf32, #tpu.memory_space<vmem>>, vector<4x32xf32>
    tpu.vector_store %arg12[%c0_97, %c32], %129 {strides = array<i32>} : memref<64x288xf32, #tpu.memory_space<vmem>>, vector<4x32xf32>,
    %c1_98 = arith.constant 1 : index
    %c0_99 = arith.constant 0 : index
    %c7_100 = arith.constant 7 : index
    %c0_101 = arith.constant 0 : index
    %131 = vector.load %arg11[%c1_98, %c0_99, %c7_100, %c0_101] : memref<2x2x36x32xf32, #tpu.memory_space<vmem>>, vector<1x1x4x32xf32>
    %132 = vector.shape_cast %131 : vector<1x1x4x32xf32> to vector<4x32xf32>
    %c4_102 = arith.constant 4 : index
    %c32_103 = arith.constant 32 : index
    %133 = vector.load %arg12[%c4_102, %c32_103] : memref<64x288xf32, #tpu.memory_space<vmem>>, vector<4x32xf32>
    tpu.vector_store %arg12[%c4_102, %c32_103], %132 {strides = array<i32>} : memref<64x288xf32, #tpu.memory_space<vmem>>, vector<4x32xf32>,
    %c1_104 = arith.constant 1 : index
    %c0_105 = arith.constant 0 : index
    %c13_106 = arith.constant 13 : index
    %c0_107 = arith.constant 0 : index
    %134 = vector.load %arg11[%c1_104, %c0_105, %c13_106, %c0_107] : memref<2x2x36x32xf32, #tpu.memory_space<vmem>>, vector<1x1x4x32xf32>
    %135 = vector.shape_cast %134 : vector<1x1x4x32xf32> to vector<4x32xf32>
    %c8_108 = arith.constant 8 : index
    %c32_109 = arith.constant 32 : index
    %136 = vector.load %arg12[%c8_108, %c32_109] : memref<64x288xf32, #tpu.memory_space<vmem>>, vector<4x32xf32>
    tpu.vector_store %arg12[%c8_108, %c32_109], %135 {strides = array<i32>} : memref<64x288xf32, #tpu.memory_space<vmem>>, vector<4x32xf32>,
    %c1_110 = arith.constant 1 : index
    %c0_111 = arith.constant 0 : index
    %c19_112 = arith.constant 19 : index
    %c0_113 = arith.constant 0 : index
    %137 = vector.load %arg11[%c1_110, %c0_111, %c19_112, %c0_113] : memref<2x2x36x32xf32, #tpu.memory_space<vmem>>, vector<1x1x4x32xf32>
    %138 = vector.shape_cast %137 : vector<1x1x4x32xf32> to vector<4x32xf32>
    %c12_114 = arith.constant 12 : index
    %c32_115 = arith.constant 32 : index
    %139 = vector.load %arg12[%c12_114, %c32_115] : memref<64x288xf32, #tpu.memory_space<vmem>>, vector<4x32xf32>
    tpu.vector_store %arg12[%c12_114, %c32_115], %138 {strides = array<i32>} : memref<64x288xf32, #tpu.memory_space<vmem>>, vector<4x32xf32>,
    %c1_116 = arith.constant 1 : index
    %c1_117 = arith.constant 1 : index
    %c1_118 = arith.constant 1 : index
    %c0_119 = arith.constant 0 : index
    %140 = vector.load %arg11[%c1_116, %c1_117, %c1_118, %c0_119] : memref<2x2x36x32xf32, #tpu.memory_space<vmem>>, vector<1x1x4x32xf32>
    %141 = vector.shape_cast %140 : vector<1x1x4x32xf32> to vector<4x32xf32>
    %c0_120 = arith.constant 0 : index
    %c64 = arith.constant 64 : index
    %142 = vector.load %arg12[%c0_120, %c64] : memref<64x288xf32, #tpu.memory_space<vmem>>, vector<4x32xf32>
    tpu.vector_store %arg12[%c0_120, %c64], %141 {strides = array<i32>} : memref<64x288xf32, #tpu.memory_space<vmem>>, vector<4x32xf32>,
    %c1_121 = arith.constant 1 : index
    %c1_122 = arith.constant 1 : index
    %c7_123 = arith.constant 7 : index
    %c0_124 = arith.constant 0 : index
    %143 = vector.load %arg11[%c1_121, %c1_122, %c7_123, %c0_124] : memref<2x2x36x32xf32, #tpu.memory_space<vmem>>, vector<1x1x4x32xf32>
    %144 = vector.shape_cast %143 : vector<1x1x4x32xf32> to vector<4x32xf32>
    %c4_125 = arith.constant 4 : index
    %c64_126 = arith.constant 64 : index
    %145 = vector.load %arg12[%c4_125, %c64_126] : memref<64x288xf32, #tpu.memory_space<vmem>>, vector<4x32xf32>
    tpu.vector_store %arg12[%c4_125, %c64_126], %144 {strides = array<i32>} : memref<64x288xf32, #tpu.memory_space<vmem>>, vector<4x32xf32>,
    %c1_127 = arith.constant 1 : index
    %c1_128 = arith.constant 1 : index
    %c13_129 = arith.constant 13 : index
    %c0_130 = arith.constant 0 : index
    %146 = vector.load %arg11[%c1_127, %c1_128, %c13_129, %c0_130] : memref<2x2x36x32xf32, #tpu.memory_space<vmem>>, vector<1x1x4x32xf32>
    %147 = vector.shape_cast %146 : vector<1x1x4x32xf32> to vector<4x32xf32>
    %c8_131 = arith.constant 8 : index
    %c64_132 = arith.constant 64 : index
    %148 = vector.load %arg12[%c8_131, %c64_132] : memref<64x288xf32, #tpu.memory_space<vmem>>, vector<4x32xf32>
    tpu.vector_store %arg12[%c8_131, %c64_132], %147 {strides = array<i32>} : memref<64x288xf32, #tpu.memory_space<vmem>>, vector<4x32xf32>,
    %c1_133 = arith.constant 1 : index
    %c1_134 = arith.constant 1 : index
    %c19_135 = arith.constant 19 : index
    %c0_136 = arith.constant 0 : index
    %149 = vector.load %arg11[%c1_133, %c1_134, %c19_135, %c0_136] : memref<2x2x36x32xf32, #tpu.memory_space<vmem>>, vector<1x1x4x32xf32>
    %150 = vector.shape_cast %149 : vector<1x1x4x32xf32> to vector<4x32xf32>
    %c12_137 = arith.constant 12 : index
    %c64_138 = arith.constant 64 : index
    %151 = vector.load %arg12[%c12_137, %c64_138] : memref<64x288xf32, #tpu.memory_space<vmem>>, vector<4x32xf32>
    tpu.vector_store %arg12[%c12_137, %c64_138], %150 {strides = array<i32>} : memref<64x288xf32, #tpu.memory_space<vmem>>, vector<4x32xf32>,
    %c0_139 = arith.constant 0 : index
    %c1_140 = arith.constant 1 : index
    %c6_141 = arith.constant 6 : index
    %c0_142 = arith.constant 0 : index
    %152 = vector.load %arg11[%c0_139, %c1_140, %c6_141, %c0_142] : memref<2x2x36x32xf32, #tpu.memory_space<vmem>>, vector<1x1x4x32xf32>
    %153 = vector.shape_cast %152 : vector<1x1x4x32xf32> to vector<4x32xf32>
    %c0_143 = arith.constant 0 : index
    %c96 = arith.constant 96 : index
    %154 = vector.load %arg12[%c0_143, %c96] : memref<64x288xf32, #tpu.memory_space<vmem>>, vector<4x32xf32>
    tpu.vector_store %arg12[%c0_143, %c96], %153 {strides = array<i32>} : memref<64x288xf32, #tpu.memory_space<vmem>>, vector<4x32xf32>,
    %c0_144 = arith.constant 0 : index
    %c1_145 = arith.constant 1 : index
    %c12_146 = arith.constant 12 : index
    %c0_147 = arith.constant 0 : index
    %155 = vector.load %arg11[%c0_144, %c1_145, %c12_146, %c0_147] : memref<2x2x36x32xf32, #tpu.memory_space<vmem>>, vector<1x1x4x32xf32>
    %156 = vector.shape_cast %155 : vector<1x1x4x32xf32> to vector<4x32xf32>
    %c4_148 = arith.constant 4 : index
    %c96_149 = arith.constant 96 : index
    %157 = vector.load %arg12[%c4_148, %c96_149] : memref<64x288xf32, #tpu.memory_space<vmem>>, vector<4x32xf32>
    tpu.vector_store %arg12[%c4_148, %c96_149], %156 {strides = array<i32>} : memref<64x288xf32, #tpu.memory_space<vmem>>, vector<4x32xf32>,
    %c0_150 = arith.constant 0 : index
    %c1_151 = arith.constant 1 : index
    %c18_152 = arith.constant 18 : index
    %c0_153 = arith.constant 0 : index
    %158 = vector.load %arg11[%c0_150, %c1_151, %c18_152, %c0_153] : memref<2x2x36x32xf32, #tpu.memory_space<vmem>>, vector<1x1x4x32xf32>
    %159 = vector.shape_cast %158 : vector<1x1x4x32xf32> to vector<4x32xf32>
    %c8_154 = arith.constant 8 : index
    %c96_155 = arith.constant 96 : index
    %160 = vector.load %arg12[%c8_154, %c96_155] : memref<64x288xf32, #tpu.memory_space<vmem>>, vector<4x32xf32>
    tpu.vector_store %arg12[%c8_154, %c96_155], %159 {strides = array<i32>} : memref<64x288xf32, #tpu.memory_space<vmem>>, vector<4x32xf32>,
    %c0_156 = arith.constant 0 : index
    %c1_157 = arith.constant 1 : index
    %c24 = arith.constant 24 : index
    %c0_158 = arith.constant 0 : index
    %161 = vector.load %arg11[%c0_156, %c1_157, %c24, %c0_158] : memref<2x2x36x32xf32, #tpu.memory_space<vmem>>, vector<1x1x4x32xf32>
    %162 = vector.shape_cast %161 : vector<1x1x4x32xf32> to vector<4x32xf32>
    %c12_159 = arith.constant 12 : index
    %c96_160 = arith.constant 96 : index
    %163 = vector.load %arg12[%c12_159, %c96_160] : memref<64x288xf32, #tpu.memory_space<vmem>>, vector<4x32xf32>
    tpu.vector_store %arg12[%c12_159, %c96_160], %162 {strides = array<i32>} : memref<64x288xf32, #tpu.memory_space<vmem>>, vector<4x32xf32>,
    %c0_161 = arith.constant 0 : index
    %c0_162 = arith.constant 0 : index
    %c7_163 = arith.constant 7 : index
    %c0_164 = arith.constant 0 : index
    %164 = vector.load %arg11[%c0_161, %c0_162, %c7_163, %c0_164] : memref<2x2x36x32xf32, #tpu.memory_space<vmem>>, vector<1x1x4x32xf32>
    %165 = vector.shape_cast %164 : vector<1x1x4x32xf32> to vector<4x32xf32>
    %c0_165 = arith.constant 0 : index
    %c128 = arith.constant 128 : index
    %166 = vector.load %arg12[%c0_165, %c128] : memref<64x288xf32, #tpu.memory_space<vmem>>, vector<4x32xf32>
    tpu.vector_store %arg12[%c0_165, %c128], %165 {strides = array<i32>} : memref<64x288xf32, #tpu.memory_space<vmem>>, vector<4x32xf32>,
    %c0_166 = arith.constant 0 : index
    %c0_167 = arith.constant 0 : index
    %c13_168 = arith.constant 13 : index
    %c0_169 = arith.constant 0 : index
    %167 = vector.load %arg11[%c0_166, %c0_167, %c13_168, %c0_169] : memref<2x2x36x32xf32, #tpu.memory_space<vmem>>, vector<1x1x4x32xf32>
    %168 = vector.shape_cast %167 : vector<1x1x4x32xf32> to vector<4x32xf32>
    %c4_170 = arith.constant 4 : index
    %c128_171 = arith.constant 128 : index
    %169 = vector.load %arg12[%c4_170, %c128_171] : memref<64x288xf32, #tpu.memory_space<vmem>>, vector<4x32xf32>
    tpu.vector_store %arg12[%c4_170, %c128_171], %168 {strides = array<i32>} : memref<64x288xf32, #tpu.memory_space<vmem>>, vector<4x32xf32>,
    %c0_172 = arith.constant 0 : index
    %c0_173 = arith.constant 0 : index
    %c19_174 = arith.constant 19 : index
    %c0_175 = arith.constant 0 : index
    %170 = vector.load %arg11[%c0_172, %c0_173, %c19_174, %c0_175] : memref<2x2x36x32xf32, #tpu.memory_space<vmem>>, vector<1x1x4x32xf32>
    %171 = vector.shape_cast %170 : vector<1x1x4x32xf32> to vector<4x32xf32>
    %c8_176 = arith.constant 8 : index
    %c128_177 = arith.constant 128 : index
    %172 = vector.load %arg12[%c8_176, %c128_177] : memref<64x288xf32, #tpu.memory_space<vmem>>, vector<4x32xf32>
    tpu.vector_store %arg12[%c8_176, %c128_177], %171 {strides = array<i32>} : memref<64x288xf32, #tpu.memory_space<vmem>>, vector<4x32xf32>,
    %c0_178 = arith.constant 0 : index
    %c0_179 = arith.constant 0 : index
    %c25_180 = arith.constant 25 : index
    %c0_181 = arith.constant 0 : index
    %173 = vector.load %arg11[%c0_178, %c0_179, %c25_180, %c0_181] : memref<2x2x36x32xf32, #tpu.memory_space<vmem>>, vector<1x1x4x32xf32>
    %174 = vector.shape_cast %173 : vector<1x1x4x32xf32> to vector<4x32xf32>
    %c12_182 = arith.constant 12 : index
    %c128_183 = arith.constant 128 : index
    %175 = vector.load %arg12[%c12_182, %c128_183] : memref<64x288xf32, #tpu.memory_space<vmem>>, vector<4x32xf32>
    tpu.vector_store %arg12[%c12_182, %c128_183], %174 {strides = array<i32>} : memref<64x288xf32, #tpu.memory_space<vmem>>, vector<4x32xf32>,
    %c0_184 = arith.constant 0 : index
    %c1_185 = arith.constant 1 : index
    %c7_186 = arith.constant 7 : index
    %c0_187 = arith.constant 0 : index
    %176 = vector.load %arg11[%c0_184, %c1_185, %c7_186, %c0_187] : memref<2x2x36x32xf32, #tpu.memory_space<vmem>>, vector<1x1x4x32xf32>
    %177 = vector.shape_cast %176 : vector<1x1x4x32xf32> to vector<4x32xf32>
    %c0_188 = arith.constant 0 : index
    %c160 = arith.constant 160 : index
    %178 = vector.load %arg12[%c0_188, %c160] : memref<64x288xf32, #tpu.memory_space<vmem>>, vector<4x32xf32>
    tpu.vector_store %arg12[%c0_188, %c160], %177 {strides = array<i32>} : memref<64x288xf32, #tpu.memory_space<vmem>>, vector<4x32xf32>,
    %c0_189 = arith.constant 0 : index
    %c1_190 = arith.constant 1 : index
    %c13_191 = arith.constant 13 : index
    %c0_192 = arith.constant 0 : index
    %179 = vector.load %arg11[%c0_189, %c1_190, %c13_191, %c0_192] : memref<2x2x36x32xf32, #tpu.memory_space<vmem>>, vector<1x1x4x32xf32>
    %180 = vector.shape_cast %179 : vector<1x1x4x32xf32> to vector<4x32xf32>
    %c4_193 = arith.constant 4 : index
    %c160_194 = arith.constant 160 : index
    %181 = vector.load %arg12[%c4_193, %c160_194] : memref<64x288xf32, #tpu.memory_space<vmem>>, vector<4x32xf32>
    tpu.vector_store %arg12[%c4_193, %c160_194], %180 {strides = array<i32>} : memref<64x288xf32, #tpu.memory_space<vmem>>, vector<4x32xf32>,
    %c0_195 = arith.constant 0 : index
    %c1_196 = arith.constant 1 : index
    %c19_197 = arith.constant 19 : index
    %c0_198 = arith.constant 0 : index
    %182 = vector.load %arg11[%c0_195, %c1_196, %c19_197, %c0_198] : memref<2x2x36x32xf32, #tpu.memory_space<vmem>>, vector<1x1x4x32xf32>
    %183 = vector.shape_cast %182 : vector<1x1x4x32xf32> to vector<4x32xf32>
    %c8_199 = arith.constant 8 : index
    %c160_200 = arith.constant 160 : index
    %184 = vector.load %arg12[%c8_199, %c160_200] : memref<64x288xf32, #tpu.memory_space<vmem>>, vector<4x32xf32>
    tpu.vector_store %arg12[%c8_199, %c160_200], %183 {strides = array<i32>} : memref<64x288xf32, #tpu.memory_space<vmem>>, vector<4x32xf32>,
    %c0_201 = arith.constant 0 : index
    %c1_202 = arith.constant 1 : index
    %c25_203 = arith.constant 25 : index
    %c0_204 = arith.constant 0 : index
    %185 = vector.load %arg11[%c0_201, %c1_202, %c25_203, %c0_204] : memref<2x2x36x32xf32, #tpu.memory_space<vmem>>, vector<1x1x4x32xf32>
    %186 = vector.shape_cast %185 : vector<1x1x4x32xf32> to vector<4x32xf32>
    %c12_205 = arith.constant 12 : index
    %c160_206 = arith.constant 160 : index
    %187 = vector.load %arg12[%c12_205, %c160_206] : memref<64x288xf32, #tpu.memory_space<vmem>>, vector<4x32xf32>
    tpu.vector_store %arg12[%c12_205, %c160_206], %186 {strides = array<i32>} : memref<64x288xf32, #tpu.memory_space<vmem>>, vector<4x32xf32>,
    %c1_207 = arith.constant 1 : index
    %c1_208 = arith.constant 1 : index
    %c6_209 = arith.constant 6 : index
    %c0_210 = arith.constant 0 : index
    %188 = vector.load %arg11[%c1_207, %c1_208, %c6_209, %c0_210] : memref<2x2x36x32xf32, #tpu.memory_space<vmem>>, vector<1x1x4x32xf32>
    %189 = vector.shape_cast %188 : vector<1x1x4x32xf32> to vector<4x32xf32>
    %c0_211 = arith.constant 0 : index
    %c192 = arith.constant 192 : index
    %190 = vector.load %arg12[%c0_211, %c192] : memref<64x288xf32, #tpu.memory_space<vmem>>, vector<4x32xf32>
    tpu.vector_store %arg12[%c0_211, %c192], %189 {strides = array<i32>} : memref<64x288xf32, #tpu.memory_space<vmem>>, vector<4x32xf32>,
    %c1_212 = arith.constant 1 : index
    %c1_213 = arith.constant 1 : index
    %c12_214 = arith.constant 12 : index
    %c0_215 = arith.constant 0 : index
    %191 = vector.load %arg11[%c1_212, %c1_213, %c12_214, %c0_215] : memref<2x2x36x32xf32, #tpu.memory_space<vmem>>, vector<1x1x4x32xf32>
    %192 = vector.shape_cast %191 : vector<1x1x4x32xf32> to vector<4x32xf32>
    %c4_216 = arith.constant 4 : index
    %c192_217 = arith.constant 192 : index
    %193 = vector.load %arg12[%c4_216, %c192_217] : memref<64x288xf32, #tpu.memory_space<vmem>>, vector<4x32xf32>
    tpu.vector_store %arg12[%c4_216, %c192_217], %192 {strides = array<i32>} : memref<64x288xf32, #tpu.memory_space<vmem>>, vector<4x32xf32>,
    %c1_218 = arith.constant 1 : index
    %c1_219 = arith.constant 1 : index
    %c18_220 = arith.constant 18 : index
    %c0_221 = arith.constant 0 : index
    %194 = vector.load %arg11[%c1_218, %c1_219, %c18_220, %c0_221] : memref<2x2x36x32xf32, #tpu.memory_space<vmem>>, vector<1x1x4x32xf32>
    %195 = vector.shape_cast %194 : vector<1x1x4x32xf32> to vector<4x32xf32>
    %c8_222 = arith.constant 8 : index
    %c192_223 = arith.constant 192 : index
    %196 = vector.load %arg12[%c8_222, %c192_223] : memref<64x288xf32, #tpu.memory_space<vmem>>, vector<4x32xf32>
    tpu.vector_store %arg12[%c8_222, %c192_223], %195 {strides = array<i32>} : memref<64x288xf32, #tpu.memory_space<vmem>>, vector<4x32xf32>,
    %c1_224 = arith.constant 1 : index
    %c1_225 = arith.constant 1 : index
    %c24_226 = arith.constant 24 : index
    %c0_227 = arith.constant 0 : index
    %197 = vector.load %arg11[%c1_224, %c1_225, %c24_226, %c0_227] : memref<2x2x36x32xf32, #tpu.memory_space<vmem>>, vector<1x1x4x32xf32>
    %198 = vector.shape_cast %197 : vector<1x1x4x32xf32> to vector<4x32xf32>
    %c12_228 = arith.constant 12 : index
    %c192_229 = arith.constant 192 : index
    %199 = vector.load %arg12[%c12_228, %c192_229] : memref<64x288xf32, #tpu.memory_space<vmem>>, vector<4x32xf32>
    tpu.vector_store %arg12[%c12_228, %c192_229], %198 {strides = array<i32>} : memref<64x288xf32, #tpu.memory_space<vmem>>, vector<4x32xf32>,
    %c1_230 = arith.constant 1 : index
    %c0_231 = arith.constant 0 : index
    %c7_232 = arith.constant 7 : index
    %c0_233 = arith.constant 0 : index
    %200 = vector.load %arg11[%c1_230, %c0_231, %c7_232, %c0_233] : memref<2x2x36x32xf32, #tpu.memory_space<vmem>>, vector<1x1x4x32xf32>
    %201 = vector.shape_cast %200 : vector<1x1x4x32xf32> to vector<4x32xf32>
    %c0_234 = arith.constant 0 : index
    %c224 = arith.constant 224 : index
    %202 = vector.load %arg12[%c0_234, %c224] : memref<64x288xf32, #tpu.memory_space<vmem>>, vector<4x32xf32>
    tpu.vector_store %arg12[%c0_234, %c224], %201 {strides = array<i32>} : memref<64x288xf32, #tpu.memory_space<vmem>>, vector<4x32xf32>,
    %c1_235 = arith.constant 1 : index
    %c0_236 = arith.constant 0 : index
    %c13_237 = arith.constant 13 : index
    %c0_238 = arith.constant 0 : index
    %203 = vector.load %arg11[%c1_235, %c0_236, %c13_237, %c0_238] : memref<2x2x36x32xf32, #tpu.memory_space<vmem>>, vector<1x1x4x32xf32>
    %204 = vector.shape_cast %203 : vector<1x1x4x32xf32> to vector<4x32xf32>
    %c4_239 = arith.constant 4 : index
    %c224_240 = arith.constant 224 : index
    %205 = vector.load %arg12[%c4_239, %c224_240] : memref<64x288xf32, #tpu.memory_space<vmem>>, vector<4x32xf32>
    tpu.vector_store %arg12[%c4_239, %c224_240], %204 {strides = array<i32>} : memref<64x288xf32, #tpu.memory_space<vmem>>, vector<4x32xf32>,
    %c1_241 = arith.constant 1 : index
    %c0_242 = arith.constant 0 : index
    %c19_243 = arith.constant 19 : index
    %c0_244 = arith.constant 0 : index
    %206 = vector.load %arg11[%c1_241, %c0_242, %c19_243, %c0_244] : memref<2x2x36x32xf32, #tpu.memory_space<vmem>>, vector<1x1x4x32xf32>
    %207 = vector.shape_cast %206 : vector<1x1x4x32xf32> to vector<4x32xf32>
    %c8_245 = arith.constant 8 : index
    %c224_246 = arith.constant 224 : index
    %208 = vector.load %arg12[%c8_245, %c224_246] : memref<64x288xf32, #tpu.memory_space<vmem>>, vector<4x32xf32>
    tpu.vector_store %arg12[%c8_245, %c224_246], %207 {strides = array<i32>} : memref<64x288xf32, #tpu.memory_space<vmem>>, vector<4x32xf32>,
    %c1_247 = arith.constant 1 : index
    %c0_248 = arith.constant 0 : index
    %c25_249 = arith.constant 25 : index
    %c0_250 = arith.constant 0 : index
    %209 = vector.load %arg11[%c1_247, %c0_248, %c25_249, %c0_250] : memref<2x2x36x32xf32, #tpu.memory_space<vmem>>, vector<1x1x4x32xf32>
    %210 = vector.shape_cast %209 : vector<1x1x4x32xf32> to vector<4x32xf32>
    %c12_251 = arith.constant 12 : index
    %c224_252 = arith.constant 224 : index
    %211 = vector.load %arg12[%c12_251, %c224_252] : memref<64x288xf32, #tpu.memory_space<vmem>>, vector<4x32xf32>
    tpu.vector_store %arg12[%c12_251, %c224_252], %210 {strides = array<i32>} : memref<64x288xf32, #tpu.memory_space<vmem>>, vector<4x32xf32>,
    %c1_253 = arith.constant 1 : index
    %c1_254 = arith.constant 1 : index
    %c7_255 = arith.constant 7 : index
    %c0_256 = arith.constant 0 : index
    %212 = vector.load %arg11[%c1_253, %c1_254, %c7_255, %c0_256] : memref<2x2x36x32xf32, #tpu.memory_space<vmem>>, vector<1x1x4x32xf32>
    %213 = vector.shape_cast %212 : vector<1x1x4x32xf32> to vector<4x32xf32>
    %c0_257 = arith.constant 0 : index
    %c256 = arith.constant 256 : index
    %214 = vector.load %arg12[%c0_257, %c256] : memref<64x288xf32, #tpu.memory_space<vmem>>, vector<4x32xf32>
    tpu.vector_store %arg12[%c0_257, %c256], %213 {strides = array<i32>} : memref<64x288xf32, #tpu.memory_space<vmem>>, vector<4x32xf32>,
    %c1_258 = arith.constant 1 : index
    %c1_259 = arith.constant 1 : index
    %c13_260 = arith.constant 13 : index
    %c0_261 = arith.constant 0 : index
    %215 = vector.load %arg11[%c1_258, %c1_259, %c13_260, %c0_261] : memref<2x2x36x32xf32, #tpu.memory_space<vmem>>, vector<1x1x4x32xf32>
    %216 = vector.shape_cast %215 : vector<1x1x4x32xf32> to vector<4x32xf32>
    %c4_262 = arith.constant 4 : index
    %c256_263 = arith.constant 256 : index
    %217 = vector.load %arg12[%c4_262, %c256_263] : memref<64x288xf32, #tpu.memory_space<vmem>>, vector<4x32xf32>
    tpu.vector_store %arg12[%c4_262, %c256_263], %216 {strides = array<i32>} : memref<64x288xf32, #tpu.memory_space<vmem>>, vector<4x32xf32>,
    %c1_264 = arith.constant 1 : index
    %c1_265 = arith.constant 1 : index
    %c19_266 = arith.constant 19 : index
    %c0_267 = arith.constant 0 : index
    %218 = vector.load %arg11[%c1_264, %c1_265, %c19_266, %c0_267] : memref<2x2x36x32xf32, #tpu.memory_space<vmem>>, vector<1x1x4x32xf32>
    %219 = vector.shape_cast %218 : vector<1x1x4x32xf32> to vector<4x32xf32>
    %c8_268 = arith.constant 8 : index
    %c256_269 = arith.constant 256 : index
    %220 = vector.load %arg12[%c8_268, %c256_269] : memref<64x288xf32, #tpu.memory_space<vmem>>, vector<4x32xf32>
    tpu.vector_store %arg12[%c8_268, %c256_269], %219 {strides = array<i32>} : memref<64x288xf32, #tpu.memory_space<vmem>>, vector<4x32xf32>,
    %c1_270 = arith.constant 1 : index
    %c1_271 = arith.constant 1 : index
    %c25_272 = arith.constant 25 : index
    %c0_273 = arith.constant 0 : index
    %221 = vector.load %arg11[%c1_270, %c1_271, %c25_272, %c0_273] : memref<2x2x36x32xf32, #tpu.memory_space<vmem>>, vector<1x1x4x32xf32>
    %222 = vector.shape_cast %221 : vector<1x1x4x32xf32> to vector<4x32xf32>
    %c12_274 = arith.constant 12 : index
    %c256_275 = arith.constant 256 : index
    %223 = vector.load %arg12[%c12_274, %c256_275] : memref<64x288xf32, #tpu.memory_space<vmem>>, vector<4x32xf32>
    tpu.vector_store %arg12[%c12_274, %c256_275], %222 {strides = array<i32>} : memref<64x288xf32, #tpu.memory_space<vmem>>, vector<4x32xf32>,
    %c1_276 = arith.constant 1 : index
    %c0_277 = arith.constant 0 : index
    %c1_278 = arith.constant 1 : index
    %c0_279 = arith.constant 0 : index
    %224 = vector.load %arg11[%c1_276, %c0_277, %c1_278, %c0_279] : memref<2x2x36x32xf32, #tpu.memory_space<vmem>>, vector<1x1x4x32xf32>
    %225 = vector.shape_cast %224 : vector<1x1x4x32xf32> to vector<4x32xf32>
    %c16 = arith.constant 16 : index
    %c0_280 = arith.constant 0 : index
    %226 = vector.load %arg12[%c16, %c0_280] : memref<64x288xf32, #tpu.memory_space<vmem>>, vector<4x32xf32>
    tpu.vector_store %arg12[%c16, %c0_280], %225 {strides = array<i32>} : memref<64x288xf32, #tpu.memory_space<vmem>>, vector<4x32xf32>,
    %c1_281 = arith.constant 1 : index
    %c0_282 = arith.constant 0 : index
    %c7_283 = arith.constant 7 : index
    %c0_284 = arith.constant 0 : index
    %227 = vector.load %arg11[%c1_281, %c0_282, %c7_283, %c0_284] : memref<2x2x36x32xf32, #tpu.memory_space<vmem>>, vector<1x1x4x32xf32>
    %228 = vector.shape_cast %227 : vector<1x1x4x32xf32> to vector<4x32xf32>
    %c20 = arith.constant 20 : index
    %c0_285 = arith.constant 0 : index
    %229 = vector.load %arg12[%c20, %c0_285] : memref<64x288xf32, #tpu.memory_space<vmem>>, vector<4x32xf32>
    tpu.vector_store %arg12[%c20, %c0_285], %228 {strides = array<i32>} : memref<64x288xf32, #tpu.memory_space<vmem>>, vector<4x32xf32>,
    %c1_286 = arith.constant 1 : index
    %c0_287 = arith.constant 0 : index
    %c13_288 = arith.constant 13 : index
    %c0_289 = arith.constant 0 : index
    %230 = vector.load %arg11[%c1_286, %c0_287, %c13_288, %c0_289] : memref<2x2x36x32xf32, #tpu.memory_space<vmem>>, vector<1x1x4x32xf32>
    %231 = vector.shape_cast %230 : vector<1x1x4x32xf32> to vector<4x32xf32>
    %c24_290 = arith.constant 24 : index
    %c0_291 = arith.constant 0 : index
    %232 = vector.load %arg12[%c24_290, %c0_291] : memref<64x288xf32, #tpu.memory_space<vmem>>, vector<4x32xf32>
    tpu.vector_store %arg12[%c24_290, %c0_291], %231 {strides = array<i32>} : memref<64x288xf32, #tpu.memory_space<vmem>>, vector<4x32xf32>,
    %c1_292 = arith.constant 1 : index
    %c0_293 = arith.constant 0 : index
    %c19_294 = arith.constant 19 : index
    %c0_295 = arith.constant 0 : index
    %233 = vector.load %arg11[%c1_292, %c0_293, %c19_294, %c0_295] : memref<2x2x36x32xf32, #tpu.memory_space<vmem>>, vector<1x1x4x32xf32>
    %234 = vector.shape_cast %233 : vector<1x1x4x32xf32> to vector<4x32xf32>
    %c28 = arith.constant 28 : index
    %c0_296 = arith.constant 0 : index
    %235 = vector.load %arg12[%c28, %c0_296] : memref<64x288xf32, #tpu.memory_space<vmem>>, vector<4x32xf32>
    tpu.vector_store %arg12[%c28, %c0_296], %234 {strides = array<i32>} : memref<64x288xf32, #tpu.memory_space<vmem>>, vector<4x32xf32>,
    %c1_297 = arith.constant 1 : index
    %c1_298 = arith.constant 1 : index
    %c1_299 = arith.constant 1 : index
    %c0_300 = arith.constant 0 : index
    %236 = vector.load %arg11[%c1_297, %c1_298, %c1_299, %c0_300] : memref<2x2x36x32xf32, #tpu.memory_space<vmem>>, vector<1x1x4x32xf32>
    %237 = vector.shape_cast %236 : vector<1x1x4x32xf32> to vector<4x32xf32>
    %c16_301 = arith.constant 16 : index
    %c32_302 = arith.constant 32 : index
    %238 = vector.load %arg12[%c16_301, %c32_302] : memref<64x288xf32, #tpu.memory_space<vmem>>, vector<4x32xf32>
    tpu.vector_store %arg12[%c16_301, %c32_302], %237 {strides = array<i32>} : memref<64x288xf32, #tpu.memory_space<vmem>>, vector<4x32xf32>,
    %c1_303 = arith.constant 1 : index
    %c1_304 = arith.constant 1 : index
    %c7_305 = arith.constant 7 : index
    %c0_306 = arith.constant 0 : index
    %239 = vector.load %arg11[%c1_303, %c1_304, %c7_305, %c0_306] : memref<2x2x36x32xf32, #tpu.memory_space<vmem>>, vector<1x1x4x32xf32>
    %240 = vector.shape_cast %239 : vector<1x1x4x32xf32> to vector<4x32xf32>
    %c20_307 = arith.constant 20 : index
    %c32_308 = arith.constant 32 : index
    %241 = vector.load %arg12[%c20_307, %c32_308] : memref<64x288xf32, #tpu.memory_space<vmem>>, vector<4x32xf32>
    tpu.vector_store %arg12[%c20_307, %c32_308], %240 {strides = array<i32>} : memref<64x288xf32, #tpu.memory_space<vmem>>, vector<4x32xf32>,
    %c1_309 = arith.constant 1 : index
    %c1_310 = arith.constant 1 : index
    %c13_311 = arith.constant 13 : index
    %c0_312 = arith.constant 0 : index
    %242 = vector.load %arg11[%c1_309, %c1_310, %c13_311, %c0_312] : memref<2x2x36x32xf32, #tpu.memory_space<vmem>>, vector<1x1x4x32xf32>
    %243 = vector.shape_cast %242 : vector<1x1x4x32xf32> to vector<4x32xf32>
    %c24_313 = arith.constant 24 : index
    %c32_314 = arith.constant 32 : index
    %244 = vector.load %arg12[%c24_313, %c32_314] : memref<64x288xf32, #tpu.memory_space<vmem>>, vector<4x32xf32>
    tpu.vector_store %arg12[%c24_313, %c32_314], %243 {strides = array<i32>} : memref<64x288xf32, #tpu.memory_space<vmem>>, vector<4x32xf32>,
    %c1_315 = arith.constant 1 : index
    %c1_316 = arith.constant 1 : index
    %c19_317 = arith.constant 19 : index
    %c0_318 = arith.constant 0 : index
    %245 = vector.load %arg11[%c1_315, %c1_316, %c19_317, %c0_318] : memref<2x2x36x32xf32, #tpu.memory_space<vmem>>, vector<1x1x4x32xf32>
    %246 = vector.shape_cast %245 : vector<1x1x4x32xf32> to vector<4x32xf32>
    %c28_319 = arith.constant 28 : index
    %c32_320 = arith.constant 32 : index
    %247 = vector.load %arg12[%c28_319, %c32_320] : memref<64x288xf32, #tpu.memory_space<vmem>>, vector<4x32xf32>
    tpu.vector_store %arg12[%c28_319, %c32_320], %246 {strides = array<i32>} : memref<64x288xf32, #tpu.memory_space<vmem>>, vector<4x32xf32>,
    %c1_321 = arith.constant 1 : index
    %c0_322 = arith.constant 0 : index
    %c2 = arith.constant 2 : index
    %c0_323 = arith.constant 0 : index
    %248 = vector.load %arg11[%c1_321, %c0_322, %c2, %c0_323] : memref<2x2x36x32xf32, #tpu.memory_space<vmem>>, vector<1x1x4x32xf32>
    %249 = vector.shape_cast %248 : vector<1x1x4x32xf32> to vector<4x32xf32>
    %c16_324 = arith.constant 16 : index
    %c64_325 = arith.constant 64 : index
    %250 = vector.load %arg12[%c16_324, %c64_325] : memref<64x288xf32, #tpu.memory_space<vmem>>, vector<4x32xf32>
    tpu.vector_store %arg12[%c16_324, %c64_325], %249 {strides = array<i32>} : memref<64x288xf32, #tpu.memory_space<vmem>>, vector<4x32xf32>,
    %c1_326 = arith.constant 1 : index
    %c0_327 = arith.constant 0 : index
    %c8_328 = arith.constant 8 : index
    %c0_329 = arith.constant 0 : index
    %251 = vector.load %arg11[%c1_326, %c0_327, %c8_328, %c0_329] : memref<2x2x36x32xf32, #tpu.memory_space<vmem>>, vector<1x1x4x32xf32>
    %252 = vector.shape_cast %251 : vector<1x1x4x32xf32> to vector<4x32xf32>
    %c20_330 = arith.constant 20 : index
    %c64_331 = arith.constant 64 : index
    %253 = vector.load %arg12[%c20_330, %c64_331] : memref<64x288xf32, #tpu.memory_space<vmem>>, vector<4x32xf32>
    tpu.vector_store %arg12[%c20_330, %c64_331], %252 {strides = array<i32>} : memref<64x288xf32, #tpu.memory_space<vmem>>, vector<4x32xf32>,
    %c1_332 = arith.constant 1 : index
    %c0_333 = arith.constant 0 : index
    %c14 = arith.constant 14 : index
    %c0_334 = arith.constant 0 : index
    %254 = vector.load %arg11[%c1_332, %c0_333, %c14, %c0_334] : memref<2x2x36x32xf32, #tpu.memory_space<vmem>>, vector<1x1x4x32xf32>
    %255 = vector.shape_cast %254 : vector<1x1x4x32xf32> to vector<4x32xf32>
    %c24_335 = arith.constant 24 : index
    %c64_336 = arith.constant 64 : index
    %256 = vector.load %arg12[%c24_335, %c64_336] : memref<64x288xf32, #tpu.memory_space<vmem>>, vector<4x32xf32>
    tpu.vector_store %arg12[%c24_335, %c64_336], %255 {strides = array<i32>} : memref<64x288xf32, #tpu.memory_space<vmem>>, vector<4x32xf32>,
    %c1_337 = arith.constant 1 : index
    %c0_338 = arith.constant 0 : index
    %c20_339 = arith.constant 20 : index
    %c0_340 = arith.constant 0 : index
    %257 = vector.load %arg11[%c1_337, %c0_338, %c20_339, %c0_340] : memref<2x2x36x32xf32, #tpu.memory_space<vmem>>, vector<1x1x4x32xf32>
    %258 = vector.shape_cast %257 : vector<1x1x4x32xf32> to vector<4x32xf32>
    %c28_341 = arith.constant 28 : index
    %c64_342 = arith.constant 64 : index
    %259 = vector.load %arg12[%c28_341, %c64_342] : memref<64x288xf32, #tpu.memory_space<vmem>>, vector<4x32xf32>
    tpu.vector_store %arg12[%c28_341, %c64_342], %258 {strides = array<i32>} : memref<64x288xf32, #tpu.memory_space<vmem>>, vector<4x32xf32>,
    %c0_343 = arith.constant 0 : index
    %c0_344 = arith.constant 0 : index
    %c7_345 = arith.constant 7 : index
    %c0_346 = arith.constant 0 : index
    %260 = vector.load %arg11[%c0_343, %c0_344, %c7_345, %c0_346] : memref<2x2x36x32xf32, #tpu.memory_space<vmem>>, vector<1x1x4x32xf32>
    %261 = vector.shape_cast %260 : vector<1x1x4x32xf32> to vector<4x32xf32>
    %c16_347 = arith.constant 16 : index
    %c96_348 = arith.constant 96 : index
    %262 = vector.load %arg12[%c16_347, %c96_348] : memref<64x288xf32, #tpu.memory_space<vmem>>, vector<4x32xf32>
    tpu.vector_store %arg12[%c16_347, %c96_348], %261 {strides = array<i32>} : memref<64x288xf32, #tpu.memory_space<vmem>>, vector<4x32xf32>,
    %c0_349 = arith.constant 0 : index
    %c0_350 = arith.constant 0 : index
    %c13_351 = arith.constant 13 : index
    %c0_352 = arith.constant 0 : index
    %263 = vector.load %arg11[%c0_349, %c0_350, %c13_351, %c0_352] : memref<2x2x36x32xf32, #tpu.memory_space<vmem>>, vector<1x1x4x32xf32>
    %264 = vector.shape_cast %263 : vector<1x1x4x32xf32> to vector<4x32xf32>
    %c20_353 = arith.constant 20 : index
    %c96_354 = arith.constant 96 : index
    %265 = vector.load %arg12[%c20_353, %c96_354] : memref<64x288xf32, #tpu.memory_space<vmem>>, vector<4x32xf32>
    tpu.vector_store %arg12[%c20_353, %c96_354], %264 {strides = array<i32>} : memref<64x288xf32, #tpu.memory_space<vmem>>, vector<4x32xf32>,
    %c0_355 = arith.constant 0 : index
    %c0_356 = arith.constant 0 : index
    %c19_357 = arith.constant 19 : index
    %c0_358 = arith.constant 0 : index
    %266 = vector.load %arg11[%c0_355, %c0_356, %c19_357, %c0_358] : memref<2x2x36x32xf32, #tpu.memory_space<vmem>>, vector<1x1x4x32xf32>
    %267 = vector.shape_cast %266 : vector<1x1x4x32xf32> to vector<4x32xf32>
    %c24_359 = arith.constant 24 : index
    %c96_360 = arith.constant 96 : index
    %268 = vector.load %arg12[%c24_359, %c96_360] : memref<64x288xf32, #tpu.memory_space<vmem>>, vector<4x32xf32>
    tpu.vector_store %arg12[%c24_359, %c96_360], %267 {strides = array<i32>} : memref<64x288xf32, #tpu.memory_space<vmem>>, vector<4x32xf32>,
    %c0_361 = arith.constant 0 : index
    %c0_362 = arith.constant 0 : index
    %c25_363 = arith.constant 25 : index
    %c0_364 = arith.constant 0 : index
    %269 = vector.load %arg11[%c0_361, %c0_362, %c25_363, %c0_364] : memref<2x2x36x32xf32, #tpu.memory_space<vmem>>, vector<1x1x4x32xf32>
    %270 = vector.shape_cast %269 : vector<1x1x4x32xf32> to vector<4x32xf32>
    %c28_365 = arith.constant 28 : index
    %c96_366 = arith.constant 96 : index
    %271 = vector.load %arg12[%c28_365, %c96_366] : memref<64x288xf32, #tpu.memory_space<vmem>>, vector<4x32xf32>
    tpu.vector_store %arg12[%c28_365, %c96_366], %270 {strides = array<i32>} : memref<64x288xf32, #tpu.memory_space<vmem>>, vector<4x32xf32>,
    %c0_367 = arith.constant 0 : index
    %c1_368 = arith.constant 1 : index
    %c7_369 = arith.constant 7 : index
    %c0_370 = arith.constant 0 : index
    %272 = vector.load %arg11[%c0_367, %c1_368, %c7_369, %c0_370] : memref<2x2x36x32xf32, #tpu.memory_space<vmem>>, vector<1x1x4x32xf32>
    %273 = vector.shape_cast %272 : vector<1x1x4x32xf32> to vector<4x32xf32>
    %c16_371 = arith.constant 16 : index
    %c128_372 = arith.constant 128 : index
    %274 = vector.load %arg12[%c16_371, %c128_372] : memref<64x288xf32, #tpu.memory_space<vmem>>, vector<4x32xf32>
    tpu.vector_store %arg12[%c16_371, %c128_372], %273 {strides = array<i32>} : memref<64x288xf32, #tpu.memory_space<vmem>>, vector<4x32xf32>,
    %c0_373 = arith.constant 0 : index
    %c1_374 = arith.constant 1 : index
    %c13_375 = arith.constant 13 : index
    %c0_376 = arith.constant 0 : index
    %275 = vector.load %arg11[%c0_373, %c1_374, %c13_375, %c0_376] : memref<2x2x36x32xf32, #tpu.memory_space<vmem>>, vector<1x1x4x32xf32>
    %276 = vector.shape_cast %275 : vector<1x1x4x32xf32> to vector<4x32xf32>
    %c20_377 = arith.constant 20 : index
    %c128_378 = arith.constant 128 : index
    %277 = vector.load %arg12[%c20_377, %c128_378] : memref<64x288xf32, #tpu.memory_space<vmem>>, vector<4x32xf32>
    tpu.vector_store %arg12[%c20_377, %c128_378], %276 {strides = array<i32>} : memref<64x288xf32, #tpu.memory_space<vmem>>, vector<4x32xf32>,
    %c0_379 = arith.constant 0 : index
    %c1_380 = arith.constant 1 : index
    %c19_381 = arith.constant 19 : index
    %c0_382 = arith.constant 0 : index
    %278 = vector.load %arg11[%c0_379, %c1_380, %c19_381, %c0_382] : memref<2x2x36x32xf32, #tpu.memory_space<vmem>>, vector<1x1x4x32xf32>
    %279 = vector.shape_cast %278 : vector<1x1x4x32xf32> to vector<4x32xf32>
    %c24_383 = arith.constant 24 : index
    %c128_384 = arith.constant 128 : index
    %280 = vector.load %arg12[%c24_383, %c128_384] : memref<64x288xf32, #tpu.memory_space<vmem>>, vector<4x32xf32>
    tpu.vector_store %arg12[%c24_383, %c128_384], %279 {strides = array<i32>} : memref<64x288xf32, #tpu.memory_space<vmem>>, vector<4x32xf32>,
    %c0_385 = arith.constant 0 : index
    %c1_386 = arith.constant 1 : index
    %c25_387 = arith.constant 25 : index
    %c0_388 = arith.constant 0 : index
    %281 = vector.load %arg11[%c0_385, %c1_386, %c25_387, %c0_388] : memref<2x2x36x32xf32, #tpu.memory_space<vmem>>, vector<1x1x4x32xf32>
    %282 = vector.shape_cast %281 : vector<1x1x4x32xf32> to vector<4x32xf32>
    %c28_389 = arith.constant 28 : index
    %c128_390 = arith.constant 128 : index
    %283 = vector.load %arg12[%c28_389, %c128_390] : memref<64x288xf32, #tpu.memory_space<vmem>>, vector<4x32xf32>
    tpu.vector_store %arg12[%c28_389, %c128_390], %282 {strides = array<i32>} : memref<64x288xf32, #tpu.memory_space<vmem>>, vector<4x32xf32>,
    %c0_391 = arith.constant 0 : index
    %c0_392 = arith.constant 0 : index
    %c8_393 = arith.constant 8 : index
    %c0_394 = arith.constant 0 : index
    %284 = vector.load %arg11[%c0_391, %c0_392, %c8_393, %c0_394] : memref<2x2x36x32xf32, #tpu.memory_space<vmem>>, vector<1x1x4x32xf32>
    %285 = vector.shape_cast %284 : vector<1x1x4x32xf32> to vector<4x32xf32>
    %c16_395 = arith.constant 16 : index
    %c160_396 = arith.constant 160 : index
    %286 = vector.load %arg12[%c16_395, %c160_396] : memref<64x288xf32, #tpu.memory_space<vmem>>, vector<4x32xf32>
    tpu.vector_store %arg12[%c16_395, %c160_396], %285 {strides = array<i32>} : memref<64x288xf32, #tpu.memory_space<vmem>>, vector<4x32xf32>,
    %c0_397 = arith.constant 0 : index
    %c0_398 = arith.constant 0 : index
    %c14_399 = arith.constant 14 : index
    %c0_400 = arith.constant 0 : index
    %287 = vector.load %arg11[%c0_397, %c0_398, %c14_399, %c0_400] : memref<2x2x36x32xf32, #tpu.memory_space<vmem>>, vector<1x1x4x32xf32>
    %288 = vector.shape_cast %287 : vector<1x1x4x32xf32> to vector<4x32xf32>
    %c20_401 = arith.constant 20 : index
    %c160_402 = arith.constant 160 : index
    %289 = vector.load %arg12[%c20_401, %c160_402] : memref<64x288xf32, #tpu.memory_space<vmem>>, vector<4x32xf32>
    tpu.vector_store %arg12[%c20_401, %c160_402], %288 {strides = array<i32>} : memref<64x288xf32, #tpu.memory_space<vmem>>, vector<4x32xf32>,
    %c0_403 = arith.constant 0 : index
    %c0_404 = arith.constant 0 : index
    %c20_405 = arith.constant 20 : index
    %c0_406 = arith.constant 0 : index
    %290 = vector.load %arg11[%c0_403, %c0_404, %c20_405, %c0_406] : memref<2x2x36x32xf32, #tpu.memory_space<vmem>>, vector<1x1x4x32xf32>
    %291 = vector.shape_cast %290 : vector<1x1x4x32xf32> to vector<4x32xf32>
    %c24_407 = arith.constant 24 : index
    %c160_408 = arith.constant 160 : index
    %292 = vector.load %arg12[%c24_407, %c160_408] : memref<64x288xf32, #tpu.memory_space<vmem>>, vector<4x32xf32>
    tpu.vector_store %arg12[%c24_407, %c160_408], %291 {strides = array<i32>} : memref<64x288xf32, #tpu.memory_space<vmem>>, vector<4x32xf32>,
    %c0_409 = arith.constant 0 : index
    %c0_410 = arith.constant 0 : index
    %c26 = arith.constant 26 : index
    %c0_411 = arith.constant 0 : index
    %293 = vector.load %arg11[%c0_409, %c0_410, %c26, %c0_411] : memref<2x2x36x32xf32, #tpu.memory_space<vmem>>, vector<1x1x4x32xf32>
    %294 = vector.shape_cast %293 : vector<1x1x4x32xf32> to vector<4x32xf32>
    %c28_412 = arith.constant 28 : index
    %c160_413 = arith.constant 160 : index
    %295 = vector.load %arg12[%c28_412, %c160_413] : memref<64x288xf32, #tpu.memory_space<vmem>>, vector<4x32xf32>
    tpu.vector_store %arg12[%c28_412, %c160_413], %294 {strides = array<i32>} : memref<64x288xf32, #tpu.memory_space<vmem>>, vector<4x32xf32>,
    %c1_414 = arith.constant 1 : index
    %c0_415 = arith.constant 0 : index
    %c7_416 = arith.constant 7 : index
    %c0_417 = arith.constant 0 : index
    %296 = vector.load %arg11[%c1_414, %c0_415, %c7_416, %c0_417] : memref<2x2x36x32xf32, #tpu.memory_space<vmem>>, vector<1x1x4x32xf32>
    %297 = vector.shape_cast %296 : vector<1x1x4x32xf32> to vector<4x32xf32>
    %c16_418 = arith.constant 16 : index
    %c192_419 = arith.constant 192 : index
    %298 = vector.load %arg12[%c16_418, %c192_419] : memref<64x288xf32, #tpu.memory_space<vmem>>, vector<4x32xf32>
    tpu.vector_store %arg12[%c16_418, %c192_419], %297 {strides = array<i32>} : memref<64x288xf32, #tpu.memory_space<vmem>>, vector<4x32xf32>,
    %c1_420 = arith.constant 1 : index
    %c0_421 = arith.constant 0 : index
    %c13_422 = arith.constant 13 : index
    %c0_423 = arith.constant 0 : index
    %299 = vector.load %arg11[%c1_420, %c0_421, %c13_422, %c0_423] : memref<2x2x36x32xf32, #tpu.memory_space<vmem>>, vector<1x1x4x32xf32>
    %300 = vector.shape_cast %299 : vector<1x1x4x32xf32> to vector<4x32xf32>
    %c20_424 = arith.constant 20 : index
    %c192_425 = arith.constant 192 : index
    %301 = vector.load %arg12[%c20_424, %c192_425] : memref<64x288xf32, #tpu.memory_space<vmem>>, vector<4x32xf32>
    tpu.vector_store %arg12[%c20_424, %c192_425], %300 {strides = array<i32>} : memref<64x288xf32, #tpu.memory_space<vmem>>, vector<4x32xf32>,
    %c1_426 = arith.constant 1 : index
    %c0_427 = arith.constant 0 : index
    %c19_428 = arith.constant 19 : index
    %c0_429 = arith.constant 0 : index
    %302 = vector.load %arg11[%c1_426, %c0_427, %c19_428, %c0_429] : memref<2x2x36x32xf32, #tpu.memory_space<vmem>>, vector<1x1x4x32xf32>
    %303 = vector.shape_cast %302 : vector<1x1x4x32xf32> to vector<4x32xf32>
    %c24_430 = arith.constant 24 : index
    %c192_431 = arith.constant 192 : index
    %304 = vector.load %arg12[%c24_430, %c192_431] : memref<64x288xf32, #tpu.memory_space<vmem>>, vector<4x32xf32>
    tpu.vector_store %arg12[%c24_430, %c192_431], %303 {strides = array<i32>} : memref<64x288xf32, #tpu.memory_space<vmem>>, vector<4x32xf32>,
    %c1_432 = arith.constant 1 : index
    %c0_433 = arith.constant 0 : index
    %c25_434 = arith.constant 25 : index
    %c0_435 = arith.constant 0 : index
    %305 = vector.load %arg11[%c1_432, %c0_433, %c25_434, %c0_435] : memref<2x2x36x32xf32, #tpu.memory_space<vmem>>, vector<1x1x4x32xf32>
    %306 = vector.shape_cast %305 : vector<1x1x4x32xf32> to vector<4x32xf32>
    %c28_436 = arith.constant 28 : index
    %c192_437 = arith.constant 192 : index
    %307 = vector.load %arg12[%c28_436, %c192_437] : memref<64x288xf32, #tpu.memory_space<vmem>>, vector<4x32xf32>
    tpu.vector_store %arg12[%c28_436, %c192_437], %306 {strides = array<i32>} : memref<64x288xf32, #tpu.memory_space<vmem>>, vector<4x32xf32>,
    %c1_438 = arith.constant 1 : index
    %c1_439 = arith.constant 1 : index
    %c7_440 = arith.constant 7 : index
    %c0_441 = arith.constant 0 : index
    %308 = vector.load %arg11[%c1_438, %c1_439, %c7_440, %c0_441] : memref<2x2x36x32xf32, #tpu.memory_space<vmem>>, vector<1x1x4x32xf32>
    %309 = vector.shape_cast %308 : vector<1x1x4x32xf32> to vector<4x32xf32>
    %c16_442 = arith.constant 16 : index
    %c224_443 = arith.constant 224 : index
    %310 = vector.load %arg12[%c16_442, %c224_443] : memref<64x288xf32, #tpu.memory_space<vmem>>, vector<4x32xf32>
    tpu.vector_store %arg12[%c16_442, %c224_443], %309 {strides = array<i32>} : memref<64x288xf32, #tpu.memory_space<vmem>>, vector<4x32xf32>,
    %c1_444 = arith.constant 1 : index
    %c1_445 = arith.constant 1 : index
    %c13_446 = arith.constant 13 : index
    %c0_447 = arith.constant 0 : index
    %311 = vector.load %arg11[%c1_444, %c1_445, %c13_446, %c0_447] : memref<2x2x36x32xf32, #tpu.memory_space<vmem>>, vector<1x1x4x32xf32>
    %312 = vector.shape_cast %311 : vector<1x1x4x32xf32> to vector<4x32xf32>
    %c20_448 = arith.constant 20 : index
    %c224_449 = arith.constant 224 : index
    %313 = vector.load %arg12[%c20_448, %c224_449] : memref<64x288xf32, #tpu.memory_space<vmem>>, vector<4x32xf32>
    tpu.vector_store %arg12[%c20_448, %c224_449], %312 {strides = array<i32>} : memref<64x288xf32, #tpu.memory_space<vmem>>, vector<4x32xf32>,
    %c1_450 = arith.constant 1 : index
    %c1_451 = arith.constant 1 : index
    %c19_452 = arith.constant 19 : index
    %c0_453 = arith.constant 0 : index
    %314 = vector.load %arg11[%c1_450, %c1_451, %c19_452, %c0_453] : memref<2x2x36x32xf32, #tpu.memory_space<vmem>>, vector<1x1x4x32xf32>
    %315 = vector.shape_cast %314 : vector<1x1x4x32xf32> to vector<4x32xf32>
    %c24_454 = arith.constant 24 : index
    %c224_455 = arith.constant 224 : index
    %316 = vector.load %arg12[%c24_454, %c224_455] : memref<64x288xf32, #tpu.memory_space<vmem>>, vector<4x32xf32>
    tpu.vector_store %arg12[%c24_454, %c224_455], %315 {strides = array<i32>} : memref<64x288xf32, #tpu.memory_space<vmem>>, vector<4x32xf32>,
    %c1_456 = arith.constant 1 : index
    %c1_457 = arith.constant 1 : index
    %c25_458 = arith.constant 25 : index
    %c0_459 = arith.constant 0 : index
    %317 = vector.load %arg11[%c1_456, %c1_457, %c25_458, %c0_459] : memref<2x2x36x32xf32, #tpu.memory_space<vmem>>, vector<1x1x4x32xf32>
    %318 = vector.shape_cast %317 : vector<1x1x4x32xf32> to vector<4x32xf32>
    %c28_460 = arith.constant 28 : index
    %c224_461 = arith.constant 224 : index
    %319 = vector.load %arg12[%c28_460, %c224_461] : memref<64x288xf32, #tpu.memory_space<vmem>>, vector<4x32xf32>
    tpu.vector_store %arg12[%c28_460, %c224_461], %318 {strides = array<i32>} : memref<64x288xf32, #tpu.memory_space<vmem>>, vector<4x32xf32>,
    %c1_462 = arith.constant 1 : index
    %c0_463 = arith.constant 0 : index
    %c8_464 = arith.constant 8 : index
    %c0_465 = arith.constant 0 : index
    %320 = vector.load %arg11[%c1_462, %c0_463, %c8_464, %c0_465] : memref<2x2x36x32xf32, #tpu.memory_space<vmem>>, vector<1x1x4x32xf32>
    %321 = vector.shape_cast %320 : vector<1x1x4x32xf32> to vector<4x32xf32>
    %c16_466 = arith.constant 16 : index
    %c256_467 = arith.constant 256 : index
    %322 = vector.load %arg12[%c16_466, %c256_467] : memref<64x288xf32, #tpu.memory_space<vmem>>, vector<4x32xf32>
    tpu.vector_store %arg12[%c16_466, %c256_467], %321 {strides = array<i32>} : memref<64x288xf32, #tpu.memory_space<vmem>>, vector<4x32xf32>,
    %c1_468 = arith.constant 1 : index
    %c0_469 = arith.constant 0 : index
    %c14_470 = arith.constant 14 : index
    %c0_471 = arith.constant 0 : index
    %323 = vector.load %arg11[%c1_468, %c0_469, %c14_470, %c0_471] : memref<2x2x36x32xf32, #tpu.memory_space<vmem>>, vector<1x1x4x32xf32>
    %324 = vector.shape_cast %323 : vector<1x1x4x32xf32> to vector<4x32xf32>
    %c20_472 = arith.constant 20 : index
    %c256_473 = arith.constant 256 : index
    %325 = vector.load %arg12[%c20_472, %c256_473] : memref<64x288xf32, #tpu.memory_space<vmem>>, vector<4x32xf32>
    tpu.vector_store %arg12[%c20_472, %c256_473], %324 {strides = array<i32>} : memref<64x288xf32, #tpu.memory_space<vmem>>, vector<4x32xf32>,
    %c1_474 = arith.constant 1 : index
    %c0_475 = arith.constant 0 : index
    %c20_476 = arith.constant 20 : index
    %c0_477 = arith.constant 0 : index
    %326 = vector.load %arg11[%c1_474, %c0_475, %c20_476, %c0_477] : memref<2x2x36x32xf32, #tpu.memory_space<vmem>>, vector<1x1x4x32xf32>
    %327 = vector.shape_cast %326 : vector<1x1x4x32xf32> to vector<4x32xf32>
    %c24_478 = arith.constant 24 : index
    %c256_479 = arith.constant 256 : index
    %328 = vector.load %arg12[%c24_478, %c256_479] : memref<64x288xf32, #tpu.memory_space<vmem>>, vector<4x32xf32>
    tpu.vector_store %arg12[%c24_478, %c256_479], %327 {strides = array<i32>} : memref<64x288xf32, #tpu.memory_space<vmem>>, vector<4x32xf32>,
    %c1_480 = arith.constant 1 : index
    %c0_481 = arith.constant 0 : index
    %c26_482 = arith.constant 26 : index
    %c0_483 = arith.constant 0 : index
    %329 = vector.load %arg11[%c1_480, %c0_481, %c26_482, %c0_483] : memref<2x2x36x32xf32, #tpu.memory_space<vmem>>, vector<1x1x4x32xf32>
    %330 = vector.shape_cast %329 : vector<1x1x4x32xf32> to vector<4x32xf32>
    %c28_484 = arith.constant 28 : index
    %c256_485 = arith.constant 256 : index
    %331 = vector.load %arg12[%c28_484, %c256_485] : memref<64x288xf32, #tpu.memory_space<vmem>>, vector<4x32xf32>
    tpu.vector_store %arg12[%c28_484, %c256_485], %330 {strides = array<i32>} : memref<64x288xf32, #tpu.memory_space<vmem>>, vector<4x32xf32>,
    %c0_486 = arith.constant 0 : index
    %c1_487 = arith.constant 1 : index
    %c6_488 = arith.constant 6 : index
    %c0_489 = arith.constant 0 : index
    %332 = vector.load %arg11[%c0_486, %c1_487, %c6_488, %c0_489] : memref<2x2x36x32xf32, #tpu.memory_space<vmem>>, vector<1x1x4x32xf32>
    %333 = vector.shape_cast %332 : vector<1x1x4x32xf32> to vector<4x32xf32>
    %c32_490 = arith.constant 32 : index
    %c0_491 = arith.constant 0 : index
    %334 = vector.load %arg12[%c32_490, %c0_491] : memref<64x288xf32, #tpu.memory_space<vmem>>, vector<4x32xf32>
    tpu.vector_store %arg12[%c32_490, %c0_491], %333 {strides = array<i32>} : memref<64x288xf32, #tpu.memory_space<vmem>>, vector<4x32xf32>,
    %c0_492 = arith.constant 0 : index
    %c1_493 = arith.constant 1 : index
    %c12_494 = arith.constant 12 : index
    %c0_495 = arith.constant 0 : index
    %335 = vector.load %arg11[%c0_492, %c1_493, %c12_494, %c0_495] : memref<2x2x36x32xf32, #tpu.memory_space<vmem>>, vector<1x1x4x32xf32>
    %336 = vector.shape_cast %335 : vector<1x1x4x32xf32> to vector<4x32xf32>
    %c36 = arith.constant 36 : index
    %c0_496 = arith.constant 0 : index
    %337 = vector.load %arg12[%c36, %c0_496] : memref<64x288xf32, #tpu.memory_space<vmem>>, vector<4x32xf32>
    tpu.vector_store %arg12[%c36, %c0_496], %336 {strides = array<i32>} : memref<64x288xf32, #tpu.memory_space<vmem>>, vector<4x32xf32>,
    %c0_497 = arith.constant 0 : index
    %c1_498 = arith.constant 1 : index
    %c18_499 = arith.constant 18 : index
    %c0_500 = arith.constant 0 : index
    %338 = vector.load %arg11[%c0_497, %c1_498, %c18_499, %c0_500] : memref<2x2x36x32xf32, #tpu.memory_space<vmem>>, vector<1x1x4x32xf32>
    %339 = vector.shape_cast %338 : vector<1x1x4x32xf32> to vector<4x32xf32>
    %c40 = arith.constant 40 : index
    %c0_501 = arith.constant 0 : index
    %340 = vector.load %arg12[%c40, %c0_501] : memref<64x288xf32, #tpu.memory_space<vmem>>, vector<4x32xf32>
    tpu.vector_store %arg12[%c40, %c0_501], %339 {strides = array<i32>} : memref<64x288xf32, #tpu.memory_space<vmem>>, vector<4x32xf32>,
    %c0_502 = arith.constant 0 : index
    %c1_503 = arith.constant 1 : index
    %c24_504 = arith.constant 24 : index
    %c0_505 = arith.constant 0 : index
    %341 = vector.load %arg11[%c0_502, %c1_503, %c24_504, %c0_505] : memref<2x2x36x32xf32, #tpu.memory_space<vmem>>, vector<1x1x4x32xf32>
    %342 = vector.shape_cast %341 : vector<1x1x4x32xf32> to vector<4x32xf32>
    %c44 = arith.constant 44 : index
    %c0_506 = arith.constant 0 : index
    %343 = vector.load %arg12[%c44, %c0_506] : memref<64x288xf32, #tpu.memory_space<vmem>>, vector<4x32xf32>
    tpu.vector_store %arg12[%c44, %c0_506], %342 {strides = array<i32>} : memref<64x288xf32, #tpu.memory_space<vmem>>, vector<4x32xf32>,
    %c0_507 = arith.constant 0 : index
    %c0_508 = arith.constant 0 : index
    %c7_509 = arith.constant 7 : index
    %c0_510 = arith.constant 0 : index
    %344 = vector.load %arg11[%c0_507, %c0_508, %c7_509, %c0_510] : memref<2x2x36x32xf32, #tpu.memory_space<vmem>>, vector<1x1x4x32xf32>
    %345 = vector.shape_cast %344 : vector<1x1x4x32xf32> to vector<4x32xf32>
    %c32_511 = arith.constant 32 : index
    %c32_512 = arith.constant 32 : index
    %346 = vector.load %arg12[%c32_511, %c32_512] : memref<64x288xf32, #tpu.memory_space<vmem>>, vector<4x32xf32>
    tpu.vector_store %arg12[%c32_511, %c32_512], %345 {strides = array<i32>} : memref<64x288xf32, #tpu.memory_space<vmem>>, vector<4x32xf32>,
    %c0_513 = arith.constant 0 : index
    %c0_514 = arith.constant 0 : index
    %c13_515 = arith.constant 13 : index
    %c0_516 = arith.constant 0 : index
    %347 = vector.load %arg11[%c0_513, %c0_514, %c13_515, %c0_516] : memref<2x2x36x32xf32, #tpu.memory_space<vmem>>, vector<1x1x4x32xf32>
    %348 = vector.shape_cast %347 : vector<1x1x4x32xf32> to vector<4x32xf32>
    %c36_517 = arith.constant 36 : index
    %c32_518 = arith.constant 32 : index
    %349 = vector.load %arg12[%c36_517, %c32_518] : memref<64x288xf32, #tpu.memory_space<vmem>>, vector<4x32xf32>
    tpu.vector_store %arg12[%c36_517, %c32_518], %348 {strides = array<i32>} : memref<64x288xf32, #tpu.memory_space<vmem>>, vector<4x32xf32>,
    %c0_519 = arith.constant 0 : index
    %c0_520 = arith.constant 0 : index
    %c19_521 = arith.constant 19 : index
    %c0_522 = arith.constant 0 : index
    %350 = vector.load %arg11[%c0_519, %c0_520, %c19_521, %c0_522] : memref<2x2x36x32xf32, #tpu.memory_space<vmem>>, vector<1x1x4x32xf32>
    %351 = vector.shape_cast %350 : vector<1x1x4x32xf32> to vector<4x32xf32>
    %c40_523 = arith.constant 40 : index
    %c32_524 = arith.constant 32 : index
    %352 = vector.load %arg12[%c40_523, %c32_524] : memref<64x288xf32, #tpu.memory_space<vmem>>, vector<4x32xf32>
    tpu.vector_store %arg12[%c40_523, %c32_524], %351 {strides = array<i32>} : memref<64x288xf32, #tpu.memory_space<vmem>>, vector<4x32xf32>,
    %c0_525 = arith.constant 0 : index
    %c0_526 = arith.constant 0 : index
    %c25_527 = arith.constant 25 : index
    %c0_528 = arith.constant 0 : index
    %353 = vector.load %arg11[%c0_525, %c0_526, %c25_527, %c0_528] : memref<2x2x36x32xf32, #tpu.memory_space<vmem>>, vector<1x1x4x32xf32>
    %354 = vector.shape_cast %353 : vector<1x1x4x32xf32> to vector<4x32xf32>
    %c44_529 = arith.constant 44 : index
    %c32_530 = arith.constant 32 : index
    %355 = vector.load %arg12[%c44_529, %c32_530] : memref<64x288xf32, #tpu.memory_space<vmem>>, vector<4x32xf32>
    tpu.vector_store %arg12[%c44_529, %c32_530], %354 {strides = array<i32>} : memref<64x288xf32, #tpu.memory_space<vmem>>, vector<4x32xf32>,
    %c0_531 = arith.constant 0 : index
    %c1_532 = arith.constant 1 : index
    %c7_533 = arith.constant 7 : index
    %c0_534 = arith.constant 0 : index
    %356 = vector.load %arg11[%c0_531, %c1_532, %c7_533, %c0_534] : memref<2x2x36x32xf32, #tpu.memory_space<vmem>>, vector<1x1x4x32xf32>
    %357 = vector.shape_cast %356 : vector<1x1x4x32xf32> to vector<4x32xf32>
    %c32_535 = arith.constant 32 : index
    %c64_536 = arith.constant 64 : index
    %358 = vector.load %arg12[%c32_535, %c64_536] : memref<64x288xf32, #tpu.memory_space<vmem>>, vector<4x32xf32>
    tpu.vector_store %arg12[%c32_535, %c64_536], %357 {strides = array<i32>} : memref<64x288xf32, #tpu.memory_space<vmem>>, vector<4x32xf32>,
    %c0_537 = arith.constant 0 : index
    %c1_538 = arith.constant 1 : index
    %c13_539 = arith.constant 13 : index
    %c0_540 = arith.constant 0 : index
    %359 = vector.load %arg11[%c0_537, %c1_538, %c13_539, %c0_540] : memref<2x2x36x32xf32, #tpu.memory_space<vmem>>, vector<1x1x4x32xf32>
    %360 = vector.shape_cast %359 : vector<1x1x4x32xf32> to vector<4x32xf32>
    %c36_541 = arith.constant 36 : index
    %c64_542 = arith.constant 64 : index
    %361 = vector.load %arg12[%c36_541, %c64_542] : memref<64x288xf32, #tpu.memory_space<vmem>>, vector<4x32xf32>
    tpu.vector_store %arg12[%c36_541, %c64_542], %360 {strides = array<i32>} : memref<64x288xf32, #tpu.memory_space<vmem>>, vector<4x32xf32>,
    %c0_543 = arith.constant 0 : index
    %c1_544 = arith.constant 1 : index
    %c19_545 = arith.constant 19 : index
    %c0_546 = arith.constant 0 : index
    %362 = vector.load %arg11[%c0_543, %c1_544, %c19_545, %c0_546] : memref<2x2x36x32xf32, #tpu.memory_space<vmem>>, vector<1x1x4x32xf32>
    %363 = vector.shape_cast %362 : vector<1x1x4x32xf32> to vector<4x32xf32>
    %c40_547 = arith.constant 40 : index
    %c64_548 = arith.constant 64 : index
    %364 = vector.load %arg12[%c40_547, %c64_548] : memref<64x288xf32, #tpu.memory_space<vmem>>, vector<4x32xf32>
    tpu.vector_store %arg12[%c40_547, %c64_548], %363 {strides = array<i32>} : memref<64x288xf32, #tpu.memory_space<vmem>>, vector<4x32xf32>,
    %c0_549 = arith.constant 0 : index
    %c1_550 = arith.constant 1 : index
    %c25_551 = arith.constant 25 : index
    %c0_552 = arith.constant 0 : index
    %365 = vector.load %arg11[%c0_549, %c1_550, %c25_551, %c0_552] : memref<2x2x36x32xf32, #tpu.memory_space<vmem>>, vector<1x1x4x32xf32>
    %366 = vector.shape_cast %365 : vector<1x1x4x32xf32> to vector<4x32xf32>
    %c44_553 = arith.constant 44 : index
    %c64_554 = arith.constant 64 : index
    %367 = vector.load %arg12[%c44_553, %c64_554] : memref<64x288xf32, #tpu.memory_space<vmem>>, vector<4x32xf32>
    tpu.vector_store %arg12[%c44_553, %c64_554], %366 {strides = array<i32>} : memref<64x288xf32, #tpu.memory_space<vmem>>, vector<4x32xf32>,
    %c1_555 = arith.constant 1 : index
    %c1_556 = arith.constant 1 : index
    %c6_557 = arith.constant 6 : index
    %c0_558 = arith.constant 0 : index
    %368 = vector.load %arg11[%c1_555, %c1_556, %c6_557, %c0_558] : memref<2x2x36x32xf32, #tpu.memory_space<vmem>>, vector<1x1x4x32xf32>
    %369 = vector.shape_cast %368 : vector<1x1x4x32xf32> to vector<4x32xf32>
    %c32_559 = arith.constant 32 : index
    %c96_560 = arith.constant 96 : index
    %370 = vector.load %arg12[%c32_559, %c96_560] : memref<64x288xf32, #tpu.memory_space<vmem>>, vector<4x32xf32>
    tpu.vector_store %arg12[%c32_559, %c96_560], %369 {strides = array<i32>} : memref<64x288xf32, #tpu.memory_space<vmem>>, vector<4x32xf32>,
    %c1_561 = arith.constant 1 : index
    %c1_562 = arith.constant 1 : index
    %c12_563 = arith.constant 12 : index
    %c0_564 = arith.constant 0 : index
    %371 = vector.load %arg11[%c1_561, %c1_562, %c12_563, %c0_564] : memref<2x2x36x32xf32, #tpu.memory_space<vmem>>, vector<1x1x4x32xf32>
    %372 = vector.shape_cast %371 : vector<1x1x4x32xf32> to vector<4x32xf32>
    %c36_565 = arith.constant 36 : index
    %c96_566 = arith.constant 96 : index
    %373 = vector.load %arg12[%c36_565, %c96_566] : memref<64x288xf32, #tpu.memory_space<vmem>>, vector<4x32xf32>
    tpu.vector_store %arg12[%c36_565, %c96_566], %372 {strides = array<i32>} : memref<64x288xf32, #tpu.memory_space<vmem>>, vector<4x32xf32>,
    %c1_567 = arith.constant 1 : index
    %c1_568 = arith.constant 1 : index
    %c18_569 = arith.constant 18 : index
    %c0_570 = arith.constant 0 : index
    %374 = vector.load %arg11[%c1_567, %c1_568, %c18_569, %c0_570] : memref<2x2x36x32xf32, #tpu.memory_space<vmem>>, vector<1x1x4x32xf32>
    %375 = vector.shape_cast %374 : vector<1x1x4x32xf32> to vector<4x32xf32>
    %c40_571 = arith.constant 40 : index
    %c96_572 = arith.constant 96 : index
    %376 = vector.load %arg12[%c40_571, %c96_572] : memref<64x288xf32, #tpu.memory_space<vmem>>, vector<4x32xf32>
    tpu.vector_store %arg12[%c40_571, %c96_572], %375 {strides = array<i32>} : memref<64x288xf32, #tpu.memory_space<vmem>>, vector<4x32xf32>,
    %c1_573 = arith.constant 1 : index
    %c1_574 = arith.constant 1 : index
    %c24_575 = arith.constant 24 : index
    %c0_576 = arith.constant 0 : index
    %377 = vector.load %arg11[%c1_573, %c1_574, %c24_575, %c0_576] : memref<2x2x36x32xf32, #tpu.memory_space<vmem>>, vector<1x1x4x32xf32>
    %378 = vector.shape_cast %377 : vector<1x1x4x32xf32> to vector<4x32xf32>
    %c44_577 = arith.constant 44 : index
    %c96_578 = arith.constant 96 : index
    %379 = vector.load %arg12[%c44_577, %c96_578] : memref<64x288xf32, #tpu.memory_space<vmem>>, vector<4x32xf32>
    tpu.vector_store %arg12[%c44_577, %c96_578], %378 {strides = array<i32>} : memref<64x288xf32, #tpu.memory_space<vmem>>, vector<4x32xf32>,
    %c1_579 = arith.constant 1 : index
    %c0_580 = arith.constant 0 : index
    %c7_581 = arith.constant 7 : index
    %c0_582 = arith.constant 0 : index
    %380 = vector.load %arg11[%c1_579, %c0_580, %c7_581, %c0_582] : memref<2x2x36x32xf32, #tpu.memory_space<vmem>>, vector<1x1x4x32xf32>
    %381 = vector.shape_cast %380 : vector<1x1x4x32xf32> to vector<4x32xf32>
    %c32_583 = arith.constant 32 : index
    %c128_584 = arith.constant 128 : index
    %382 = vector.load %arg12[%c32_583, %c128_584] : memref<64x288xf32, #tpu.memory_space<vmem>>, vector<4x32xf32>
    tpu.vector_store %arg12[%c32_583, %c128_584], %381 {strides = array<i32>} : memref<64x288xf32, #tpu.memory_space<vmem>>, vector<4x32xf32>,
    %c1_585 = arith.constant 1 : index
    %c0_586 = arith.constant 0 : index
    %c13_587 = arith.constant 13 : index
    %c0_588 = arith.constant 0 : index
    %383 = vector.load %arg11[%c1_585, %c0_586, %c13_587, %c0_588] : memref<2x2x36x32xf32, #tpu.memory_space<vmem>>, vector<1x1x4x32xf32>
    %384 = vector.shape_cast %383 : vector<1x1x4x32xf32> to vector<4x32xf32>
    %c36_589 = arith.constant 36 : index
    %c128_590 = arith.constant 128 : index
    %385 = vector.load %arg12[%c36_589, %c128_590] : memref<64x288xf32, #tpu.memory_space<vmem>>, vector<4x32xf32>
    tpu.vector_store %arg12[%c36_589, %c128_590], %384 {strides = array<i32>} : memref<64x288xf32, #tpu.memory_space<vmem>>, vector<4x32xf32>,
    %c1_591 = arith.constant 1 : index
    %c0_592 = arith.constant 0 : index
    %c19_593 = arith.constant 19 : index
    %c0_594 = arith.constant 0 : index
    %386 = vector.load %arg11[%c1_591, %c0_592, %c19_593, %c0_594] : memref<2x2x36x32xf32, #tpu.memory_space<vmem>>, vector<1x1x4x32xf32>
    %387 = vector.shape_cast %386 : vector<1x1x4x32xf32> to vector<4x32xf32>
    %c40_595 = arith.constant 40 : index
    %c128_596 = arith.constant 128 : index
    %388 = vector.load %arg12[%c40_595, %c128_596] : memref<64x288xf32, #tpu.memory_space<vmem>>, vector<4x32xf32>
    tpu.vector_store %arg12[%c40_595, %c128_596], %387 {strides = array<i32>} : memref<64x288xf32, #tpu.memory_space<vmem>>, vector<4x32xf32>,
    %c1_597 = arith.constant 1 : index
    %c0_598 = arith.constant 0 : index
    %c25_599 = arith.constant 25 : index
    %c0_600 = arith.constant 0 : index
    %389 = vector.load %arg11[%c1_597, %c0_598, %c25_599, %c0_600] : memref<2x2x36x32xf32, #tpu.memory_space<vmem>>, vector<1x1x4x32xf32>
    %390 = vector.shape_cast %389 : vector<1x1x4x32xf32> to vector<4x32xf32>
    %c44_601 = arith.constant 44 : index
    %c128_602 = arith.constant 128 : index
    %391 = vector.load %arg12[%c44_601, %c128_602] : memref<64x288xf32, #tpu.memory_space<vmem>>, vector<4x32xf32>
    tpu.vector_store %arg12[%c44_601, %c128_602], %390 {strides = array<i32>} : memref<64x288xf32, #tpu.memory_space<vmem>>, vector<4x32xf32>,
    %c1_603 = arith.constant 1 : index
    %c1_604 = arith.constant 1 : index
    %c7_605 = arith.constant 7 : index
    %c0_606 = arith.constant 0 : index
    %392 = vector.load %arg11[%c1_603, %c1_604, %c7_605, %c0_606] : memref<2x2x36x32xf32, #tpu.memory_space<vmem>>, vector<1x1x4x32xf32>
    %393 = vector.shape_cast %392 : vector<1x1x4x32xf32> to vector<4x32xf32>
    %c32_607 = arith.constant 32 : index
    %c160_608 = arith.constant 160 : index
    %394 = vector.load %arg12[%c32_607, %c160_608] : memref<64x288xf32, #tpu.memory_space<vmem>>, vector<4x32xf32>
    tpu.vector_store %arg12[%c32_607, %c160_608], %393 {strides = array<i32>} : memref<64x288xf32, #tpu.memory_space<vmem>>, vector<4x32xf32>,
    %c1_609 = arith.constant 1 : index
    %c1_610 = arith.constant 1 : index
    %c13_611 = arith.constant 13 : index
    %c0_612 = arith.constant 0 : index
    %395 = vector.load %arg11[%c1_609, %c1_610, %c13_611, %c0_612] : memref<2x2x36x32xf32, #tpu.memory_space<vmem>>, vector<1x1x4x32xf32>
    %396 = vector.shape_cast %395 : vector<1x1x4x32xf32> to vector<4x32xf32>
    %c36_613 = arith.constant 36 : index
    %c160_614 = arith.constant 160 : index
    %397 = vector.load %arg12[%c36_613, %c160_614] : memref<64x288xf32, #tpu.memory_space<vmem>>, vector<4x32xf32>
    tpu.vector_store %arg12[%c36_613, %c160_614], %396 {strides = array<i32>} : memref<64x288xf32, #tpu.memory_space<vmem>>, vector<4x32xf32>,
    %c1_615 = arith.constant 1 : index
    %c1_616 = arith.constant 1 : index
    %c19_617 = arith.constant 19 : index
    %c0_618 = arith.constant 0 : index
    %398 = vector.load %arg11[%c1_615, %c1_616, %c19_617, %c0_618] : memref<2x2x36x32xf32, #tpu.memory_space<vmem>>, vector<1x1x4x32xf32>
    %399 = vector.shape_cast %398 : vector<1x1x4x32xf32> to vector<4x32xf32>
    %c40_619 = arith.constant 40 : index
    %c160_620 = arith.constant 160 : index
    %400 = vector.load %arg12[%c40_619, %c160_620] : memref<64x288xf32, #tpu.memory_space<vmem>>, vector<4x32xf32>
    tpu.vector_store %arg12[%c40_619, %c160_620], %399 {strides = array<i32>} : memref<64x288xf32, #tpu.memory_space<vmem>>, vector<4x32xf32>,
    %c1_621 = arith.constant 1 : index
    %c1_622 = arith.constant 1 : index
    %c25_623 = arith.constant 25 : index
    %c0_624 = arith.constant 0 : index
    %401 = vector.load %arg11[%c1_621, %c1_622, %c25_623, %c0_624] : memref<2x2x36x32xf32, #tpu.memory_space<vmem>>, vector<1x1x4x32xf32>
    %402 = vector.shape_cast %401 : vector<1x1x4x32xf32> to vector<4x32xf32>
    %c44_625 = arith.constant 44 : index
    %c160_626 = arith.constant 160 : index
    %403 = vector.load %arg12[%c44_625, %c160_626] : memref<64x288xf32, #tpu.memory_space<vmem>>, vector<4x32xf32>
    tpu.vector_store %arg12[%c44_625, %c160_626], %402 {strides = array<i32>} : memref<64x288xf32, #tpu.memory_space<vmem>>, vector<4x32xf32>,
    %c0_627 = arith.constant 0 : index
    %c1_628 = arith.constant 1 : index
    %c12_629 = arith.constant 12 : index
    %c0_630 = arith.constant 0 : index
    %404 = vector.load %arg11[%c0_627, %c1_628, %c12_629, %c0_630] : memref<2x2x36x32xf32, #tpu.memory_space<vmem>>, vector<1x1x4x32xf32>
    %405 = vector.shape_cast %404 : vector<1x1x4x32xf32> to vector<4x32xf32>
    %c32_631 = arith.constant 32 : index
    %c192_632 = arith.constant 192 : index
    %406 = vector.load %arg12[%c32_631, %c192_632] : memref<64x288xf32, #tpu.memory_space<vmem>>, vector<4x32xf32>
    tpu.vector_store %arg12[%c32_631, %c192_632], %405 {strides = array<i32>} : memref<64x288xf32, #tpu.memory_space<vmem>>, vector<4x32xf32>,
    %c0_633 = arith.constant 0 : index
    %c1_634 = arith.constant 1 : index
    %c18_635 = arith.constant 18 : index
    %c0_636 = arith.constant 0 : index
    %407 = vector.load %arg11[%c0_633, %c1_634, %c18_635, %c0_636] : memref<2x2x36x32xf32, #tpu.memory_space<vmem>>, vector<1x1x4x32xf32>
    %408 = vector.shape_cast %407 : vector<1x1x4x32xf32> to vector<4x32xf32>
    %c36_637 = arith.constant 36 : index
    %c192_638 = arith.constant 192 : index
    %409 = vector.load %arg12[%c36_637, %c192_638] : memref<64x288xf32, #tpu.memory_space<vmem>>, vector<4x32xf32>
    tpu.vector_store %arg12[%c36_637, %c192_638], %408 {strides = array<i32>} : memref<64x288xf32, #tpu.memory_space<vmem>>, vector<4x32xf32>,
    %c0_639 = arith.constant 0 : index
    %c1_640 = arith.constant 1 : index
    %c24_641 = arith.constant 24 : index
    %c0_642 = arith.constant 0 : index
    %410 = vector.load %arg11[%c0_639, %c1_640, %c24_641, %c0_642] : memref<2x2x36x32xf32, #tpu.memory_space<vmem>>, vector<1x1x4x32xf32>
    %411 = vector.shape_cast %410 : vector<1x1x4x32xf32> to vector<4x32xf32>
    %c40_643 = arith.constant 40 : index
    %c192_644 = arith.constant 192 : index
    %412 = vector.load %arg12[%c40_643, %c192_644] : memref<64x288xf32, #tpu.memory_space<vmem>>, vector<4x32xf32>
    tpu.vector_store %arg12[%c40_643, %c192_644], %411 {strides = array<i32>} : memref<64x288xf32, #tpu.memory_space<vmem>>, vector<4x32xf32>,
    %c0_645 = arith.constant 0 : index
    %c1_646 = arith.constant 1 : index
    %c30 = arith.constant 30 : index
    %c0_647 = arith.constant 0 : index
    %413 = vector.load %arg11[%c0_645, %c1_646, %c30, %c0_647] : memref<2x2x36x32xf32, #tpu.memory_space<vmem>>, vector<1x1x4x32xf32>
    %414 = vector.shape_cast %413 : vector<1x1x4x32xf32> to vector<4x32xf32>
    %c44_648 = arith.constant 44 : index
    %c192_649 = arith.constant 192 : index
    %415 = vector.load %arg12[%c44_648, %c192_649] : memref<64x288xf32, #tpu.memory_space<vmem>>, vector<4x32xf32>
    tpu.vector_store %arg12[%c44_648, %c192_649], %414 {strides = array<i32>} : memref<64x288xf32, #tpu.memory_space<vmem>>, vector<4x32xf32>,
    %c0_650 = arith.constant 0 : index
    %c0_651 = arith.constant 0 : index
    %c13_652 = arith.constant 13 : index
    %c0_653 = arith.constant 0 : index
    %416 = vector.load %arg11[%c0_650, %c0_651, %c13_652, %c0_653] : memref<2x2x36x32xf32, #tpu.memory_space<vmem>>, vector<1x1x4x32xf32>
    %417 = vector.shape_cast %416 : vector<1x1x4x32xf32> to vector<4x32xf32>
    %c32_654 = arith.constant 32 : index
    %c224_655 = arith.constant 224 : index
    %418 = vector.load %arg12[%c32_654, %c224_655] : memref<64x288xf32, #tpu.memory_space<vmem>>, vector<4x32xf32>
    tpu.vector_store %arg12[%c32_654, %c224_655], %417 {strides = array<i32>} : memref<64x288xf32, #tpu.memory_space<vmem>>, vector<4x32xf32>,
    %c0_656 = arith.constant 0 : index
    %c0_657 = arith.constant 0 : index
    %c19_658 = arith.constant 19 : index
    %c0_659 = arith.constant 0 : index
    %419 = vector.load %arg11[%c0_656, %c0_657, %c19_658, %c0_659] : memref<2x2x36x32xf32, #tpu.memory_space<vmem>>, vector<1x1x4x32xf32>
    %420 = vector.shape_cast %419 : vector<1x1x4x32xf32> to vector<4x32xf32>
    %c36_660 = arith.constant 36 : index
    %c224_661 = arith.constant 224 : index
    %421 = vector.load %arg12[%c36_660, %c224_661] : memref<64x288xf32, #tpu.memory_space<vmem>>, vector<4x32xf32>
    tpu.vector_store %arg12[%c36_660, %c224_661], %420 {strides = array<i32>} : memref<64x288xf32, #tpu.memory_space<vmem>>, vector<4x32xf32>,
    %c0_662 = arith.constant 0 : index
    %c0_663 = arith.constant 0 : index
    %c25_664 = arith.constant 25 : index
    %c0_665 = arith.constant 0 : index
    %422 = vector.load %arg11[%c0_662, %c0_663, %c25_664, %c0_665] : memref<2x2x36x32xf32, #tpu.memory_space<vmem>>, vector<1x1x4x32xf32>
    %423 = vector.shape_cast %422 : vector<1x1x4x32xf32> to vector<4x32xf32>
    %c40_666 = arith.constant 40 : index
    %c224_667 = arith.constant 224 : index
    %424 = vector.load %arg12[%c40_666, %c224_667] : memref<64x288xf32, #tpu.memory_space<vmem>>, vector<4x32xf32>
    tpu.vector_store %arg12[%c40_666, %c224_667], %423 {strides = array<i32>} : memref<64x288xf32, #tpu.memory_space<vmem>>, vector<4x32xf32>,
    %c0_668 = arith.constant 0 : index
    %c0_669 = arith.constant 0 : index
    %c31 = arith.constant 31 : index
    %c0_670 = arith.constant 0 : index
    %425 = vector.load %arg11[%c0_668, %c0_669, %c31, %c0_670] : memref<2x2x36x32xf32, #tpu.memory_space<vmem>>, vector<1x1x4x32xf32>
    %426 = vector.shape_cast %425 : vector<1x1x4x32xf32> to vector<4x32xf32>
    %c44_671 = arith.constant 44 : index
    %c224_672 = arith.constant 224 : index
    %427 = vector.load %arg12[%c44_671, %c224_672] : memref<64x288xf32, #tpu.memory_space<vmem>>, vector<4x32xf32>
    tpu.vector_store %arg12[%c44_671, %c224_672], %426 {strides = array<i32>} : memref<64x288xf32, #tpu.memory_space<vmem>>, vector<4x32xf32>,
    %c0_673 = arith.constant 0 : index
    %c1_674 = arith.constant 1 : index
    %c13_675 = arith.constant 13 : index
    %c0_676 = arith.constant 0 : index
    %428 = vector.load %arg11[%c0_673, %c1_674, %c13_675, %c0_676] : memref<2x2x36x32xf32, #tpu.memory_space<vmem>>, vector<1x1x4x32xf32>
    %429 = vector.shape_cast %428 : vector<1x1x4x32xf32> to vector<4x32xf32>
    %c32_677 = arith.constant 32 : index
    %c256_678 = arith.constant 256 : index
    %430 = vector.load %arg12[%c32_677, %c256_678] : memref<64x288xf32, #tpu.memory_space<vmem>>, vector<4x32xf32>
    tpu.vector_store %arg12[%c32_677, %c256_678], %429 {strides = array<i32>} : memref<64x288xf32, #tpu.memory_space<vmem>>, vector<4x32xf32>,
    %c0_679 = arith.constant 0 : index
    %c1_680 = arith.constant 1 : index
    %c19_681 = arith.constant 19 : index
    %c0_682 = arith.constant 0 : index
    %431 = vector.load %arg11[%c0_679, %c1_680, %c19_681, %c0_682] : memref<2x2x36x32xf32, #tpu.memory_space<vmem>>, vector<1x1x4x32xf32>
    %432 = vector.shape_cast %431 : vector<1x1x4x32xf32> to vector<4x32xf32>
    %c36_683 = arith.constant 36 : index
    %c256_684 = arith.constant 256 : index
    %433 = vector.load %arg12[%c36_683, %c256_684] : memref<64x288xf32, #tpu.memory_space<vmem>>, vector<4x32xf32>
    tpu.vector_store %arg12[%c36_683, %c256_684], %432 {strides = array<i32>} : memref<64x288xf32, #tpu.memory_space<vmem>>, vector<4x32xf32>,
    %c0_685 = arith.constant 0 : index
    %c1_686 = arith.constant 1 : index
    %c25_687 = arith.constant 25 : index
    %c0_688 = arith.constant 0 : index
    %434 = vector.load %arg11[%c0_685, %c1_686, %c25_687, %c0_688] : memref<2x2x36x32xf32, #tpu.memory_space<vmem>>, vector<1x1x4x32xf32>
    %435 = vector.shape_cast %434 : vector<1x1x4x32xf32> to vector<4x32xf32>
    %c40_689 = arith.constant 40 : index
    %c256_690 = arith.constant 256 : index
    %436 = vector.load %arg12[%c40_689, %c256_690] : memref<64x288xf32, #tpu.memory_space<vmem>>, vector<4x32xf32>
    tpu.vector_store %arg12[%c40_689, %c256_690], %435 {strides = array<i32>} : memref<64x288xf32, #tpu.memory_space<vmem>>, vector<4x32xf32>,
    %c0_691 = arith.constant 0 : index
    %c1_692 = arith.constant 1 : index
    %c31_693 = arith.constant 31 : index
    %c0_694 = arith.constant 0 : index
    %437 = vector.load %arg11[%c0_691, %c1_692, %c31_693, %c0_694] : memref<2x2x36x32xf32, #tpu.memory_space<vmem>>, vector<1x1x4x32xf32>
    %438 = vector.shape_cast %437 : vector<1x1x4x32xf32> to vector<4x32xf32>
    %c44_695 = arith.constant 44 : index
    %c256_696 = arith.constant 256 : index
    %439 = vector.load %arg12[%c44_695, %c256_696] : memref<64x288xf32, #tpu.memory_space<vmem>>, vector<4x32xf32>
    tpu.vector_store %arg12[%c44_695, %c256_696], %438 {strides = array<i32>} : memref<64x288xf32, #tpu.memory_space<vmem>>, vector<4x32xf32>,
    %c0_697 = arith.constant 0 : index
    %c0_698 = arith.constant 0 : index
    %c7_699 = arith.constant 7 : index
    %c0_700 = arith.constant 0 : index
    %440 = vector.load %arg11[%c0_697, %c0_698, %c7_699, %c0_700] : memref<2x2x36x32xf32, #tpu.memory_space<vmem>>, vector<1x1x4x32xf32>
    %441 = vector.shape_cast %440 : vector<1x1x4x32xf32> to vector<4x32xf32>
    %c48 = arith.constant 48 : index
    %c0_701 = arith.constant 0 : index
    %442 = vector.load %arg12[%c48, %c0_701] : memref<64x288xf32, #tpu.memory_space<vmem>>, vector<4x32xf32>
    tpu.vector_store %arg12[%c48, %c0_701], %441 {strides = array<i32>} : memref<64x288xf32, #tpu.memory_space<vmem>>, vector<4x32xf32>,
    %c0_702 = arith.constant 0 : index
    %c0_703 = arith.constant 0 : index
    %c13_704 = arith.constant 13 : index
    %c0_705 = arith.constant 0 : index
    %443 = vector.load %arg11[%c0_702, %c0_703, %c13_704, %c0_705] : memref<2x2x36x32xf32, #tpu.memory_space<vmem>>, vector<1x1x4x32xf32>
    %444 = vector.shape_cast %443 : vector<1x1x4x32xf32> to vector<4x32xf32>
    %c52 = arith.constant 52 : index
    %c0_706 = arith.constant 0 : index
    %445 = vector.load %arg12[%c52, %c0_706] : memref<64x288xf32, #tpu.memory_space<vmem>>, vector<4x32xf32>
    tpu.vector_store %arg12[%c52, %c0_706], %444 {strides = array<i32>} : memref<64x288xf32, #tpu.memory_space<vmem>>, vector<4x32xf32>,
    %c0_707 = arith.constant 0 : index
    %c0_708 = arith.constant 0 : index
    %c19_709 = arith.constant 19 : index
    %c0_710 = arith.constant 0 : index
    %446 = vector.load %arg11[%c0_707, %c0_708, %c19_709, %c0_710] : memref<2x2x36x32xf32, #tpu.memory_space<vmem>>, vector<1x1x4x32xf32>
    %447 = vector.shape_cast %446 : vector<1x1x4x32xf32> to vector<4x32xf32>
    %c56 = arith.constant 56 : index
    %c0_711 = arith.constant 0 : index
    %448 = vector.load %arg12[%c56, %c0_711] : memref<64x288xf32, #tpu.memory_space<vmem>>, vector<4x32xf32>
    tpu.vector_store %arg12[%c56, %c0_711], %447 {strides = array<i32>} : memref<64x288xf32, #tpu.memory_space<vmem>>, vector<4x32xf32>,
    %c0_712 = arith.constant 0 : index
    %c0_713 = arith.constant 0 : index
    %c25_714 = arith.constant 25 : index
    %c0_715 = arith.constant 0 : index
    %449 = vector.load %arg11[%c0_712, %c0_713, %c25_714, %c0_715] : memref<2x2x36x32xf32, #tpu.memory_space<vmem>>, vector<1x1x4x32xf32>
    %450 = vector.shape_cast %449 : vector<1x1x4x32xf32> to vector<4x32xf32>
    %c60 = arith.constant 60 : index
    %c0_716 = arith.constant 0 : index
    %451 = vector.load %arg12[%c60, %c0_716] : memref<64x288xf32, #tpu.memory_space<vmem>>, vector<4x32xf32>
    tpu.vector_store %arg12[%c60, %c0_716], %450 {strides = array<i32>} : memref<64x288xf32, #tpu.memory_space<vmem>>, vector<4x32xf32>,
    %c0_717 = arith.constant 0 : index
    %c1_718 = arith.constant 1 : index
    %c7_719 = arith.constant 7 : index
    %c0_720 = arith.constant 0 : index
    %452 = vector.load %arg11[%c0_717, %c1_718, %c7_719, %c0_720] : memref<2x2x36x32xf32, #tpu.memory_space<vmem>>, vector<1x1x4x32xf32>
    %453 = vector.shape_cast %452 : vector<1x1x4x32xf32> to vector<4x32xf32>
    %c48_721 = arith.constant 48 : index
    %c32_722 = arith.constant 32 : index
    %454 = vector.load %arg12[%c48_721, %c32_722] : memref<64x288xf32, #tpu.memory_space<vmem>>, vector<4x32xf32>
    tpu.vector_store %arg12[%c48_721, %c32_722], %453 {strides = array<i32>} : memref<64x288xf32, #tpu.memory_space<vmem>>, vector<4x32xf32>,
    %c0_723 = arith.constant 0 : index
    %c1_724 = arith.constant 1 : index
    %c13_725 = arith.constant 13 : index
    %c0_726 = arith.constant 0 : index
    %455 = vector.load %arg11[%c0_723, %c1_724, %c13_725, %c0_726] : memref<2x2x36x32xf32, #tpu.memory_space<vmem>>, vector<1x1x4x32xf32>
    %456 = vector.shape_cast %455 : vector<1x1x4x32xf32> to vector<4x32xf32>
    %c52_727 = arith.constant 52 : index
    %c32_728 = arith.constant 32 : index
    %457 = vector.load %arg12[%c52_727, %c32_728] : memref<64x288xf32, #tpu.memory_space<vmem>>, vector<4x32xf32>
    tpu.vector_store %arg12[%c52_727, %c32_728], %456 {strides = array<i32>} : memref<64x288xf32, #tpu.memory_space<vmem>>, vector<4x32xf32>,
    %c0_729 = arith.constant 0 : index
    %c1_730 = arith.constant 1 : index
    %c19_731 = arith.constant 19 : index
    %c0_732 = arith.constant 0 : index
    %458 = vector.load %arg11[%c0_729, %c1_730, %c19_731, %c0_732] : memref<2x2x36x32xf32, #tpu.memory_space<vmem>>, vector<1x1x4x32xf32>
    %459 = vector.shape_cast %458 : vector<1x1x4x32xf32> to vector<4x32xf32>
    %c56_733 = arith.constant 56 : index
    %c32_734 = arith.constant 32 : index
    %460 = vector.load %arg12[%c56_733, %c32_734] : memref<64x288xf32, #tpu.memory_space<vmem>>, vector<4x32xf32>
    tpu.vector_store %arg12[%c56_733, %c32_734], %459 {strides = array<i32>} : memref<64x288xf32, #tpu.memory_space<vmem>>, vector<4x32xf32>,
    %c0_735 = arith.constant 0 : index
    %c1_736 = arith.constant 1 : index
    %c25_737 = arith.constant 25 : index
    %c0_738 = arith.constant 0 : index
    %461 = vector.load %arg11[%c0_735, %c1_736, %c25_737, %c0_738] : memref<2x2x36x32xf32, #tpu.memory_space<vmem>>, vector<1x1x4x32xf32>
    %462 = vector.shape_cast %461 : vector<1x1x4x32xf32> to vector<4x32xf32>
    %c60_739 = arith.constant 60 : index
    %c32_740 = arith.constant 32 : index
    %463 = vector.load %arg12[%c60_739, %c32_740] : memref<64x288xf32, #tpu.memory_space<vmem>>, vector<4x32xf32>
    tpu.vector_store %arg12[%c60_739, %c32_740], %462 {strides = array<i32>} : memref<64x288xf32, #tpu.memory_space<vmem>>, vector<4x32xf32>,
    %c0_741 = arith.constant 0 : index
    %c0_742 = arith.constant 0 : index
    %c8_743 = arith.constant 8 : index
    %c0_744 = arith.constant 0 : index
    %464 = vector.load %arg11[%c0_741, %c0_742, %c8_743, %c0_744] : memref<2x2x36x32xf32, #tpu.memory_space<vmem>>, vector<1x1x4x32xf32>
    %465 = vector.shape_cast %464 : vector<1x1x4x32xf32> to vector<4x32xf32>
    %c48_745 = arith.constant 48 : index
    %c64_746 = arith.constant 64 : index
    %466 = vector.load %arg12[%c48_745, %c64_746] : memref<64x288xf32, #tpu.memory_space<vmem>>, vector<4x32xf32>
    tpu.vector_store %arg12[%c48_745, %c64_746], %465 {strides = array<i32>} : memref<64x288xf32, #tpu.memory_space<vmem>>, vector<4x32xf32>,
    %c0_747 = arith.constant 0 : index
    %c0_748 = arith.constant 0 : index
    %c14_749 = arith.constant 14 : index
    %c0_750 = arith.constant 0 : index
    %467 = vector.load %arg11[%c0_747, %c0_748, %c14_749, %c0_750] : memref<2x2x36x32xf32, #tpu.memory_space<vmem>>, vector<1x1x4x32xf32>
    %468 = vector.shape_cast %467 : vector<1x1x4x32xf32> to vector<4x32xf32>
    %c52_751 = arith.constant 52 : index
    %c64_752 = arith.constant 64 : index
    %469 = vector.load %arg12[%c52_751, %c64_752] : memref<64x288xf32, #tpu.memory_space<vmem>>, vector<4x32xf32>
    tpu.vector_store %arg12[%c52_751, %c64_752], %468 {strides = array<i32>} : memref<64x288xf32, #tpu.memory_space<vmem>>, vector<4x32xf32>,
    %c0_753 = arith.constant 0 : index
    %c0_754 = arith.constant 0 : index
    %c20_755 = arith.constant 20 : index
    %c0_756 = arith.constant 0 : index
    %470 = vector.load %arg11[%c0_753, %c0_754, %c20_755, %c0_756] : memref<2x2x36x32xf32, #tpu.memory_space<vmem>>, vector<1x1x4x32xf32>
    %471 = vector.shape_cast %470 : vector<1x1x4x32xf32> to vector<4x32xf32>
    %c56_757 = arith.constant 56 : index
    %c64_758 = arith.constant 64 : index
    %472 = vector.load %arg12[%c56_757, %c64_758] : memref<64x288xf32, #tpu.memory_space<vmem>>, vector<4x32xf32>
    tpu.vector_store %arg12[%c56_757, %c64_758], %471 {strides = array<i32>} : memref<64x288xf32, #tpu.memory_space<vmem>>, vector<4x32xf32>,
    %c0_759 = arith.constant 0 : index
    %c0_760 = arith.constant 0 : index
    %c26_761 = arith.constant 26 : index
    %c0_762 = arith.constant 0 : index
    %473 = vector.load %arg11[%c0_759, %c0_760, %c26_761, %c0_762] : memref<2x2x36x32xf32, #tpu.memory_space<vmem>>, vector<1x1x4x32xf32>
    %474 = vector.shape_cast %473 : vector<1x1x4x32xf32> to vector<4x32xf32>
    %c60_763 = arith.constant 60 : index
    %c64_764 = arith.constant 64 : index
    %475 = vector.load %arg12[%c60_763, %c64_764] : memref<64x288xf32, #tpu.memory_space<vmem>>, vector<4x32xf32>
    tpu.vector_store %arg12[%c60_763, %c64_764], %474 {strides = array<i32>} : memref<64x288xf32, #tpu.memory_space<vmem>>, vector<4x32xf32>,
    %c1_765 = arith.constant 1 : index
    %c0_766 = arith.constant 0 : index
    %c7_767 = arith.constant 7 : index
    %c0_768 = arith.constant 0 : index
    %476 = vector.load %arg11[%c1_765, %c0_766, %c7_767, %c0_768] : memref<2x2x36x32xf32, #tpu.memory_space<vmem>>, vector<1x1x4x32xf32>
    %477 = vector.shape_cast %476 : vector<1x1x4x32xf32> to vector<4x32xf32>
    %c48_769 = arith.constant 48 : index
    %c96_770 = arith.constant 96 : index
    %478 = vector.load %arg12[%c48_769, %c96_770] : memref<64x288xf32, #tpu.memory_space<vmem>>, vector<4x32xf32>
    tpu.vector_store %arg12[%c48_769, %c96_770], %477 {strides = array<i32>} : memref<64x288xf32, #tpu.memory_space<vmem>>, vector<4x32xf32>,
    %c1_771 = arith.constant 1 : index
    %c0_772 = arith.constant 0 : index
    %c13_773 = arith.constant 13 : index
    %c0_774 = arith.constant 0 : index
    %479 = vector.load %arg11[%c1_771, %c0_772, %c13_773, %c0_774] : memref<2x2x36x32xf32, #tpu.memory_space<vmem>>, vector<1x1x4x32xf32>
    %480 = vector.shape_cast %479 : vector<1x1x4x32xf32> to vector<4x32xf32>
    %c52_775 = arith.constant 52 : index
    %c96_776 = arith.constant 96 : index
    %481 = vector.load %arg12[%c52_775, %c96_776] : memref<64x288xf32, #tpu.memory_space<vmem>>, vector<4x32xf32>
    tpu.vector_store %arg12[%c52_775, %c96_776], %480 {strides = array<i32>} : memref<64x288xf32, #tpu.memory_space<vmem>>, vector<4x32xf32>,
    %c1_777 = arith.constant 1 : index
    %c0_778 = arith.constant 0 : index
    %c19_779 = arith.constant 19 : index
    %c0_780 = arith.constant 0 : index
    %482 = vector.load %arg11[%c1_777, %c0_778, %c19_779, %c0_780] : memref<2x2x36x32xf32, #tpu.memory_space<vmem>>, vector<1x1x4x32xf32>
    %483 = vector.shape_cast %482 : vector<1x1x4x32xf32> to vector<4x32xf32>
    %c56_781 = arith.constant 56 : index
    %c96_782 = arith.constant 96 : index
    %484 = vector.load %arg12[%c56_781, %c96_782] : memref<64x288xf32, #tpu.memory_space<vmem>>, vector<4x32xf32>
    tpu.vector_store %arg12[%c56_781, %c96_782], %483 {strides = array<i32>} : memref<64x288xf32, #tpu.memory_space<vmem>>, vector<4x32xf32>,
    %c1_783 = arith.constant 1 : index
    %c0_784 = arith.constant 0 : index
    %c25_785 = arith.constant 25 : index
    %c0_786 = arith.constant 0 : index
    %485 = vector.load %arg11[%c1_783, %c0_784, %c25_785, %c0_786] : memref<2x2x36x32xf32, #tpu.memory_space<vmem>>, vector<1x1x4x32xf32>
    %486 = vector.shape_cast %485 : vector<1x1x4x32xf32> to vector<4x32xf32>
    %c60_787 = arith.constant 60 : index
    %c96_788 = arith.constant 96 : index
    %487 = vector.load %arg12[%c60_787, %c96_788] : memref<64x288xf32, #tpu.memory_space<vmem>>, vector<4x32xf32>
    tpu.vector_store %arg12[%c60_787, %c96_788], %486 {strides = array<i32>} : memref<64x288xf32, #tpu.memory_space<vmem>>, vector<4x32xf32>,
    %c1_789 = arith.constant 1 : index
    %c1_790 = arith.constant 1 : index
    %c7_791 = arith.constant 7 : index
    %c0_792 = arith.constant 0 : index
    %488 = vector.load %arg11[%c1_789, %c1_790, %c7_791, %c0_792] : memref<2x2x36x32xf32, #tpu.memory_space<vmem>>, vector<1x1x4x32xf32>
    %489 = vector.shape_cast %488 : vector<1x1x4x32xf32> to vector<4x32xf32>
    %c48_793 = arith.constant 48 : index
    %c128_794 = arith.constant 128 : index
    %490 = vector.load %arg12[%c48_793, %c128_794] : memref<64x288xf32, #tpu.memory_space<vmem>>, vector<4x32xf32>
    tpu.vector_store %arg12[%c48_793, %c128_794], %489 {strides = array<i32>} : memref<64x288xf32, #tpu.memory_space<vmem>>, vector<4x32xf32>,
    %c1_795 = arith.constant 1 : index
    %c1_796 = arith.constant 1 : index
    %c13_797 = arith.constant 13 : index
    %c0_798 = arith.constant 0 : index
    %491 = vector.load %arg11[%c1_795, %c1_796, %c13_797, %c0_798] : memref<2x2x36x32xf32, #tpu.memory_space<vmem>>, vector<1x1x4x32xf32>
    %492 = vector.shape_cast %491 : vector<1x1x4x32xf32> to vector<4x32xf32>
    %c52_799 = arith.constant 52 : index
    %c128_800 = arith.constant 128 : index
    %493 = vector.load %arg12[%c52_799, %c128_800] : memref<64x288xf32, #tpu.memory_space<vmem>>, vector<4x32xf32>
    tpu.vector_store %arg12[%c52_799, %c128_800], %492 {strides = array<i32>} : memref<64x288xf32, #tpu.memory_space<vmem>>, vector<4x32xf32>,
    %c1_801 = arith.constant 1 : index
    %c1_802 = arith.constant 1 : index
    %c19_803 = arith.constant 19 : index
    %c0_804 = arith.constant 0 : index
    %494 = vector.load %arg11[%c1_801, %c1_802, %c19_803, %c0_804] : memref<2x2x36x32xf32, #tpu.memory_space<vmem>>, vector<1x1x4x32xf32>
    %495 = vector.shape_cast %494 : vector<1x1x4x32xf32> to vector<4x32xf32>
    %c56_805 = arith.constant 56 : index
    %c128_806 = arith.constant 128 : index
    %496 = vector.load %arg12[%c56_805, %c128_806] : memref<64x288xf32, #tpu.memory_space<vmem>>, vector<4x32xf32>
    tpu.vector_store %arg12[%c56_805, %c128_806], %495 {strides = array<i32>} : memref<64x288xf32, #tpu.memory_space<vmem>>, vector<4x32xf32>,
    %c1_807 = arith.constant 1 : index
    %c1_808 = arith.constant 1 : index
    %c25_809 = arith.constant 25 : index
    %c0_810 = arith.constant 0 : index
    %497 = vector.load %arg11[%c1_807, %c1_808, %c25_809, %c0_810] : memref<2x2x36x32xf32, #tpu.memory_space<vmem>>, vector<1x1x4x32xf32>
    %498 = vector.shape_cast %497 : vector<1x1x4x32xf32> to vector<4x32xf32>
    %c60_811 = arith.constant 60 : index
    %c128_812 = arith.constant 128 : index
    %499 = vector.load %arg12[%c60_811, %c128_812] : memref<64x288xf32, #tpu.memory_space<vmem>>, vector<4x32xf32>
    tpu.vector_store %arg12[%c60_811, %c128_812], %498 {strides = array<i32>} : memref<64x288xf32, #tpu.memory_space<vmem>>, vector<4x32xf32>,
    %c1_813 = arith.constant 1 : index
    %c0_814 = arith.constant 0 : index
    %c8_815 = arith.constant 8 : index
    %c0_816 = arith.constant 0 : index
    %500 = vector.load %arg11[%c1_813, %c0_814, %c8_815, %c0_816] : memref<2x2x36x32xf32, #tpu.memory_space<vmem>>, vector<1x1x4x32xf32>
    %501 = vector.shape_cast %500 : vector<1x1x4x32xf32> to vector<4x32xf32>
    %c48_817 = arith.constant 48 : index
    %c160_818 = arith.constant 160 : index
    %502 = vector.load %arg12[%c48_817, %c160_818] : memref<64x288xf32, #tpu.memory_space<vmem>>, vector<4x32xf32>
    tpu.vector_store %arg12[%c48_817, %c160_818], %501 {strides = array<i32>} : memref<64x288xf32, #tpu.memory_space<vmem>>, vector<4x32xf32>,
    %c1_819 = arith.constant 1 : index
    %c0_820 = arith.constant 0 : index
    %c14_821 = arith.constant 14 : index
    %c0_822 = arith.constant 0 : index
    %503 = vector.load %arg11[%c1_819, %c0_820, %c14_821, %c0_822] : memref<2x2x36x32xf32, #tpu.memory_space<vmem>>, vector<1x1x4x32xf32>
    %504 = vector.shape_cast %503 : vector<1x1x4x32xf32> to vector<4x32xf32>
    %c52_823 = arith.constant 52 : index
    %c160_824 = arith.constant 160 : index
    %505 = vector.load %arg12[%c52_823, %c160_824] : memref<64x288xf32, #tpu.memory_space<vmem>>, vector<4x32xf32>
    tpu.vector_store %arg12[%c52_823, %c160_824], %504 {strides = array<i32>} : memref<64x288xf32, #tpu.memory_space<vmem>>, vector<4x32xf32>,
    %c1_825 = arith.constant 1 : index
    %c0_826 = arith.constant 0 : index
    %c20_827 = arith.constant 20 : index
    %c0_828 = arith.constant 0 : index
    %506 = vector.load %arg11[%c1_825, %c0_826, %c20_827, %c0_828] : memref<2x2x36x32xf32, #tpu.memory_space<vmem>>, vector<1x1x4x32xf32>
    %507 = vector.shape_cast %506 : vector<1x1x4x32xf32> to vector<4x32xf32>
    %c56_829 = arith.constant 56 : index
    %c160_830 = arith.constant 160 : index
    %508 = vector.load %arg12[%c56_829, %c160_830] : memref<64x288xf32, #tpu.memory_space<vmem>>, vector<4x32xf32>
    tpu.vector_store %arg12[%c56_829, %c160_830], %507 {strides = array<i32>} : memref<64x288xf32, #tpu.memory_space<vmem>>, vector<4x32xf32>,
    %c1_831 = arith.constant 1 : index
    %c0_832 = arith.constant 0 : index
    %c26_833 = arith.constant 26 : index
    %c0_834 = arith.constant 0 : index
    %509 = vector.load %arg11[%c1_831, %c0_832, %c26_833, %c0_834] : memref<2x2x36x32xf32, #tpu.memory_space<vmem>>, vector<1x1x4x32xf32>
    %510 = vector.shape_cast %509 : vector<1x1x4x32xf32> to vector<4x32xf32>
    %c60_835 = arith.constant 60 : index
    %c160_836 = arith.constant 160 : index
    %511 = vector.load %arg12[%c60_835, %c160_836] : memref<64x288xf32, #tpu.memory_space<vmem>>, vector<4x32xf32>
    tpu.vector_store %arg12[%c60_835, %c160_836], %510 {strides = array<i32>} : memref<64x288xf32, #tpu.memory_space<vmem>>, vector<4x32xf32>,
    %c0_837 = arith.constant 0 : index
    %c0_838 = arith.constant 0 : index
    %c13_839 = arith.constant 13 : index
    %c0_840 = arith.constant 0 : index
    %512 = vector.load %arg11[%c0_837, %c0_838, %c13_839, %c0_840] : memref<2x2x36x32xf32, #tpu.memory_space<vmem>>, vector<1x1x4x32xf32>
    %513 = vector.shape_cast %512 : vector<1x1x4x32xf32> to vector<4x32xf32>
    %c48_841 = arith.constant 48 : index
    %c192_842 = arith.constant 192 : index
    %514 = vector.load %arg12[%c48_841, %c192_842] : memref<64x288xf32, #tpu.memory_space<vmem>>, vector<4x32xf32>
    tpu.vector_store %arg12[%c48_841, %c192_842], %513 {strides = array<i32>} : memref<64x288xf32, #tpu.memory_space<vmem>>, vector<4x32xf32>,
    %c0_843 = arith.constant 0 : index
    %c0_844 = arith.constant 0 : index
    %c19_845 = arith.constant 19 : index
    %c0_846 = arith.constant 0 : index
    %515 = vector.load %arg11[%c0_843, %c0_844, %c19_845, %c0_846] : memref<2x2x36x32xf32, #tpu.memory_space<vmem>>, vector<1x1x4x32xf32>
    %516 = vector.shape_cast %515 : vector<1x1x4x32xf32> to vector<4x32xf32>
    %c52_847 = arith.constant 52 : index
    %c192_848 = arith.constant 192 : index
    %517 = vector.load %arg12[%c52_847, %c192_848] : memref<64x288xf32, #tpu.memory_space<vmem>>, vector<4x32xf32>
    tpu.vector_store %arg12[%c52_847, %c192_848], %516 {strides = array<i32>} : memref<64x288xf32, #tpu.memory_space<vmem>>, vector<4x32xf32>,
    %c0_849 = arith.constant 0 : index
    %c0_850 = arith.constant 0 : index
    %c25_851 = arith.constant 25 : index
    %c0_852 = arith.constant 0 : index
    %518 = vector.load %arg11[%c0_849, %c0_850, %c25_851, %c0_852] : memref<2x2x36x32xf32, #tpu.memory_space<vmem>>, vector<1x1x4x32xf32>
    %519 = vector.shape_cast %518 : vector<1x1x4x32xf32> to vector<4x32xf32>
    %c56_853 = arith.constant 56 : index
    %c192_854 = arith.constant 192 : index
    %520 = vector.load %arg12[%c56_853, %c192_854] : memref<64x288xf32, #tpu.memory_space<vmem>>, vector<4x32xf32>
    tpu.vector_store %arg12[%c56_853, %c192_854], %519 {strides = array<i32>} : memref<64x288xf32, #tpu.memory_space<vmem>>, vector<4x32xf32>,
    %c0_855 = arith.constant 0 : index
    %c0_856 = arith.constant 0 : index
    %c31_857 = arith.constant 31 : index
    %c0_858 = arith.constant 0 : index
    %521 = vector.load %arg11[%c0_855, %c0_856, %c31_857, %c0_858] : memref<2x2x36x32xf32, #tpu.memory_space<vmem>>, vector<1x1x4x32xf32>
    %522 = vector.shape_cast %521 : vector<1x1x4x32xf32> to vector<4x32xf32>
    %c60_859 = arith.constant 60 : index
    %c192_860 = arith.constant 192 : index
    %523 = vector.load %arg12[%c60_859, %c192_860] : memref<64x288xf32, #tpu.memory_space<vmem>>, vector<4x32xf32>
    tpu.vector_store %arg12[%c60_859, %c192_860], %522 {strides = array<i32>} : memref<64x288xf32, #tpu.memory_space<vmem>>, vector<4x32xf32>,
    %c0_861 = arith.constant 0 : index
    %c1_862 = arith.constant 1 : index
    %c13_863 = arith.constant 13 : index
    %c0_864 = arith.constant 0 : index
    %524 = vector.load %arg11[%c0_861, %c1_862, %c13_863, %c0_864] : memref<2x2x36x32xf32, #tpu.memory_space<vmem>>, vector<1x1x4x32xf32>
    %525 = vector.shape_cast %524 : vector<1x1x4x32xf32> to vector<4x32xf32>
    %c48_865 = arith.constant 48 : index
    %c224_866 = arith.constant 224 : index
    %526 = vector.load %arg12[%c48_865, %c224_866] : memref<64x288xf32, #tpu.memory_space<vmem>>, vector<4x32xf32>
    tpu.vector_store %arg12[%c48_865, %c224_866], %525 {strides = array<i32>} : memref<64x288xf32, #tpu.memory_space<vmem>>, vector<4x32xf32>,
    %c0_867 = arith.constant 0 : index
    %c1_868 = arith.constant 1 : index
    %c19_869 = arith.constant 19 : index
    %c0_870 = arith.constant 0 : index
    %527 = vector.load %arg11[%c0_867, %c1_868, %c19_869, %c0_870] : memref<2x2x36x32xf32, #tpu.memory_space<vmem>>, vector<1x1x4x32xf32>
    %528 = vector.shape_cast %527 : vector<1x1x4x32xf32> to vector<4x32xf32>
    %c52_871 = arith.constant 52 : index
    %c224_872 = arith.constant 224 : index
    %529 = vector.load %arg12[%c52_871, %c224_872] : memref<64x288xf32, #tpu.memory_space<vmem>>, vector<4x32xf32>
    tpu.vector_store %arg12[%c52_871, %c224_872], %528 {strides = array<i32>} : memref<64x288xf32, #tpu.memory_space<vmem>>, vector<4x32xf32>,
    %c0_873 = arith.constant 0 : index
    %c1_874 = arith.constant 1 : index
    %c25_875 = arith.constant 25 : index
    %c0_876 = arith.constant 0 : index
    %530 = vector.load %arg11[%c0_873, %c1_874, %c25_875, %c0_876] : memref<2x2x36x32xf32, #tpu.memory_space<vmem>>, vector<1x1x4x32xf32>
    %531 = vector.shape_cast %530 : vector<1x1x4x32xf32> to vector<4x32xf32>
    %c56_877 = arith.constant 56 : index
    %c224_878 = arith.constant 224 : index
    %532 = vector.load %arg12[%c56_877, %c224_878] : memref<64x288xf32, #tpu.memory_space<vmem>>, vector<4x32xf32>
    tpu.vector_store %arg12[%c56_877, %c224_878], %531 {strides = array<i32>} : memref<64x288xf32, #tpu.memory_space<vmem>>, vector<4x32xf32>,
    %c0_879 = arith.constant 0 : index
    %c1_880 = arith.constant 1 : index
    %c31_881 = arith.constant 31 : index
    %c0_882 = arith.constant 0 : index
    %533 = vector.load %arg11[%c0_879, %c1_880, %c31_881, %c0_882] : memref<2x2x36x32xf32, #tpu.memory_space<vmem>>, vector<1x1x4x32xf32>
    %534 = vector.shape_cast %533 : vector<1x1x4x32xf32> to vector<4x32xf32>
    %c60_883 = arith.constant 60 : index
    %c224_884 = arith.constant 224 : index
    %535 = vector.load %arg12[%c60_883, %c224_884] : memref<64x288xf32, #tpu.memory_space<vmem>>, vector<4x32xf32>
    tpu.vector_store %arg12[%c60_883, %c224_884], %534 {strides = array<i32>} : memref<64x288xf32, #tpu.memory_space<vmem>>, vector<4x32xf32>,
    %c0_885 = arith.constant 0 : index
    %c0_886 = arith.constant 0 : index
    %c14_887 = arith.constant 14 : index
    %c0_888 = arith.constant 0 : index
    %536 = vector.load %arg11[%c0_885, %c0_886, %c14_887, %c0_888] : memref<2x2x36x32xf32, #tpu.memory_space<vmem>>, vector<1x1x4x32xf32>
    %537 = vector.shape_cast %536 : vector<1x1x4x32xf32> to vector<4x32xf32>
    %c48_889 = arith.constant 48 : index
    %c256_890 = arith.constant 256 : index
    %538 = vector.load %arg12[%c48_889, %c256_890] : memref<64x288xf32, #tpu.memory_space<vmem>>, vector<4x32xf32>
    tpu.vector_store %arg12[%c48_889, %c256_890], %537 {strides = array<i32>} : memref<64x288xf32, #tpu.memory_space<vmem>>, vector<4x32xf32>,
    %c0_891 = arith.constant 0 : index
    %c0_892 = arith.constant 0 : index
    %c20_893 = arith.constant 20 : index
    %c0_894 = arith.constant 0 : index
    %539 = vector.load %arg11[%c0_891, %c0_892, %c20_893, %c0_894] : memref<2x2x36x32xf32, #tpu.memory_space<vmem>>, vector<1x1x4x32xf32>
    %540 = vector.shape_cast %539 : vector<1x1x4x32xf32> to vector<4x32xf32>
    %c52_895 = arith.constant 52 : index
    %c256_896 = arith.constant 256 : index
    %541 = vector.load %arg12[%c52_895, %c256_896] : memref<64x288xf32, #tpu.memory_space<vmem>>, vector<4x32xf32>
    tpu.vector_store %arg12[%c52_895, %c256_896], %540 {strides = array<i32>} : memref<64x288xf32, #tpu.memory_space<vmem>>, vector<4x32xf32>,
    %c0_897 = arith.constant 0 : index
    %c0_898 = arith.constant 0 : index
    %c26_899 = arith.constant 26 : index
    %c0_900 = arith.constant 0 : index
    %542 = vector.load %arg11[%c0_897, %c0_898, %c26_899, %c0_900] : memref<2x2x36x32xf32, #tpu.memory_space<vmem>>, vector<1x1x4x32xf32>
    %543 = vector.shape_cast %542 : vector<1x1x4x32xf32> to vector<4x32xf32>
    %c56_901 = arith.constant 56 : index
    %c256_902 = arith.constant 256 : index
    %544 = vector.load %arg12[%c56_901, %c256_902] : memref<64x288xf32, #tpu.memory_space<vmem>>, vector<4x32xf32>
    tpu.vector_store %arg12[%c56_901, %c256_902], %543 {strides = array<i32>} : memref<64x288xf32, #tpu.memory_space<vmem>>, vector<4x32xf32>,
    %c0_903 = arith.constant 0 : index
    %c0_904 = arith.constant 0 : index
    %c32_905 = arith.constant 32 : index
    %c0_906 = arith.constant 0 : index
    %545 = vector.load %arg11[%c0_903, %c0_904, %c32_905, %c0_906] : memref<2x2x36x32xf32, #tpu.memory_space<vmem>>, vector<1x1x4x32xf32>
    %546 = vector.shape_cast %545 : vector<1x1x4x32xf32> to vector<4x32xf32>
    %c60_907 = arith.constant 60 : index
    %c256_908 = arith.constant 256 : index
    %547 = vector.load %arg12[%c60_907, %c256_908] : memref<64x288xf32, #tpu.memory_space<vmem>>, vector<4x32xf32>
    tpu.vector_store %arg12[%c60_907, %c256_908], %546 {strides = array<i32>} : memref<64x288xf32, #tpu.memory_space<vmem>>, vector<4x32xf32>,
    %c0_909 = arith.constant 0 : index
    %c0_910 = arith.constant 0 : index
    %548 = vector.load %arg12[%c0_909, %c0_910] : memref<64x288xf32, #tpu.memory_space<vmem>>, vector<64x288xf32>
    %549 = arith.truncf %548 : vector<64x288xf32> to vector<64x288xbf16>
    %c0_911 = arith.constant 0 : index
    %c0_912 = arith.constant 0 : index
    %550 = vector.load %arg4[%c0_911, %c0_912] : memref<288x64xbf16, #tpu.memory_space<vmem>>, vector<288x64xbf16>
    %cst_913 = arith.constant dense<0.000000e+00> : vector<64x64xf32>
    %551 = tpu.matmul %549, %550, %cst_913 {dimension_numbers = #tpu.dot_dimension_numbers<[1], [0], [0], [1], [0, 0, 1, 1], [], []>} : vector<64x288xbf16>, vector<288x64xbf16>, vector<64x64xf32> -> vector<64x64xf32>
    %552 = vector.extract_strided_slice %551 {offsets = [0, 0], sizes = [16, 64], strides = [1, 1]} : vector<64x64xf32> to vector<16x64xf32>
    %553 = vector.extract_strided_slice %551 {offsets = [16, 0], sizes = [16, 64], strides = [1, 1]} : vector<64x64xf32> to vector<16x64xf32>
    %554 = arith.maximumf %552, %553 : vector<16x64xf32>
    %555 = vector.extract_strided_slice %551 {offsets = [32, 0], sizes = [16, 64], strides = [1, 1]} : vector<64x64xf32> to vector<16x64xf32>
    %556 = vector.extract_strided_slice %551 {offsets = [48, 0], sizes = [16, 64], strides = [1, 1]} : vector<64x64xf32> to vector<16x64xf32>
    %557 = arith.maximumf %555, %556 : vector<16x64xf32>
    %558 = arith.maximumf %554, %557 : vector<16x64xf32>
    %c0_914 = arith.constant 0 : index
    %c0_915 = arith.constant 0 : index
    %559 = vector.load %arg5[%c0_914, %c0_915] : memref<1x64xf32, #tpu.memory_space<vmem>>, vector<1x64xf32>
    %560 = vector.broadcast %559 : vector<1x64xf32> to vector<16x64xf32>
    %561 = arith.addf %558, %560 : vector<16x64xf32>
    %cst_916 = arith.constant 0.000000e+00 : f32
    %562 = vector.broadcast %cst_916 : f32 to vector<16x64xf32>
    %563 = arith.maximumf %561, %562 : vector<16x64xf32>
    %564 = vector.extract_strided_slice %563 {offsets = [0, 0], sizes = [1, 64], strides = [1, 1]} : vector<16x64xf32> to vector<1x64xf32>
    %c0_917 = arith.constant 0 : index
    %c0_918 = arith.constant 0 : index
    %565 = vector.load %arg13[%c0_917, %c0_918] : memref<1x1024xf32, #tpu.memory_space<vmem>>, vector<1x64xf32>
    tpu.vector_store %arg13[%c0_917, %c0_918], %564 {strides = array<i32>} : memref<1x1024xf32, #tpu.memory_space<vmem>>, vector<1x64xf32>,
    %566 = vector.extract_strided_slice %563 {offsets = [1, 0], sizes = [1, 64], strides = [1, 1]} : vector<16x64xf32> to vector<1x64xf32>
    %c0_919 = arith.constant 0 : index
    %c64_920 = arith.constant 64 : index
    %567 = vector.load %arg13[%c0_919, %c64_920] : memref<1x1024xf32, #tpu.memory_space<vmem>>, vector<1x64xf32>
    tpu.vector_store %arg13[%c0_919, %c64_920], %566 {strides = array<i32>} : memref<1x1024xf32, #tpu.memory_space<vmem>>, vector<1x64xf32>,
    %568 = vector.extract_strided_slice %563 {offsets = [2, 0], sizes = [1, 64], strides = [1, 1]} : vector<16x64xf32> to vector<1x64xf32>
    %c0_921 = arith.constant 0 : index
    %c128_922 = arith.constant 128 : index
    %569 = vector.load %arg13[%c0_921, %c128_922] : memref<1x1024xf32, #tpu.memory_space<vmem>>, vector<1x64xf32>
    tpu.vector_store %arg13[%c0_921, %c128_922], %568 {strides = array<i32>} : memref<1x1024xf32, #tpu.memory_space<vmem>>, vector<1x64xf32>,
    %570 = vector.extract_strided_slice %563 {offsets = [3, 0], sizes = [1, 64], strides = [1, 1]} : vector<16x64xf32> to vector<1x64xf32>
    %c0_923 = arith.constant 0 : index
    %c192_924 = arith.constant 192 : index
    %571 = vector.load %arg13[%c0_923, %c192_924] : memref<1x1024xf32, #tpu.memory_space<vmem>>, vector<1x64xf32>
    tpu.vector_store %arg13[%c0_923, %c192_924], %570 {strides = array<i32>} : memref<1x1024xf32, #tpu.memory_space<vmem>>, vector<1x64xf32>,
    %572 = vector.extract_strided_slice %563 {offsets = [4, 0], sizes = [1, 64], strides = [1, 1]} : vector<16x64xf32> to vector<1x64xf32>
    %c0_925 = arith.constant 0 : index
    %c256_926 = arith.constant 256 : index
    %573 = vector.load %arg13[%c0_925, %c256_926] : memref<1x1024xf32, #tpu.memory_space<vmem>>, vector<1x64xf32>
    tpu.vector_store %arg13[%c0_925, %c256_926], %572 {strides = array<i32>} : memref<1x1024xf32, #tpu.memory_space<vmem>>, vector<1x64xf32>,
    %574 = vector.extract_strided_slice %563 {offsets = [5, 0], sizes = [1, 64], strides = [1, 1]} : vector<16x64xf32> to vector<1x64xf32>
    %c0_927 = arith.constant 0 : index
    %c320 = arith.constant 320 : index
    %575 = vector.load %arg13[%c0_927, %c320] : memref<1x1024xf32, #tpu.memory_space<vmem>>, vector<1x64xf32>
    tpu.vector_store %arg13[%c0_927, %c320], %574 {strides = array<i32>} : memref<1x1024xf32, #tpu.memory_space<vmem>>, vector<1x64xf32>,
    %576 = vector.extract_strided_slice %563 {offsets = [6, 0], sizes = [1, 64], strides = [1, 1]} : vector<16x64xf32> to vector<1x64xf32>
    %c0_928 = arith.constant 0 : index
    %c384 = arith.constant 384 : index
    %577 = vector.load %arg13[%c0_928, %c384] : memref<1x1024xf32, #tpu.memory_space<vmem>>, vector<1x64xf32>
    tpu.vector_store %arg13[%c0_928, %c384], %576 {strides = array<i32>} : memref<1x1024xf32, #tpu.memory_space<vmem>>, vector<1x64xf32>,
    %578 = vector.extract_strided_slice %563 {offsets = [7, 0], sizes = [1, 64], strides = [1, 1]} : vector<16x64xf32> to vector<1x64xf32>
    %c0_929 = arith.constant 0 : index
    %c448 = arith.constant 448 : index
    %579 = vector.load %arg13[%c0_929, %c448] : memref<1x1024xf32, #tpu.memory_space<vmem>>, vector<1x64xf32>
    tpu.vector_store %arg13[%c0_929, %c448], %578 {strides = array<i32>} : memref<1x1024xf32, #tpu.memory_space<vmem>>, vector<1x64xf32>,
    %580 = vector.extract_strided_slice %563 {offsets = [8, 0], sizes = [1, 64], strides = [1, 1]} : vector<16x64xf32> to vector<1x64xf32>
    %c0_930 = arith.constant 0 : index
    %c512 = arith.constant 512 : index
    %581 = vector.load %arg13[%c0_930, %c512] : memref<1x1024xf32, #tpu.memory_space<vmem>>, vector<1x64xf32>
    tpu.vector_store %arg13[%c0_930, %c512], %580 {strides = array<i32>} : memref<1x1024xf32, #tpu.memory_space<vmem>>, vector<1x64xf32>,
    %582 = vector.extract_strided_slice %563 {offsets = [9, 0], sizes = [1, 64], strides = [1, 1]} : vector<16x64xf32> to vector<1x64xf32>
    %c0_931 = arith.constant 0 : index
    %c576 = arith.constant 576 : index
    %583 = vector.load %arg13[%c0_931, %c576] : memref<1x1024xf32, #tpu.memory_space<vmem>>, vector<1x64xf32>
    tpu.vector_store %arg13[%c0_931, %c576], %582 {strides = array<i32>} : memref<1x1024xf32, #tpu.memory_space<vmem>>, vector<1x64xf32>,
    %584 = vector.extract_strided_slice %563 {offsets = [10, 0], sizes = [1, 64], strides = [1, 1]} : vector<16x64xf32> to vector<1x64xf32>
    %c0_932 = arith.constant 0 : index
    %c640 = arith.constant 640 : index
    %585 = vector.load %arg13[%c0_932, %c640] : memref<1x1024xf32, #tpu.memory_space<vmem>>, vector<1x64xf32>
    tpu.vector_store %arg13[%c0_932, %c640], %584 {strides = array<i32>} : memref<1x1024xf32, #tpu.memory_space<vmem>>, vector<1x64xf32>,
    %586 = vector.extract_strided_slice %563 {offsets = [11, 0], sizes = [1, 64], strides = [1, 1]} : vector<16x64xf32> to vector<1x64xf32>
    %c0_933 = arith.constant 0 : index
    %c704 = arith.constant 704 : index
    %587 = vector.load %arg13[%c0_933, %c704] : memref<1x1024xf32, #tpu.memory_space<vmem>>, vector<1x64xf32>
    tpu.vector_store %arg13[%c0_933, %c704], %586 {strides = array<i32>} : memref<1x1024xf32, #tpu.memory_space<vmem>>, vector<1x64xf32>,
    %588 = vector.extract_strided_slice %563 {offsets = [12, 0], sizes = [1, 64], strides = [1, 1]} : vector<16x64xf32> to vector<1x64xf32>
    %c0_934 = arith.constant 0 : index
    %c768 = arith.constant 768 : index
    %589 = vector.load %arg13[%c0_934, %c768] : memref<1x1024xf32, #tpu.memory_space<vmem>>, vector<1x64xf32>
    tpu.vector_store %arg13[%c0_934, %c768], %588 {strides = array<i32>} : memref<1x1024xf32, #tpu.memory_space<vmem>>, vector<1x64xf32>,
    %590 = vector.extract_strided_slice %563 {offsets = [13, 0], sizes = [1, 64], strides = [1, 1]} : vector<16x64xf32> to vector<1x64xf32>
    %c0_935 = arith.constant 0 : index
    %c832 = arith.constant 832 : index
    %591 = vector.load %arg13[%c0_935, %c832] : memref<1x1024xf32, #tpu.memory_space<vmem>>, vector<1x64xf32>
    tpu.vector_store %arg13[%c0_935, %c832], %590 {strides = array<i32>} : memref<1x1024xf32, #tpu.memory_space<vmem>>, vector<1x64xf32>,
    %592 = vector.extract_strided_slice %563 {offsets = [14, 0], sizes = [1, 64], strides = [1, 1]} : vector<16x64xf32> to vector<1x64xf32>
    %c0_936 = arith.constant 0 : index
    %c896 = arith.constant 896 : index
    %593 = vector.load %arg13[%c0_936, %c896] : memref<1x1024xf32, #tpu.memory_space<vmem>>, vector<1x64xf32>
    tpu.vector_store %arg13[%c0_936, %c896], %592 {strides = array<i32>} : memref<1x1024xf32, #tpu.memory_space<vmem>>, vector<1x64xf32>,
    %594 = vector.extract_strided_slice %563 {offsets = [15, 0], sizes = [1, 64], strides = [1, 1]} : vector<16x64xf32> to vector<1x64xf32>
    %c0_937 = arith.constant 0 : index
    %c960 = arith.constant 960 : index
    %595 = vector.load %arg13[%c0_937, %c960] : memref<1x1024xf32, #tpu.memory_space<vmem>>, vector<1x64xf32>
    tpu.vector_store %arg13[%c0_937, %c960], %594 {strides = array<i32>} : memref<1x1024xf32, #tpu.memory_space<vmem>>, vector<1x64xf32>,
    %c0_938 = arith.constant 0 : index
    %c0_939 = arith.constant 0 : index
    %596 = vector.load %arg13[%c0_938, %c0_939] : memref<1x1024xf32, #tpu.memory_space<vmem>>, vector<1x1024xf32>
    %597 = arith.truncf %596 : vector<1x1024xf32> to vector<1x1024xbf16>
    %c0_940 = arith.constant 0 : index
    %c0_941 = arith.constant 0 : index
    %598 = vector.load %arg6[%c0_940, %c0_941] : memref<1024x128xbf16, #tpu.memory_space<vmem>>, vector<1024x128xbf16>
    %cst_942 = arith.constant dense<0.000000e+00> : vector<1x128xf32>
    %599 = tpu.matmul %597, %598, %cst_942 {dimension_numbers = #tpu.dot_dimension_numbers<[1], [0], [0], [1], [0, 0, 1, 1], [], []>} : vector<1x1024xbf16>, vector<1024x128xbf16>, vector<1x128xf32> -> vector<1x128xf32>
    %c0_943 = arith.constant 0 : index
    %c0_944 = arith.constant 0 : index
    %600 = vector.load %arg7[%c0_943, %c0_944] : memref<1x128xf32, #tpu.memory_space<vmem>>, vector<1x128xf32>
    %601 = arith.addf %599, %600 : vector<1x128xf32>
    %cst_945 = arith.constant 0.000000e+00 : f32
    %602 = vector.broadcast %cst_945 : f32 to vector<1x128xf32>
    %603 = arith.maximumf %601, %602 : vector<1x128xf32>
    %604 = arith.truncf %603 : vector<1x128xf32> to vector<1x128xbf16>
    %c0_946 = arith.constant 0 : index
    %c0_947 = arith.constant 0 : index
    %605 = vector.load %arg8[%c0_946, %c0_947] : memref<128x10xbf16, #tpu.memory_space<vmem>>, vector<128x10xbf16>
    %cst_948 = arith.constant dense<0.000000e+00> : vector<1x10xf32>
    %606 = tpu.matmul %604, %605, %cst_948 {dimension_numbers = #tpu.dot_dimension_numbers<[1], [0], [0], [1], [0, 0, 1, 1], [], []>} : vector<1x128xbf16>, vector<128x10xbf16>, vector<1x10xf32> -> vector<1x10xf32>
    %c0_949 = arith.constant 0 : index
    %c0_950 = arith.constant 0 : index
    %607 = vector.load %arg9[%c0_949, %c0_950] : memref<1x10xf32, #tpu.memory_space<vmem>>, vector<1x10xf32>
    %608 = arith.addf %606, %607 : vector<1x10xf32>
    %c0_951 = arith.constant 0 : index
    %c0_952 = arith.constant 0 : index
    %c0_953 = arith.constant 0 : index
    %609 = vector.load %arg10[%c0_951, %c0_952, %c0_953] : memref<1x1x10xf32, #tpu.memory_space<vmem>>, vector<1x1x10xf32>
    %610 = vector.shape_cast %609 : vector<1x1x10xf32> to vector<1x10xf32>
    %611 = vector.shape_cast %608 : vector<1x10xf32> to vector<1x1x10xf32>
    tpu.vector_store %arg10[%c0_951, %c0_952, %c0_953], %611 {strides = array<i32>} : memref<1x1x10xf32, #tpu.memory_space<vmem>>, vector<1x1x10xf32>,
    return
  }
  func.func @transform_0(%arg0: i32) -> (i32, i32, i32) {
    %c0_i32 = arith.constant 0 : i32
    %c0_i32_0 = arith.constant 0 : i32
    %c0_i32_1 = arith.constant 0 : i32
    return %arg0, %c0_i32, %c0_i32_0 : i32, i32, i32
  }
  func.func @transform_1(%arg0: i32) -> (i32, i32) {
    %c0_i32 = arith.constant 0 : i32
    %c0_i32_0 = arith.constant 0 : i32
    %c0_i32_1 = arith.constant 0 : i32
    return %c0_i32, %c0_i32_0 : i32, i32
  }
  func.func @transform_2(%arg0: i32) -> (i32, i32) {
    %c0_i32 = arith.constant 0 : i32
    %c0_i32_0 = arith.constant 0 : i32
    %c0_i32_1 = arith.constant 0 : i32
    return %c0_i32, %c0_i32_0 : i32, i32
  }
  func.func @transform_3(%arg0: i32) -> (i32, i32) {
    %c0_i32 = arith.constant 0 : i32
    %c0_i32_0 = arith.constant 0 : i32
    %c0_i32_1 = arith.constant 0 : i32
    return %c0_i32, %c0_i32_0 : i32, i32
  }
  func.func @transform_4(%arg0: i32) -> (i32, i32) {
    %c0_i32 = arith.constant 0 : i32
    %c0_i32_0 = arith.constant 0 : i32
    %c0_i32_1 = arith.constant 0 : i32
    return %c0_i32, %c0_i32_0 : i32, i32
  }
  func.func @transform_5(%arg0: i32) -> (i32, i32) {
    %c0_i32 = arith.constant 0 : i32
    %c0_i32_0 = arith.constant 0 : i32
    %c0_i32_1 = arith.constant 0 : i32
    return %c0_i32, %c0_i32_0 : i32, i32
  }
  func.func @transform_6(%arg0: i32) -> (i32, i32) {
    %c0_i32 = arith.constant 0 : i32
    %c0_i32_0 = arith.constant 0 : i32
    %c0_i32_1 = arith.constant 0 : i32
    return %c0_i32, %c0_i32_0 : i32, i32
  }
  func.func @transform_7(%arg0: i32) -> (i32, i32) {
    %c0_i32 = arith.constant 0 : i32
    %c0_i32_0 = arith.constant 0 : i32
    %c0_i32_1 = arith.constant 0 : i32
    return %c0_i32, %c0_i32_0 : i32, i32
  }
  func.func @transform_8(%arg0: i32) -> (i32, i32) {
    %c0_i32 = arith.constant 0 : i32
    %c0_i32_0 = arith.constant 0 : i32
    %c0_i32_1 = arith.constant 0 : i32
    return %c0_i32, %c0_i32_0 : i32, i32
  }
  func.func @transform_9(%arg0: i32) -> (i32, i32, i32) {
    %c0_i32 = arith.constant 0 : i32
    %c0_i32_0 = arith.constant 0 : i32
    %c0_i32_1 = arith.constant 0 : i32
    return %arg0, %c0_i32, %c0_i32_0 : i32, i32, i32
  }
}

</mosaic_0001>

<bundles_post_ra>
// kernel: cnn_forward.1
= control target key start
LH: loop header
LB: loop body
LE: loop exit
PB: predicated region body
PF: predicated region fallthrough
CT: control target
= control target key end

     0   :  { %14 = vsyncpa [#allocation6], 0  ;;  %s4406_s0 = inlined_call_operand.vmem [shape: f32[2,256,9], index: 0, kind: input, shape index: {}]   ;;  %s4407_s1 = inlined_call_operand.vmem [shape: bf16[9,32], index: 1, kind: input, shape index: {}]   ;;  %s4408_s2 = inlined_call_operand.vmem [shape: f32[1,32], index: 2, kind: input, shape index: {}]   ;;  %s4409_s3 = inlined_call_operand.vmem [shape: bf16[288,64], index: 3, kind: input, shape index: {}]   ;;  %s4410_s4 = inlined_call_operand.vmem [shape: f32[1,64], index: 4, kind: input, shape index: {}]   ;;  %s4411_s5 = inlined_call_operand.vmem [shape: bf16[1024,128], index: 5, kind: input, shape index: {}]   ;;  %s4412_s6 = inlined_call_operand.vmem [shape: f32[1,128], index: 6, kind: input, shape index: {}]   ;;  %s4413_s7 = inlined_call_operand.vmem [shape: bf16[128,10], index: 7, kind: input, shape index: {}]   ;;  %s4414_s8 = inlined_call_operand.vmem [shape: f32[1,10], index: 8, kind: input, shape index: {}]   ;;  %s4415_s9 = inlined_call_operand.hbm [shape: f32[2,1,10], index: 9, kind: output, shape index: {}]  }
   0x1   :  { %16 = vsyncpa [#allocation6 + $0x1], 0  ;;  %s3490_s30 = smov 0   ;;  %s3492_s10 = smov 0  }
   0x2   :  { %s3494_s11 = smov 0   ;;  %s3496_s12 = smov 0  }
   0x3 LB: > { %s3511_s13 = sadd.s32 4294967295, %s3430_s12   ;;  %s2882_s14 = sadd.s32 4294967294, %s3430_s12   ;;  %s3430_s12 = sphi %s3496_s12, %s4425_s12   ;;  %s3426_s11 = sphi %s3494_s11, %s4424_s11   ;;  %s3422_s10 = sphi %s3492_s10, %s4423_s10   ;;  %s3418_s30 = sphi %s3490_s30, %s4422_s30  }
   0x4   : > { %s3515_s15 = sadd.s32 1, %s3430_s12   ;;  %s223_s16 = sadd.s32 1, %s3426_s11 }
   0x5   : > { %s220_s17 = ssub.s32 %s3430_s12, %s3515_s15  ;;  %p233_p0 = scmp.ne.s32.totalorder %s3426_s11, %s3422_s10 }
   0x6   : > { %p221_p1 = scmp.eq.s32.totalorder %s220_s17, 0  ;;  %p234_p2 = scmp.eq.s32.totalorder %s3511_s13, 1 }
   0x7   : > { %p239_p3 = scmp.ne.s32.totalorder %s3422_s10, %s3418_s30  ;;  %p240_p4 = scmp.eq.s32.totalorder %s2882_s14, 1 }
   0x8   : > { %s3526_s18 = scalar_select %p221_p1, %s3426_s11, %s223_s16  }
   0x9   : > { %p3528_p5 = por %p234_p2, %p233_p0  ;;  %p3532_p6 = por %p240_p4, %p239_p3 }
   0xa   : > { %p2885_p7 = scmp.ge.s32.totalorder %s3430_s12, 1  ;;  %p290_p8 = scmp.lt.s32.totalorder %s3430_s12, 3 }
   0xc   : > { %p291_p9 = pnand %p2885_p7, %p290_p8 }
   0xd   : > { %v3277_v0 = vld [vmem:[%s4407_s1] sm:$0x1f] (!%p291_p9)   ;;  %vm435_vm0 = vcmask (!%p291_p9), 1043456   ;;  %vm436_vm1 = vcmask (!%p291_p9), 1044480   ;;  %p325_p10 = scmp.lt.s32.totalorder (!%p291_p9), %s3511_s13, 1  ;;  %v3432_v1 = vmov (!%p291_p9), 65535  }
   0xe   : > { %294 = sbr.rel (%p291_p9) target bundleno = 1448 (0x5a8), region = 56  ;;  %v437_v2 = vsel (!%p291_p9), %vm435_vm0, 4294967295, %v3432_v1  ;;  %vm386_vm2 = vcmask (!%p291_p9), 72704   ;;  %vm604_vm3 = vcmask (!%p291_p9), 261120   ;;  %v3433_v53 = vmov (!%p291_p9), 0.0   ;;  %s3434_s28 = smov (!%p291_p9), 32  }
   0xf   : > { %v438_v3 = vsel (!%p291_p9), %vm436_vm1, %v437_v2, 0  ;;  %605 = vst.msk [vmem:[#allocation2] sm:$0xff] (!%p291_p9), %vm604_vm3, %v3433_v53  ;;  %606 = vst.msk [vmem:[#allocation2 + $0x8] sm:$0xff] (!%p291_p9), %vm604_vm3, %v3433_v53  ;;  %vm609_vm4 = vcmask (!%p291_p9), 257024   ;;  %s3435_s29 = smov (!%p291_p9), 64   ;;  %s3436_s14 = smov (!%p291_p9), 96  }
  0x10   : > { %v440_v4 = vand.u32 (!%p291_p9), %v3277_v0, %v438_v3  ;;  %607 = vst.msk [vmem:[#allocation2 + $0x10] sm:$0xff] (!%p291_p9), %vm604_vm3, %v3433_v53  ;;  %608 = vst.msk [vmem:[#allocation2 + $0x18] sm:$0xff] (!%p291_p9), %vm604_vm3, %v3433_v53  ;;  %vm643_vm5 = vcmask (!%p291_p9), 261124   ;;  %vm711_vm6 = vcmask (!%p291_p9), 519424   ;;  %vm739_vm7 = vcmask (!%p291_p9), 781824   ;;  %s3001_s17 = sshll.u32 (!%p291_p9), %s3511_s13, 4 }
  0x11   : > { %611 = vst.msk [vmem:[#allocation2 + $0x28] sm:$0xff] (!%p291_p9), %vm604_vm3, %v3433_v53  ;;  %612 = vst.msk [vmem:[#allocation2 + $0x30] sm:$0xff] (!%p291_p9), %vm604_vm3, %v3433_v53  ;;  %vm719_vm8 = vcmask (!%p291_p9), 523524   ;;  %vm767_vm9 = vcmask (!%p291_p9), 1044224   ;;  %vm747_vm10 = vcmask (!%p291_p9), 785924   ;;  %vm775_vm11 = vcmask (!%p291_p9), 1048324  }
  0x12   : > { %3165 = vmatprep.subr.bf16.mxu0 (!%p291_p9), %v440_v4  ;;  %613 = vst.msk [vmem:[#allocation2 + $0x38] sm:$0xff] (!%p291_p9), %vm604_vm3, %v3433_v53  ;;  %614 = vst.msk [vmem:[#allocation2 + $0x40] sm:$0xff] (!%p291_p9), %vm604_vm3, %v3433_v53  ;;  %vm3438_vm0 = vmmov (!%p291_p9), 0   ;;  %vm2812_vm1 = vcmask (!%p291_p9), 73728   ;;  %s3439_s26 = smov (!%p291_p9), [#allocation5]  }
  0x13   : > { %3166 = vmatpush3.bf16.msra.mxu0 (!%p291_p9), %v440_v4  ;;  %616 = vst.msk [vmem:[#allocation2 + $0x50] sm:$0xff] (!%p291_p9), %vm604_vm3, %v3433_v53  ;;  %617 = vst.msk [vmem:[#allocation2 + $0x58] sm:$0xff] (!%p291_p9), %vm604_vm3, %v3433_v53 }
  0x14   : > { %618 = vst.msk [vmem:[#allocation2 + $0x60] sm:$0xff] (!%p291_p9), %vm604_vm3, %v3433_v53  ;;  %619 = vst.msk [vmem:[#allocation2 + $0x68] sm:$0xff] (!%p291_p9), %vm604_vm3, %v3433_v53 }
  0x15   : > { %s326_s23 = scalar_select %p325_p10, %s3511_s13, 1  ;;  %621 = vst.msk [vmem:[#allocation2 + $0x78] sm:$0xff] %vm604_vm3, %v3433_v53  ;;  %622 = vst.msk [vmem:[#allocation2 + $0x80] sm:$0xff] %vm604_vm3, %v3433_v53 }
  0x16   : > { %623 = vst.msk [vmem:[#allocation2 + $0x88] sm:$0xff] %vm604_vm3, %v3433_v53  ;;  %624 = vst.msk [vmem:[#allocation2 + $0x90] sm:$0xff] %vm604_vm3, %v3433_v53 }
  0x17   : > { %s3004_s24 = sshll.u32 %s326_s23, 8  ;;  %610 = vst.msk [vmem:[#allocation2 + $0x20] sm:$0xf] %vm609_vm4, %v3433_v53  ;;  %615 = vst.msk [vmem:[#allocation2 + $0x48] sm:$0xf] %vm609_vm4, %v3433_v53 }
  0x18   : > { %s3546_s27 = scalar_lea.vmem %s4406_s0, %s3004_s24  ;;  %s4364_s24 = scalar_lea.hbm %s4415_s9, %s3001_s17 }
  0x19   : > { %v331_v5 = vld [vmem:[%s3546_s27] sm:$0xff]  ;;  %v332_v6 = vld [vmem:[%s3546_s27 + $0x8] sm:$0xff]  ;;  %v333_v7 = vld [vmem:[%s3546_s27 + $0x10] sm:$0xff] }
  0x1a   : > { %v363_v8 = vpack.c.bf16 %v332_v6, %v331_v5  ;;  %v334_v9 = vld [vmem:[%s3546_s27 + $0x18] sm:$0xff]  ;;  %v335_v10 = vld [vmem:[%s3546_s27 + $0x20] sm:$0xff]  ;;  %v336_v11 = vld [vmem:[%s3546_s27 + $0x28] sm:$0xff] }
  0x1b   : > { %v364_v12 = vpack.c.bf16 %v334_v9, %v333_v7  ;;  %v365_v13 = vpack.c.bf16 %v336_v11, %v335_v10  ;;  %v337_v14 = vld [vmem:[%s3546_s27 + $0x30] sm:$0xff]  ;;  %v338_v15 = vld [vmem:[%s3546_s27 + $0x38] sm:$0xff]  ;;  %v339_v16 = vld [vmem:[%s3546_s27 + $0x40] sm:$0xff] }
  0x1c   : > { %3167 = vmatprep.mubr.msk.bf16.mxu0 %vm386_vm2, %v363_v8  ;;  %v340_v17 = vld [vmem:[%s3546_s27 + $0x48] sm:$0xff]  ;;  %v366_v18 = vpack.c.bf16 %v338_v15, %v337_v14  ;;  %v341_v20 = vld [vmem:[%s3546_s27 + $0x50] sm:$0xff]  ;;  %v342_v21 = vld [vmem:[%s3546_s27 + $0x58] sm:$0xff] }
  0x1d   : > { %3168 = vmatmul.mubr.msk.bf16.vlgmr.msra.gmra.mrb[0].mxu0 %vm386_vm2, %v364_v12  ;;  %v367_v19 = vpack.c.bf16 %v340_v17, %v339_v16  ;;  %v343_v22 = vld [vmem:[%s3546_s27 + $0x60] sm:$0xff]  ;;  %v344_v23 = vld [vmem:[%s3546_s27 + $0x68] sm:$0xff]  ;;  %v368_v24 = vpack.c.bf16 %v342_v21, %v341_v20  ;;  %v345_v26 = vld [vmem:[%s3546_s27 + $0x70] sm:$0xff] }
  0x1e   : > { %3171 = vmatprep.mubr.msk.bf16.mxu0 %vm386_vm2, %v365_v13  ;;  %v369_v25 = vpack.c.bf16 %v344_v23, %v343_v22  ;;  %v346_v27 = vld [vmem:[%s3546_s27 + $0x78] sm:$0xff]  ;;  %v347_v28 = vld [vmem:[%s3546_s27 + $0x80] sm:$0xff]  ;;  %v348_v29 = vld [vmem:[%s3546_s27 + $0x88] sm:$0xff] }
  0x1f   : > { %v370_v30 = vpack.c.bf16 %v346_v27, %v345_v26  ;;  %v371_v31 = vpack.c.bf16 %v348_v29, %v347_v28  ;;  %v349_v32 = vld [vmem:[%s3546_s27 + $0x90] sm:$0xff]  ;;  %v350_v33 = vld [vmem:[%s3546_s27 + $0x98] sm:$0xff]  ;;  %v351_v34 = vld [vmem:[%s3546_s27 + $0xa0] sm:$0xff] }
  0x20   : > { %v352_v35 = vld [vmem:[%s3546_s27 + $0xa8] sm:$0xff]  ;;  %v372_v36 = vpack.c.bf16 %v350_v33, %v349_v32  ;;  %v353_v38 = vld [vmem:[%s3546_s27 + $0xb0] sm:$0xff]  ;;  %v354_v39 = vld [vmem:[%s3546_s27 + $0xb8] sm:$0xff] }
  0x21   : > { %v373_v37 = vpack.c.bf16 %v352_v35, %v351_v34  ;;  %v355_v40 = vld [vmem:[%s3546_s27 + $0xc0] sm:$0xff]  ;;  %v356_v41 = vld [vmem:[%s3546_s27 + $0xc8] sm:$0xff]  ;;  %v374_v42 = vpack.c.bf16 %v354_v39, %v353_v38  ;;  %v357_v44 = vld [vmem:[%s3546_s27 + $0xd0] sm:$0xff] }
  0x22   : > { %v375_v43 = vpack.c.bf16 %v356_v41, %v355_v40  ;;  %v358_v45 = vld [vmem:[%s3546_s27 + $0xd8] sm:$0xff]  ;;  %v359_v46 = vld [vmem:[%s3546_s27 + $0xe0] sm:$0xff]  ;;  %v360_v47 = vld [vmem:[%s3546_s27 + $0xe8] sm:$0xff] }
  0x23   : > { %v376_v48 = vpack.c.bf16 %v358_v45, %v357_v44  ;;  %v377_v49 = vpack.c.bf16 %v360_v47, %v359_v46  ;;  %v361_v50 = vld [vmem:[%s3546_s27 + $0xf0] sm:$0xff]  ;;  %v362_v51 = vld [vmem:[%s3546_s27 + $0xf8] sm:$0xff]  ;;  %v1245_v56 = vld [vmem:[#allocation2 + $0x46] sm:$0xf]  ;;  %s3372_s27 = sshll.u32 %s3439_s26, 4  ;;  %s3373_s27 = int_to_ptr.vmem [resolvable:$false] %s3372_s27 }
  0x24   : > { %v378_v52 = vpack.c.bf16 %v362_v51, %v361_v50  ;;  %v706_v54 = vld [vmem:[#allocation2 + $0x51] sm:$0xf]  ;;  %v734_v55 = vld [vmem:[#allocation2 + $0x79] sm:$0xf]  ;;  %v1247_v57 = vrot.slane %v1245_v56, 4 }
  0x25   : > { %3172 = vmatmul.mubr.msk.bf16.gmra.mrb[4].mxu0 %vm386_vm2, %v366_v18  ;;  %708 = vrot.lane.b32.xlu0 %v706_v54, %s3434_s28  ;;  %v910_v58 = vld [vmem:[#allocation2 + $0x79] sm:$0xf]  ;;  %v1271_v59 = vld [vmem:[#allocation2 + $0x1f] sm:$0xf]  ;;  %v936_v61 = vld [vmem:[#allocation2 + $0x52] sm:$0xf] }
  0x26   : > { %3175 = vmatprep.mubr.msk.bf16.mxu0 %vm386_vm2, %v367_v19  ;;  %1248 = vrot.lane.b32.xlu1 %v1247_v57, %s3435_s29  ;;  %v1273_v60 = vrot.slane %v1271_v59, 4  ;;  %v1443_v62 = vld [vmem:[#allocation2 + $0x1f] sm:$0xf]  ;;  %v1287_v2 = vld [vmem:[#allocation2 + $0x47] sm:$0xf] }
  0x27   : > { %v1445_v63 = vrot.slane %v1443_v62, 4  ;;  %v1485_v0 = vld [vmem:[#allocation2 + $0x20] sm:$0xf]  ;;  %v1289_v3 = vrot.slane %v1287_v2, 4  ;;  %v692_v8 = vld [vmem:[#allocation2 + $0x78] sm:$0xf] }
  0x28   : > { %v1487_v1 = vrot.slane %v1485_v0, 4  ;;  %693 = vst.msk [vmem:[#allocation3] sm:$0xf] %vm609_vm4, %v692_v8  ;;  %v896_v17 = vld [vmem:[#allocation2 + $0x51] sm:$0xf] }
  0x29   : > { %736 = vrot.lane.b32.xlu0 %v734_v55, %s3435_s29  ;;  %1291 = vst.msk [vmem:[#allocation3 + $0x88] sm:$0xf0] %vm643_vm5, %v1289_v3  ;;  %v3650_v26 = vld [vmem:[%s4408_s2] ss:$0 sm:$0xff] }
  0x2a   : > { %1274 = vrot.lane.b32.xlu1 %v1273_v60, %s3436_s14  ;;  %1489 = vst.msk [vmem:[#allocation3 + $0xb8] sm:$0xf0] %vm643_vm5, %v1487_v1 }
  0x2b   : > { %897 = vst.msk [vmem:[#allocation3 + $0x30] sm:$0xf] %vm609_vm4, %v896_v17 }
  0x2d   : > { %3176 = vmatmul.mubr.msk.bf16.gmra.mrb[8].mxu0 %vm386_vm2, %v368_v24  ;;  %912 = vrot.lane.b32.xlu0 %v910_v58, %s3434_s28 }
  0x2e   : > { %3179 = vmatprep.mubr.msk.bf16.mxu0 %vm386_vm2, %v369_v25  ;;  %1446 = vrot.lane.b32.xlu1 %v1445_v63, %s3435_s29 }
  0x31   : > { %938 = vrot.lane.b32.xlu0 %v936_v61, %s3435_s29 }
  0x35   : > { %3180 = vmatmul.mubr.msk.bf16.gmra.mrb[12].mxu0 %vm386_vm2, %v370_v30 }
  0x36   : > { %3183 = vmatprep.mubr.msk.bf16.mxu0 %vm386_vm2, %v371_v31 }
  0x3d   : > { %3184 = vmatmul.mubr.msk.bf16.gmra.mrb[16].mxu0 %vm386_vm2, %v372_v36 }
  0x3e   : > { %3187 = vmatprep.mubr.msk.bf16.mxu0 %vm386_vm2, %v373_v37 }
  0x45   : > { %3188 = vmatmul.mubr.msk.bf16.gmra.mrb[20].mxu0 %vm386_vm2, %v374_v42 }
  0x46   : > { %3191 = vmatprep.mubr.msk.bf16.mxu0 %vm386_vm2, %v375_v43 }
  0x4d   : > { %3192 = vmatmul.mubr.msk.bf16.gmra.mrb[24].mxu0 %vm386_vm2, %v376_v48 }
  0x4e   : > { %3195 = vmatprep.mubr.msk.bf16.mxu0 %vm386_vm2, %v377_v49 }
  0x55   : > { %3196 = vmatmul.mubr.msk.bf16.gmra.mrb[28].mxu0 %vm386_vm2, %v378_v52 }
  0x97   : > { %v709_v11 = vpop.permute.xlu0 %708 }
  0x98   : > { %712 = vst.msk [vmem:[#allocation3] sm:$0xf] %vm711_vm6, %v709_v11 }
  0x9b   : > { %v737_v13 = vpop.permute.xlu0 %736 }
  0x9c   : > { %740 = vst.msk [vmem:[#allocation3] sm:$0xf] %vm739_vm7, %v737_v13 }
  0x9f   : > { %v913_v20 = vpop.permute.xlu0 %912 }
  0xa0   : > { %915 = vst.msk [vmem:[#allocation3 + $0x30] sm:$0xf] %vm711_vm6, %v913_v20 }
  0xa3   : > { %v939_v22 = vpop.permute.xlu0 %938 }
  0xa4   : > { %941 = vst.msk [vmem:[#allocation3 + $0x30] sm:$0xf] %vm739_vm7, %v939_v22 }
  0xf0   : > { %v3169_v4 = vpop.f32.mrb[0].mxu0 }
  0xf1   : > { %v476_v5 = vpop.f32.mrb[1].mxu0 }
  0xf2   : > { %v626_v6 = vmax.f32 %v476_v5, %v3169_v4  ;;  %v3170_v7 = vpop.f32.mrb[2].mxu0 }
  0xf3   : > { %v479_v9 = vpop.f32.mrb[3].mxu0 }
  0xf4   : > { %v627_v10 = vmax.f32 %v479_v9, %v3170_v7 }
  0xf8   : > { %v3173_v12 = vpop.f32.mrb[4].mxu0 }
  0xf9   : > { %v492_v14 = vpop.f32.mrb[5].mxu0 }
  0xfa   : > { %v647_v15 = vmax.f32 %v492_v14, %v3173_v12  ;;  %v3174_v16 = vpop.f32.mrb[6].mxu0 }
  0xfb   : > { %v495_v18 = vpop.f32.mrb[7].mxu0 }
  0xfc   : > { %v648_v19 = vmax.f32 %v495_v18, %v3174_v16 }
 0x100   : > { %v3177_v21 = vpop.f32.mrb[8].mxu0 }
 0x101   : > { %v508_v23 = vpop.f32.mrb[9].mxu0 }
 0x102   : > { %v628_v24 = vmax.f32 %v626_v6, %v508_v23  ;;  %v3178_v25 = vpop.f32.mrb[10].mxu0 }
 0x103   : > { %v511_v27 = vpop.f32.mrb[11].mxu0 }
 0x104   : > { %v630_v28 = vmax.f32 %v628_v24, %v3177_v21  ;;  %v629_v29 = vmax.f32 %v627_v10, %v511_v27 }
 0x106   : > { %v638_v30 = vadd.f32 %v3650_v26, %v630_v28  ;;  %v631_v31 = vmax.f32 %v629_v29, %v3178_v25 }
 0x108   : > { %v640_v32 = vmax.f32 %v638_v30, 0.0  ;;  %v639_v33 = vadd.f32 %v3650_v26, %v631_v31  ;;  %v3181_v34 = vpop.f32.mrb[12].mxu0 }
 0x109   : > { %v524_v35 = vpop.f32.mrb[13].mxu0 }
 0x10a   : > { %642 = vst.msk [vmem:[#allocation2 + $0x7] sm:$0xf] %vm609_vm4, %v640_v32  ;;  %v641_v36 = vmax.f32 %v639_v33, 0.0  ;;  %v649_v37 = vmax.f32 %v647_v15, %v524_v35  ;;  %v3182_v38 = vpop.f32.mrb[14].mxu0 }
 0x10b   : > { %644 = vst.msk [vmem:[#allocation2 + $0x9] sm:$0xf0] %vm643_vm5, %v640_v32  ;;  %v527_v39 = vpop.f32.mrb[15].mxu0 }
 0x10c   : > { %645 = vst.msk [vmem:[#allocation2 + $0x13] sm:$0xf] %vm609_vm4, %v641_v36  ;;  %v651_v40 = vmax.f32 %v649_v37, %v3181_v34  ;;  %v650_v41 = vmax.f32 %v648_v19, %v527_v39 }
 0x10d   : > { %646 = vst.msk [vmem:[#allocation2 + $0x15] sm:$0xf0] %vm643_vm5, %v641_v36 }
 0x10e   : > { %v653_v42 = vadd.f32 %v3650_v26, %v651_v40  ;;  %v652_v43 = vmax.f32 %v650_v41, %v3182_v38 }
 0x110   : > { %v655_v44 = vmax.f32 %v653_v42, 0.0  ;;  %v654_v45 = vadd.f32 %v3650_v26, %v652_v43  ;;  %v3185_v46 = vpop.f32.mrb[16].mxu0 }
 0x111   : > { %v1002_v47 = vld [vmem:[#allocation2 + $0x8] sm:$0xf]  ;;  %v540_v54 = vpop.f32.mrb[17].mxu0 }
 0x112   : > { %v1008_v48 = vld [vmem:[#allocation2 + $0xe] sm:$0xf]  ;;  %658 = vst.msk [vmem:[#allocation2 + $0x2f] sm:$0xf] %vm609_vm4, %v655_v44  ;;  %v656_v49 = vmax.f32 %v654_v45, 0.0  ;;  %1004 = vrot.lane.b32.xlu0 %v1002_v47, %s3434_s28  ;;  %v662_v56 = vmax.f32 %v540_v54, %v3185_v46  ;;  %v3186_v58 = vpop.f32.mrb[18].mxu0 }
 0x113   : > { %659 = vst.msk [vmem:[#allocation2 + $0x31] sm:$0xf0] %vm643_vm5, %v655_v44  ;;  %v1010_v50 = vrot.slane %v1008_v48, 4  ;;  %v1478_v51 = vld [vmem:[#allocation2 + $0x14] sm:$0xf]  ;;  %v543_v60 = vpop.f32.mrb[19].mxu0 }
 0x114   : > { %v968_v52 = vld [vmem:[#allocation2 + $0xd] sm:$0xf]  ;;  %v1480_v55 = vrot.slane %v1478_v51, 4  ;;  %660 = vst.msk [vmem:[#allocation2 + $0x3b] sm:$0xf] %vm609_vm4, %v656_v49  ;;  %v663_v62 = vmax.f32 %v543_v60, %v3186_v58 }
 0x115   : > { %661 = vst.msk [vmem:[#allocation2 + $0x3d] sm:$0xf0] %vm643_vm5, %v656_v49  ;;  %1011 = vrot.lane.b32.xlu1 %v1010_v50, %s3434_s28  ;;  %v962_v57 = vld [vmem:[#allocation2 + $0x7] sm:$0xf]  ;;  %v970_v59 = vrot.slane %v968_v52, 4 }
 0x116   : > { %1482 = vst.msk [vmem:[#allocation3 + $0xa0] sm:$0xf0] %vm643_vm5, %v1480_v55  ;;  %964 = vrot.lane.b32.xlu0 %v962_v57, %s3436_s14  ;;  %v1114_v61 = vld [vmem:[#allocation2 + $0xd] sm:$0xf]  ;;  %v1108_v0 = vld [vmem:[#allocation2 + $0x7] sm:$0xf] }
 0x117   : > { %v1116_v2 = vrot.slane %v1114_v61, 4  ;;  %v1338_v6 = vld [vmem:[#allocation2 + $0xe] sm:$0xf]  ;;  %v1021_v12 = vld [vmem:[#allocation2 + $0x1a] sm:$0xf] }
 0x118   : > { %v3669_v63 = vpop.f32.mrb[20].mxu0  ;;  %v1252_v10 = vld [vmem:[#allocation2 + $0xd] sm:$0xf]  ;;  %v1340_v11 = vrot.slane %v1338_v6, 4  ;;  %v1023_v16 = vrot.slane %v1021_v12, 4 }
 0x119   : > { %971 = vrot.lane.b32.xlu1 %v970_v59, %s3436_s14  ;;  %v556_v1 = vpop.f32.mrb[21].mxu0  ;;  %v1424_v14 = vld [vmem:[#allocation2 + $0xd] sm:$0xf]  ;;  %v981_v17 = vld [vmem:[#allocation2 + $0x19] sm:$0xf] }
 0x11a   : > { %1110 = vrot.lane.b32.xlu0 %v1108_v0, %s3434_s28  ;;  %v677_v3 = vmax.f32 %v556_v1, %v3669_v63  ;;  %v3673_v4 = vpop.f32.mrb[22].mxu0  ;;  %v1332_v23 = vld [vmem:[#allocation2 + $0x8] sm:$0xf]  ;;  %v983_v24 = vrot.slane %v981_v17, 4  ;;  %v988_v25 = vld [vmem:[#allocation2 + $0x2f] sm:$0xf] }
 0x11b   : > { %v1280_v5 = vld [vmem:[#allocation2 + $0x3b] sm:$0xf]  ;;  %v3675_v7 = vpop.f32.mrb[23].mxu0  ;;  %989 = vst.msk [vmem:[#allocation3 + $0x38] sm:$0xf] %vm609_vm4, %v988_v25 }
 0x11c   : > { %v1282_v8 = vrot.slane %v1280_v5, 4  ;;  %v678_v9 = vmax.f32 %v3675_v7, %v3673_v4  ;;  %v1127_v27 = vld [vmem:[#allocation2 + $0x19] sm:$0xf]  ;;  %v990_v30 = vld [vmem:[#allocation2 + $0x35] sm:$0xf] }
 0x11d   : > { %1117 = vrot.lane.b32.xlu1 %v1116_v2, %s3434_s28  ;;  %v1094_v31 = vld [vmem:[#allocation2 + $0x2e] sm:$0xf]  ;;  %v1015_v32 = vld [vmem:[#allocation2 + $0x14] sm:$0xf]  ;;  %v992_v33 = vrot.slane %v990_v30, 4  ;;  %v1129_v45 = vrot.slane %v1127_v27, 4 }
 0x11e   : > { %1284 = vst.msk [vmem:[#allocation3 + $0x70] sm:$0xf0] %vm643_vm5, %v1282_v8  ;;  %1254 = vrot.lane.b32.xlu0 %v1252_v10, %s3436_s14  ;;  %v1096_v34 = vld [vmem:[#allocation2 + $0x34] sm:$0xf]  ;;  %v997_v35 = vld [vmem:[#allocation2 + $0x41] sm:$0xf] }
 0x11f   : > { %1095 = vst.msk [vmem:[#allocation3 + $0x60] sm:$0xf] %vm609_vm4, %v1094_v31  ;;  %v1098_v39 = vrot.slane %v1096_v34, 4  ;;  %v999_v40 = vrot.slane %v997_v35, 4  ;;  %v995_v41 = vld [vmem:[#allocation2 + $0x3b] sm:$0xf] }
 0x120   : > { %v3193_v13 = vpop.f32.mrb[24].mxu0  ;;  %994 = vst.msk [vmem:[#allocation3 + $0x38] sm:$0xf0] %vm643_vm5, %v992_v33  ;;  %v1103_v43 = vld [vmem:[#allocation2 + $0x40] sm:$0xf] }
 0x121   : > { %1341 = vrot.lane.b32.xlu1 %v1340_v11, %s3435_s29  ;;  %v572_v15 = vpop.f32.mrb[25].mxu0  ;;  %996 = vst.msk [vmem:[#allocation3 + $0x50] sm:$0xf] %vm609_vm4, %v995_v41  ;;  %v1101_v44 = vld [vmem:[#allocation2 + $0x3a] sm:$0xf]  ;;  %v1105_v49 = vrot.slane %v1103_v43, 4 }
 0x122   : > { %1426 = vrot.lane.b32.xlu0 %v1424_v14, %s3435_s29  ;;  %v664_v18 = vmax.f32 %v662_v56, %v572_v15  ;;  %v3194_v19 = vpop.f32.mrb[26].mxu0  ;;  %1100 = vst.msk [vmem:[#allocation3 + $0x60] sm:$0xf0] %vm643_vm5, %v1098_v39  ;;  %1001 = vst.msk [vmem:[#allocation3 + $0x50] sm:$0xf0] %vm643_vm5, %v999_v40 }
 0x123   : > { %v575_v20 = vpop.f32.mrb[27].mxu0  ;;  %1102 = vst.msk [vmem:[#allocation3 + $0x78] sm:$0xf] %vm609_vm4, %v1101_v44  ;;  %v975_v50 = vld [vmem:[#allocation2 + $0x13] sm:$0xf] }
 0x124   : > { %v666_v21 = vmax.f32 %v664_v18, %v3193_v13  ;;  %v665_v22 = vmax.f32 %v663_v62, %v575_v20  ;;  %v1258_v51 = vld [vmem:[#allocation2 + $0x13] sm:$0xf]  ;;  %1107 = vst.msk [vmem:[#allocation3 + $0x78] sm:$0xf0] %vm643_vm5, %v1105_v49  ;;  %v790_v57 = vld [vmem:[#allocation2 + $0x7] sm:$0xf] }
 0x125   : > { %1024 = vrot.lane.b32.xlu1 %v1023_v16, %s3434_s28  ;;  %v797_v54 = vld [vmem:[#allocation2 + $0x13] sm:$0xf]  ;;  %v1294_v58 = vld [vmem:[#allocation2 + $0xd] sm:$0xf]  ;;  %v799_v59 = vld [vmem:[#allocation2 + $0x19] sm:$0xf] }
 0x126   : > { %1334 = vrot.lane.b32.xlu0 %v1332_v23, %s3435_s29  ;;  %v668_v28 = vadd.f32 %v3650_v26, %v666_v21  ;;  %v667_v29 = vmax.f32 %v665_v22, %v3194_v19  ;;  %798 = vst.msk [vmem:[#allocation3 + $0x20] sm:$0xf] %vm609_vm4, %v797_v54  ;;  %v1430_v60 = vld [vmem:[#allocation2 + $0x13] sm:$0xf]  ;;  %791 = vst.msk [vmem:[#allocation3 + $0x8] sm:$0xf] %vm609_vm4, %v790_v57 }
 0x127   : > { %v1296_v61 = vrot.slane %v1294_v58, 4  ;;  %v801_v62 = vrot.slane %v799_v59, 4  ;;  %v1292_v63 = vld [vmem:[#allocation2 + $0x7] sm:$0xf]  ;;  %v792_v0 = vld [vmem:[#allocation2 + $0xd] sm:$0xf] }
 0x128   : > { %v670_v36 = vmax.f32 %v668_v28, 0.0  ;;  %v669_v37 = vadd.f32 %v3650_v26, %v667_v29  ;;  %v3197_v38 = vpop.f32.mrb[28].mxu0  ;;  %v1260_v1 = vrot.slane %v1258_v51, 4  ;;  %1293 = vst.msk [vmem:[#allocation3 + $0x90] sm:$0xf] %vm609_vm4, %v1292_v63  ;;  %v794_v4 = vrot.slane %v792_v0, 4 }
 0x129   : > { %984 = vrot.lane.b32.xlu1 %v983_v24, %s3436_s14  ;;  %v588_v42 = vpop.f32.mrb[29].mxu0  ;;  %v1301_v5 = vld [vmem:[#allocation2 + $0x19] sm:$0xf]  ;;  %v1299_v6 = vld [vmem:[#allocation2 + $0x13] sm:$0xf] }
 0x12a   : > { %1017 = vrot.lane.b32.xlu0 %v1015_v32, %s3434_s28  ;;  %673 = vst.msk [vmem:[#allocation2 + $0x57] sm:$0xf] %vm609_vm4, %v670_v36  ;;  %v671_v46 = vmax.f32 %v669_v37, 0.0  ;;  %v679_v47 = vmax.f32 %v677_v3, %v588_v42  ;;  %v3198_v48 = vpop.f32.mrb[30].mxu0  ;;  %v1303_v7 = vrot.slane %v1301_v5, 4 }
 0x12b   : > { %674 = vst.msk [vmem:[#allocation2 + $0x59] sm:$0xf0] %vm643_vm5, %v670_v36  ;;  %v591_v52 = vpop.f32.mrb[31].mxu0  ;;  %1298 = vst.msk [vmem:[#allocation3 + $0x90] sm:$0xf0] %vm643_vm5, %v1296_v61 }
 0x12c   : > { %675 = vst.msk [vmem:[#allocation2 + $0x63] sm:$0xf] %vm609_vm4, %v671_v46  ;;  %v681_v55 = vmax.f32 %v679_v47, %v3197_v38  ;;  %v680_v56 = vmax.f32 %v678_v9, %v591_v52  ;;  %1300 = vst.msk [vmem:[#allocation3 + $0xa8] sm:$0xf] %vm609_vm4, %v1299_v6  ;;  %v1278_v8 = vld [vmem:[#allocation2 + $0x35] sm:$0xf] }
 0x12d   : > { %1130 = vrot.lane.b32.xlu1 %v1129_v45, %s3434_s28  ;;  %676 = vst.msk [vmem:[#allocation2 + $0x65] sm:$0xf0] %vm643_vm5, %v671_v46  ;;  %803 = vst.msk [vmem:[#allocation3 + $0x20] sm:$0xf0] %vm643_vm5, %v801_v62  ;;  %v1285_v9 = vld [vmem:[#allocation2 + $0x41] sm:$0xf] }
 0x12e   : > { %977 = vrot.lane.b32.xlu0 %v975_v50, %s3436_s14  ;;  %v683_v2 = vadd.f32 %v3650_v26, %v681_v55  ;;  %v682_v3 = vmax.f32 %v680_v56, %v3198_v48  ;;  %796 = vst.msk [vmem:[#allocation3 + $0x8] sm:$0xf0] %vm643_vm5, %v794_v4  ;;  %v1476_v12 = vld [vmem:[#allocation2 + $0xe] sm:$0xf]  ;;  %v1483_v13 = vld [vmem:[#allocation2 + $0x1a] sm:$0xf] }
 0x12f   : > { %1279 = vst.msk [vmem:[#allocation3 + $0x70] sm:$0xf] %vm609_vm4, %v1278_v8  ;;  %1286 = vst.msk [vmem:[#allocation3 + $0x88] sm:$0xf] %vm609_vm4, %v1285_v9  ;;  %v1121_v14 = vld [vmem:[#allocation2 + $0x13] sm:$0xf] }
 0x130   : > { %v685_v10 = vmax.f32 %v683_v2, 0.0  ;;  %v684_v11 = vadd.f32 %v3650_v26, %v682_v3  ;;  %1305 = vst.msk [vmem:[#allocation3 + $0xa8] sm:$0xf0] %vm643_vm5, %v1303_v7  ;;  %v1432_v26 = vrot.slane %v1430_v60, 4  ;;  %v1351_v19 = vld [vmem:[#allocation2 + $0x1a] sm:$0xf] }
 0x131   : > { %1261 = vrot.lane.b32.xlu1 %v1260_v1, %s3436_s14  ;;  %v1080_v15 = vld [vmem:[#allocation2 + $0x58] sm:$0xf]  ;;  %1477 = vst.msk [vmem:[#allocation3 + $0xa0] sm:$0xf] %vm609_vm4, %v1476_v12  ;;  %1484 = vst.msk [vmem:[#allocation3 + $0xb8] sm:$0xf] %vm609_vm4, %v1483_v13 }
 0x132   : > { %v1082_v16 = vld [vmem:[#allocation2 + $0x5e] sm:$0xf]  ;;  %1123 = vrot.lane.b32.xlu0 %v1121_v14, %s3434_s28  ;;  %1081 = vst.msk [vmem:[#allocation3 + $0x40] sm:$0xf] %vm609_vm4, %v1080_v15  ;;  %688 = vst.msk [vmem:[#allocation2 + $0x7f] sm:$0xf] %vm609_vm4, %v685_v10 }
 0x133   : > { %v1084_v17 = vrot.slane %v1082_v16, 4  ;;  %689 = vst.msk [vmem:[#allocation2 + $0x81] sm:$0xf0] %vm643_vm5, %v685_v10  ;;  %v686_v18 = vmax.f32 %v684_v11, 0.0  ;;  %v1087_v20 = vld [vmem:[#allocation2 + $0x64] sm:$0xf] }
 0x134   : > { %v1089_v21 = vld [vmem:[#allocation2 + $0x6a] sm:$0xf]  ;;  %1088 = vst.msk [vmem:[#allocation3 + $0x58] sm:$0xf] %vm609_vm4, %v1087_v20  ;;  %v1265_v23 = vld [vmem:[#allocation2 + $0x19] sm:$0xf] }
 0x135   : > { %1433 = vrot.lane.b32.xlu1 %v1432_v26, %s3435_s29  ;;  %1086 = vst.msk [vmem:[#allocation3 + $0x40] sm:$0xf0] %vm643_vm5, %v1084_v17  ;;  %v1091_v22 = vrot.slane %v1089_v21, 4  ;;  %691 = vst.msk [vmem:[#allocation2 + $0x8d] sm:$0xf0] %vm643_vm5, %v686_v18  ;;  %v1353_v24 = vrot.slane %v1351_v19, 4 }
 0x136   : > { %690 = vst.msk [vmem:[#allocation2 + $0x8b] sm:$0xf] %vm609_vm4, %v686_v18  ;;  %1267 = vrot.lane.b32.xlu0 %v1265_v23, %s3436_s14  ;;  %v1437_v25 = vld [vmem:[#allocation2 + $0x19] sm:$0xf]  ;;  %v769_v28 = vld [vmem:[#allocation2 + $0x34] sm:$0xf] }
 0x137   : > { %1093 = vst.msk [vmem:[#allocation3 + $0x58] sm:$0xf0] %vm643_vm5, %v1091_v22  ;;  %v817_v27 = vld [vmem:[#allocation2 + $0x3b] sm:$0xf]  ;;  %v1345_v31 = vld [vmem:[#allocation2 + $0x14] sm:$0xf] }
 0x138   : > { %v771_v32 = vrot.slane %v769_v28, 4  ;;  %v1140_v33 = vld [vmem:[#allocation2 + $0x35] sm:$0xf]  ;;  %v804_v34 = vld [vmem:[#allocation2 + $0x2f] sm:$0xf] }
 0x139   : > { %1354 = vrot.lane.b32.xlu1 %v1353_v24, %s3435_s29  ;;  %v1142_v35 = vrot.slane %v1140_v33, 4  ;;  %v1312_v36 = vld [vmem:[#allocation2 + $0x35] sm:$0xf]  ;;  %v762_v37 = vld [vmem:[#allocation2 + $0x2e] sm:$0xf] }
 0x13a   : > { %1439 = vrot.lane.b32.xlu0 %v1437_v25, %s3435_s29  ;;  %v1314_v38 = vrot.slane %v1312_v36, 4  ;;  %v823_v39 = vld [vmem:[#allocation2 + $0x41] sm:$0xf]  ;;  %v1226_v40 = vld [vmem:[#allocation2 + $0x34] sm:$0xf] }
 0x13b   : > { %v783_v41 = vld [vmem:[#allocation2 + $0x40] sm:$0xf]  ;;  %v825_v43 = vrot.slane %v823_v39, 4  ;;  %v699_v45 = vld [vmem:[#allocation2 + $0x84] sm:$0xf] }
 0x13c   : > { %v891_v29 = vld [vmem:[#allocation2 + $0x91] sm:$0xf]  ;;  %v694_v42 = vld [vmem:[#allocation2 + $0x7e] sm:$0xf]  ;;  %v1386_v46 = vld [vmem:[#allocation2 + $0x85] sm:$0xf] }
 0x13d   : > { %819 = vrot.lane.b32.xlu1 %v817_v27, %s3434_s28  ;;  %v893_v30 = vrot.slane %v891_v29, 4  ;;  %v696_v44 = vrot.slane %v694_v42, 4  ;;  %v1134_v47 = vld [vmem:[#allocation2 + $0x2f] sm:$0xf]  ;;  %700 = vst.msk [vmem:[#allocation3 + $0x18] sm:$0xf] %vm609_vm4, %v699_v45 }
 0x13e   : > { %1347 = vrot.lane.b32.xlu0 %v1345_v31, %s3435_s29  ;;  %v1388_v48 = vrot.slane %v1386_v46, 4  ;;  %v701_v49 = vld [vmem:[#allocation2 + $0x8a] sm:$0xf]  ;;  %v1384_v50 = vld [vmem:[#allocation2 + $0x7f] sm:$0xf]  ;;  %v785_v59 = vrot.slane %v783_v41, 4 }
 0x13f   : > { %895 = vst.msk [vmem:[#allocation3 + $0x28] sm:$0xf0] %vm643_vm5, %v893_v30  ;;  %698 = vst.msk [vmem:[#allocation3] sm:$0xf0] %vm643_vm5, %v696_v44  ;;  %v703_v51 = vrot.slane %v701_v49, 4 }
 0x140   : > { %1385 = vst.msk [vmem:[#allocation3 + $0x98] sm:$0xf] %vm609_vm4, %v1384_v50  ;;  %v1393_v52 = vld [vmem:[#allocation2 + $0x91] sm:$0xf]  ;;  %v1391_v54 = vld [vmem:[#allocation2 + $0x8b] sm:$0xf] }
 0x141   : > { %772 = vrot.lane.b32.xlu1 %v771_v32, %s3436_s14  ;;  %v1232_v55 = vld [vmem:[#allocation2 + $0x3a] sm:$0xf]  ;;  %1390 = vst.msk [vmem:[#allocation3 + $0x98] sm:$0xf0] %vm643_vm5, %v1388_v48  ;;  %v1395_v56 = vrot.slane %v1393_v52, 4 }
 0x142   : > { %806 = vrot.lane.b32.xlu0 %v804_v34, %s3434_s28  ;;  %1392 = vst.msk [vmem:[#allocation3 + $0xb0] sm:$0xf] %vm609_vm4, %v1391_v54  ;;  %v903_v57 = vld [vmem:[#allocation2 + $0x5d] sm:$0xf]  ;;  %v898_v58 = vld [vmem:[#allocation2 + $0x57] sm:$0xf] }
 0x143   : > { %705 = vst.msk [vmem:[#allocation3 + $0x18] sm:$0xf0] %vm643_vm5, %v703_v51  ;;  %v900_v60 = vrot.slane %v898_v58, 4  ;;  %v1186_v61 = vld [vmem:[#allocation2 + $0x57] sm:$0xf]  ;;  %v1234_v10 = vrot.slane %v1232_v55, 4 }
 0x144   : > { %904 = vst.msk [vmem:[#allocation3 + $0x48] sm:$0xf] %vm609_vm4, %v903_v57  ;;  %v1188_v62 = vld [vmem:[#allocation2 + $0x5d] sm:$0xf]  ;;  %v1306_v63 = vld [vmem:[#allocation2 + $0x2f] sm:$0xf] }
 0x145   : > { %1143 = vrot.lane.b32.xlu1 %v1142_v35, %s3435_s29  ;;  %v810_v0 = vld [vmem:[#allocation2 + $0x35] sm:$0xf]  ;;  %1397 = vst.msk [vmem:[#allocation3 + $0xb0] sm:$0xf0] %vm643_vm5, %v1395_v56  ;;  %v1190_v1 = vrot.slane %v1188_v62, 4  ;;  %v3278_v58 = vld [vmem:[%s4409_s3 + $0x40] sm:$0xff]  }
 0x146   : > { %764 = vrot.lane.b32.xlu0 %v762_v37, %s3436_s14  ;;  %1187 = vst.msk [vmem:[#allocation3 + $0x68] sm:$0xf] %vm609_vm4, %v1186_v61  ;;  %v905_v2 = vld [vmem:[#allocation2 + $0x63] sm:$0xf]  ;;  %v1195_v5 = vld [vmem:[#allocation2 + $0x69] sm:$0xf]  ;;  %v3782_v37 = vpop.permute.xlu1 %1248  ;;  %3022 = vmatprep.subr.bf16.mxu1 %v3278_v58 }
 0x147   : > { %v1193_v3 = vld [vmem:[#allocation2 + $0x63] sm:$0xf]  ;;  %902 = vst.msk [vmem:[#allocation3 + $0x30] sm:$0xf0] %vm643_vm5, %v900_v60  ;;  %v907_v4 = vrot.slane %v905_v2, 4  ;;  %v1197_v7 = vrot.slane %v1195_v5, 4 }
 0x148   : > { %1194 = vst.msk [vmem:[#allocation3 + $0x80] sm:$0xf] %vm609_vm4, %v1193_v3  ;;  %v882_v6 = vld [vmem:[#allocation2 + $0x7f] sm:$0xf]  ;;  %v884_v8 = vld [vmem:[#allocation2 + $0x85] sm:$0xf] }
 0x149   : > { %1315 = vrot.lane.b32.xlu1 %v1314_v38, %s3434_s28  ;;  %1192 = vst.msk [vmem:[#allocation3 + $0x68] sm:$0xf0] %vm643_vm5, %v1190_v1  ;;  %v889_v9 = vld [vmem:[#allocation2 + $0x8b] sm:$0xf]  ;;  %909 = vst.msk [vmem:[#allocation3 + $0x48] sm:$0xf0] %vm643_vm5, %v907_v4 }
 0x14a   : > { %1228 = vrot.lane.b32.xlu0 %v1226_v40, %s3435_s29  ;;  %883 = vst.msk [vmem:[#allocation3 + $0x10] sm:$0xf] %vm609_vm4, %v882_v6  ;;  %v886_v11 = vrot.slane %v884_v8, 4  ;;  %890 = vst.msk [vmem:[#allocation3 + $0x28] sm:$0xf] %vm609_vm4, %v889_v9  ;;  %v812_v13 = vrot.slane %v810_v0, 4 }
 0x14b   : > { %v1153_v12 = vld [vmem:[#allocation2 + $0x41] sm:$0xf]  ;;  %1199 = vst.msk [vmem:[#allocation3 + $0x80] sm:$0xf0] %vm643_vm5, %v1197_v7  ;;  %v777_v16 = vld [vmem:[#allocation2 + $0x3a] sm:$0xf] }
 0x14c   : > { %888 = vst.msk [vmem:[#allocation3 + $0x10] sm:$0xf0] %vm643_vm5, %v886_v11  ;;  %v1155_v14 = vrot.slane %v1153_v12, 4  ;;  %v1325_v15 = vld [vmem:[#allocation2 + $0x41] sm:$0xf]  ;;  %v3280_v62 = vld [vmem:[%s4409_s3 + $0x48] sm:$0xff]  }
 0x14d   : > { %826 = vrot.lane.b32.xlu1 %v825_v43, %s3434_s28  ;;  %v1327_v26 = vrot.slane %v1325_v15, 4  ;;  %v713_v17 = vld [vmem:[#allocation2 + $0x57] sm:$0xf]  ;;  %v1239_v18 = vld [vmem:[#allocation2 + $0x40] sm:$0xf]  ;;  %v3787_v43 = vpop.permute.xlu1 %1274  ;;  %v3281_v2 = vld [vmem:[%s4409_s3 + $0x8] sm:$0xff]  }
 0x14e   : > { %1136 = vrot.lane.b32.xlu0 %v1134_v47, %s3435_s29  ;;  %v715_v19 = vrot.slane %v713_v17, 4  ;;  %v862_v20 = vld [vmem:[#allocation2 + $0x5d] sm:$0xf]  ;;  %v942_v27 = vld [vmem:[#allocation2 + $0x58] sm:$0xf]  ;;  %v3282_v8 = vld [vmem:[%s4409_s3 + $0x50] sm:$0xff]  }
 0x14f   : > { %v1147_v21 = vld [vmem:[#allocation2 + $0x3b] sm:$0xf]  ;;  %v864_v22 = vrot.slane %v862_v20, 4  ;;  %v944_v29 = vrot.slane %v942_v27, 4  ;;  %v856_v31 = vld [vmem:[#allocation2 + $0x57] sm:$0xf] }
 0x150   : > { %v1034_v23 = vld [vmem:[#allocation2 + $0x5d] sm:$0xf]  ;;  %v727_v33 = vld [vmem:[#allocation2 + $0x63] sm:$0xf]  ;;  %v1028_v34 = vld [vmem:[#allocation2 + $0x57] sm:$0xf] }
 0x151   : > { %786 = vrot.lane.b32.xlu1 %v785_v59, %s3436_s14  ;;  %v1319_v24 = vld [vmem:[#allocation2 + $0x3b] sm:$0xf]  ;;  %v1036_v25 = vrot.slane %v1034_v23, 4  ;;  %v729_v35 = vrot.slane %v727_v33, 4  ;;  %v875_v36 = vld [vmem:[#allocation2 + $0x69] sm:$0xf]  ;;  %v3792_v48 = vpop.permute.xlu1 %1446 }
 0x152   : > { %1308 = vrot.lane.b32.xlu0 %v1306_v63, %s3434_s28  ;;  %v721_v28 = vld [vmem:[#allocation2 + $0x5d] sm:$0xf]  ;;  %v877_v39 = vrot.slane %v875_v36, 4  ;;  %v1047_v40 = vld [vmem:[#allocation2 + $0x69] sm:$0xf]  ;;  %v3283_v11 = vld [vmem:[%s4409_s3 + $0x10] sm:$0xff]  }
 0x153   : > { %v1404_v30 = vld [vmem:[#allocation2 + $0x5e] sm:$0xf]  ;;  %v1398_v41 = vld [vmem:[#allocation2 + $0x58] sm:$0xf]  ;;  %v1049_v42 = vrot.slane %v1047_v40, 4  ;;  %v3290_v33 = vld [vmem:[%s4409_s3 + $0x70] sm:$0xff]  }
 0x154   : > { %v1406_v32 = vrot.slane %v1404_v30, 4  ;;  %v949_v38 = vld [vmem:[#allocation2 + $0x5e] sm:$0xf]  ;;  %v955_v44 = vld [vmem:[#allocation2 + $0x64] sm:$0xf]  ;;  %v3291_v40 = vld [vmem:[%s4409_s3 + $0x30] sm:$0xff]  }
 0x155   : > { %1235 = vrot.lane.b32.xlu1 %v1234_v10, %s3435_s29  ;;  %v869_v45 = vld [vmem:[#allocation2 + $0x63] sm:$0xf]  ;;  %v957_v46 = vrot.slane %v955_v44, 4  ;;  %v1417_v47 = vld [vmem:[#allocation2 + $0x6a] sm:$0xf]  ;;  %v3284_v12 = vld [vmem:[%s4409_s3 + $0x58] sm:$0xff]  }
 0x156   : > { %813 = vrot.lane.b32.xlu0 %v812_v13, %s3434_s28  ;;  %v1041_v49 = vld [vmem:[#allocation2 + $0x63] sm:$0xf]  ;;  %v1419_v50 = vrot.slane %v1417_v47, 4  ;;  %v1456_v57 = vld [vmem:[#allocation2 + $0x3b] sm:$0xf] }
 0x157   : > { %v836_v51 = vld [vmem:[#allocation2 + $0x84] sm:$0xf]  ;;  %v830_v60 = vld [vmem:[#allocation2 + $0x7e] sm:$0xf]  ;;  %v1458_v0 = vrot.slane %v1456_v57, 4 }
 0x158   : > { %v1411_v54 = vld [vmem:[#allocation2 + $0x64] sm:$0xf]  ;;  %v838_v56 = vrot.slane %v836_v51, 4  ;;  %v741_v1 = vld [vmem:[#allocation2 + $0x7f] sm:$0xf] }
 0x159   : > { %1156 = vrot.lane.b32.xlu1 %v1155_v14, %s3435_s29  ;;  %v3279_v61 = vld [vmem:[%s4409_s3] sm:$0xff]   ;;  %v743_v6 = vrot.slane %v741_v1, 4  ;;  %v849_v36 = vld [vmem:[#allocation2 + $0x90] sm:$0xf] }
 0x15a   : > { %779 = vrot.lane.b32.xlu0 %v777_v16, %s3436_s14  ;;  %3023 = vmatpush3.bf16.msra.mxu1 %v3279_v61  ;;  %v749_v4 = vld [vmem:[#allocation2 + $0x85] sm:$0xf]  ;;  %v916_v7 = vld [vmem:[#allocation2 + $0x7f] sm:$0xf]  ;;  %v851_v44 = vrot.slane %v849_v36, 4 }
 0x15b   : > { %3024 = vmatprep.subr.bf16.mxu1 %v3280_v62  ;;  %v923_v10 = vld [vmem:[#allocation2 + $0x85] sm:$0xf]  ;;  %v918_v14 = vrot.slane %v916_v7, 4  ;;  %v3285_v16 = vld [vmem:[%s4409_s3 + $0x18] sm:$0xff]   ;;  %v1463_v61 = vld [vmem:[#allocation2 + $0x41] sm:$0xf] }
 0x15c   : > { %v1060_v15 = vld [vmem:[#allocation2 + $0x85] sm:$0xf]  ;;  %v1054_v17 = vld [vmem:[#allocation2 + $0x7f] sm:$0xf] }
 0x15d   : > { %1328 = vrot.lane.b32.xlu1 %v1327_v26, %s3434_s28  ;;  %v3286_v20 = vld [vmem:[%s4409_s3 + $0x60] sm:$0xff]  }
 0x15e   : > { %1241 = vrot.lane.b32.xlu0 %v1239_v18, %s3435_s29  ;;  %3025 = vmatpush3.bf16.msra.mxu1 %v3281_v2  ;;  %v3287_v23 = vld [vmem:[%s4409_s3 + $0x20] sm:$0xff]  }
 0x15f   : > { %3026 = vmatprep.subr.bf16.mxu1 %v3282_v8  ;;  %v1469_v62 = vld [vmem:[#allocation2 + $0x47] sm:$0xf] }
 0x160   : > { %v1173_v8 = vld [vmem:[#allocation2 + $0x8a] sm:$0xf] }
 0x161   : > { %716 = vrot.lane.b32.xlu1 %v715_v19, %s3434_s28  ;;  %v1062_v19 = vrot.slane %v1060_v15, 4  ;;  %v1358_v15 = vld [vmem:[#allocation2 + $0x57] sm:$0xf] }
 0x162   : > { %1149 = vrot.lane.b32.xlu0 %v1147_v21, %s3435_s29  ;;  %3027 = vmatpush3.bf16.msra.mxu1 %v3283_v11  ;;  %v1206_v21 = vld [vmem:[#allocation2 + $0x85] sm:$0xf] }
 0x163   : > { %3028 = vmatprep.subr.bf16.mxu1 %v3284_v12  ;;  %v1179_v12 = vld [vmem:[#allocation2 + $0x90] sm:$0xf] }
 0x165   : > { %865 = vrot.lane.b32.xlu1 %v864_v22, %s3436_s14 }
 0x166   : > { %1321 = vrot.lane.b32.xlu0 %v1319_v24, %s3434_s28  ;;  %3029 = vmatpush3.bf16.msra.mxu1 %v3285_v16  ;;  %v1200_v24 = vld [vmem:[#allocation2 + $0x7f] sm:$0xf] }
 0x167   : > { %3030 = vmatprep.subr.bf16.mxu1 %v3286_v20  ;;  %v1371_v20 = vld [vmem:[#allocation2 + $0x63] sm:$0xf] }
 0x169   : > { %1037 = vrot.lane.b32.xlu1 %v1036_v25, %s3435_s29  ;;  %v3288_v25 = vld [vmem:[%s4409_s3 + $0x68] sm:$0xff]  }
 0x16a   : > { %723 = vrot.lane.b32.xlu0 %v721_v28, %s3434_s28  ;;  %v1208_v28 = vrot.slane %v1206_v21, 4  ;;  %3031 = vmatpush3.bf16.msra.mxu1 %v3287_v23 }
 0x16b   : > { %3032 = vmatprep.subr.bf16.mxu1 %v3288_v25 }
 0x16d   : > { %945 = vrot.lane.b32.xlu1 %v944_v29, %s3435_s29  ;;  %v1166_v29 = vld [vmem:[#allocation2 + $0x84] sm:$0xf] }
 0x16e   : > { %858 = vrot.lane.b32.xlu0 %v856_v31, %s3436_s14  ;;  %v3289_v31 = vld [vmem:[%s4409_s3 + $0x28] sm:$0xff]  }
 0x16f   : > { %3033 = vmatpush3.bf16.msra.mxu1 %v3289_v31 }
 0x170   : > { %3034 = vmatprep.subr.bf16.mxu1 %v3290_v33 }
 0x171   : > { %1407 = vrot.lane.b32.xlu1 %v1406_v32, %s3434_s28  ;;  %v1160_v32 = vld [vmem:[#allocation2 + $0x7e] sm:$0xf] }
 0x172   : > { %1030 = vrot.lane.b32.xlu0 %v1028_v34, %s3435_s29 }
 0x173   : > { %3035 = vmatpush3.bf16.msra.mxu1 %v3291_v40 }
 0x175   : > { %730 = vrot.lane.b32.xlu1 %v729_v35, %s3434_s28  ;;  %v1168_v35 = vrot.slane %v1166_v29, 4 }
 0x176   : > { %951 = vrot.lane.b32.xlu0 %v949_v38, %s3435_s29 }
 0x179   : > { %878 = vrot.lane.b32.xlu1 %v877_v39, %s3436_s14  ;;  %v843_v39 = vld [vmem:[#allocation2 + $0x8a] sm:$0xf] }
 0x17a   : > { %1400 = vrot.lane.b32.xlu0 %v1398_v41, %s3434_s28  ;;  %v3292_v41 = vld [vmem:[%s4409_s3 + $0x78] sm:$0xff]  }
 0x17b   : > { %3036 = vmatprep.subr.bf16.mxu1 %v3292_v41 }
 0x17d   : > { %1050 = vrot.lane.b32.xlu1 %v1049_v42, %s3435_s29 }
 0x17e   : > { %871 = vrot.lane.b32.xlu0 %v869_v45, %s3436_s14  ;;  %v755_v45 = vld [vmem:[#allocation2 + $0x8b] sm:$0xf] }
 0x17f   : > { %v757_v51 = vrot.slane %v755_v45, 4 }
 0x181   : > { %958 = vrot.lane.b32.xlu1 %v957_v46, %s3435_s29  ;;  %v3293_v46 = vld [vmem:[%s4409_s3 + $0x38] sm:$0xff]  }
 0x182   : > { %1043 = vrot.lane.b32.xlu0 %v1041_v49, %s3435_s29  ;;  %v1450_v49 = vld [vmem:[#allocation2 + $0x35] sm:$0xf]  ;;  %3037 = vmatpush3.bf16.msra.mxu1 %v3293_v46 }
 0x184   : > { %v1005_v52 = vpop.permute.xlu0 %1004 }
 0x185   : > { %1420 = vrot.lane.b32.xlu1 %v1419_v50, %s3434_s28  ;;  %1007 = vst.msk [vmem:[#allocation3 + $0x38] sm:$0xf] %vm711_vm6, %v1005_v52  ;;  %v929_v52 = vld [vmem:[#allocation2 + $0x8b] sm:$0xf] }
 0x186   : > { %1413 = vrot.lane.b32.xlu0 %v1411_v54, %s3434_s28  ;;  %v3891_v54 = vld [vmem:[%s4409_s3 + $0x80] sm:$0xff]   ;;  %v931_v58 = vrot.slane %v929_v52, 4 }
 0x187   : > { %v1012_v55 = vpop.permute.xlu1 %1011  ;;  %3199 = vmatprep.subr.bf16.mxu1 %v3891_v54 }
 0x188   : > { %1014 = vst.msk [vmem:[#allocation3 + $0x38] sm:$0xf0] %vm719_vm8, %v1012_v55  ;;  %v965_v59 = vpop.permute.xlu0 %964 }
 0x189   : > { %839 = vrot.lane.b32.xlu1 %v838_v56, %s3435_s29  ;;  %967 = vst.msk [vmem:[#allocation3 + $0x30] sm:$0xf] %vm767_vm9, %v965_v59  ;;  %v1067_v56 = vld [vmem:[#allocation2 + $0x8b] sm:$0xf]  ;;  %v1073_v59 = vld [vmem:[#allocation2 + $0x91] sm:$0xf] }
 0x18a   : > { %832 = vrot.lane.b32.xlu0 %v830_v60, %s3435_s29  ;;  %v1075_v1 = vrot.slane %v1073_v59, 4 }
 0x18b   : > { %v3810_v63 = vpop.permute.xlu1 %971 }
 0x18c   : > { %v1111_v3 = vpop.permute.xlu0 %1110 }
 0x18d   : > { %1459 = vrot.lane.b32.xlu1 %v1458_v0, %s3436_s14  ;;  %1113 = vst.msk [vmem:[#allocation3 + $0x60] sm:$0xf] %vm711_vm6, %v1111_v3  ;;  %v1471_v3 = vrot.slane %v1469_v62, 4 }
 0x18e   : > { %751 = vrot.lane.b32.xlu0 %v749_v4, %s3435_s29  ;;  %v1213_v4 = vld [vmem:[#allocation2 + $0x8b] sm:$0xf] }
 0x18f   : > { %v1118_v5 = vpop.permute.xlu1 %1117 }
 0x190   : > { %1120 = vst.msk [vmem:[#allocation3 + $0x60] sm:$0xf0] %vm719_vm8, %v1118_v5  ;;  %v3823_v9 = vpop.permute.xlu0 %1254 }
 0x191   : > { %744 = vrot.lane.b32.xlu1 %v743_v6, %s3435_s29  ;;  %v1219_v6 = vld [vmem:[#allocation2 + $0x91] sm:$0xf] }
 0x192   : > { %925 = vrot.lane.b32.xlu0 %v923_v10, %s3434_s28  ;;  %v1221_v11 = vrot.slane %v1219_v6, 4 }
 0x193   : > { %v3832_v13 = vpop.permute.xlu1 %1341 }
 0x194   : > { %v3838_v26 = vpop.permute.xlu0 %1426 }
 0x195   : > { %919 = vrot.lane.b32.xlu1 %v918_v14, %s3434_s28 }
 0x196   : > { %1056 = vrot.lane.b32.xlu0 %v1054_v17, %s3436_s14  ;;  %v1181_v17 = vrot.slane %v1179_v12, 4 }
 0x197   : > { %v1025_v18 = vpop.permute.xlu1 %1024 }
 0x198   : > { %1027 = vst.msk [vmem:[#allocation3 + $0x50] sm:$0xf0] %vm719_vm8, %v1025_v18  ;;  %v3846_v22 = vpop.permute.xlu0 %1334  ;;  %v1364_v18 = vld [vmem:[#allocation2 + $0x5d] sm:$0xf] }
 0x199   : > { %1063 = vrot.lane.b32.xlu1 %v1062_v19, %s3436_s14  ;;  %v1366_v23 = vrot.slane %v1364_v18, 4 }
 0x19a   : > { %1202 = vrot.lane.b32.xlu0 %v1200_v24, %s3434_s28  ;;  %v1377_v24 = vld [vmem:[#allocation2 + $0x69] sm:$0xf] }
 0x19b   : > { %v3855_v27 = vpop.permute.xlu1 %984 }
 0x19c   : > { %v1018_v30 = vpop.permute.xlu0 %1017 }
 0x19d   : > { %1209 = vrot.lane.b32.xlu1 %v1208_v28, %s3434_s28  ;;  %1020 = vst.msk [vmem:[#allocation3 + $0x50] sm:$0xf] %vm711_vm6, %v1018_v30 }
 0x19e   : > { %1162 = vrot.lane.b32.xlu0 %v1160_v32, %s3436_s14 }
 0x19f   : > { %v1131_v34 = vpop.permute.xlu1 %1130 }
 0x1a0   : > { %1133 = vst.msk [vmem:[#allocation3 + $0x78] sm:$0xf0] %vm719_vm8, %v1131_v34  ;;  %v3868_v38 = vpop.permute.xlu0 %977 }
 0x1a1   : > { %1169 = vrot.lane.b32.xlu1 %v1168_v35, %s3436_s14 }
 0x1a2   : > { %845 = vrot.lane.b32.xlu0 %v843_v39, %s3435_s29 }
 0x1a3   : > { %v3877_v42 = vpop.permute.xlu1 %1261 }
 0x1a4   : > { %v1124_v47 = vpop.permute.xlu0 %1123 }
 0x1a5   : > { %852 = vrot.lane.b32.xlu1 %v851_v44, %s3435_s29  ;;  %1126 = vst.msk [vmem:[#allocation3 + $0x78] sm:$0xf] %vm711_vm6, %v1124_v47 }
 0x1a6   : > { %1452 = vrot.lane.b32.xlu0 %v1450_v49, %s3436_s14 }
 0x1a7   : > { %v3885_v50 = vpop.permute.xlu1 %1433 }
 0x1a8   : > { %v3893_v55 = vpop.permute.xlu0 %1267 }
 0x1a9   : > { %758 = vrot.lane.b32.xlu1 %v757_v51, %s3435_s29 }
 0x1aa   : > { %1069 = vrot.lane.b32.xlu0 %v1067_v56, %s3436_s14 }
 0x1ab   : > { %v3897_v57 = vpop.permute.xlu1 %1354 }
 0x1ac   : > { %v3900_v60 = vpop.permute.xlu0 %1439 }
 0x1ad   : > { %932 = vrot.lane.b32.xlu1 %v931_v58, %s3434_s28 }
 0x1ae   : > { %1465 = vrot.lane.b32.xlu0 %v1463_v61, %s3436_s14 }
 0x1af   : > { %v820_v0 = vpop.permute.xlu1 %819 }
 0x1b0   : > { %822 = vst.msk [vmem:[#allocation3 + $0x20] sm:$0xf] %vm711_vm6, %v820_v0  ;;  %v1348_v2 = vpop.permute.xlu0 %1347 }
 0x1b1   : > { %1076 = vrot.lane.b32.xlu1 %v1075_v1, %s3436_s14 }
 0x1b2   : > { %1215 = vrot.lane.b32.xlu0 %v1213_v4, %s3434_s28 }
 0x1b3   : > { %v3906_v5 = vpop.permute.xlu1 %772 }
 0x1b4   : > { %v807_v7 = vpop.permute.xlu0 %806 }
 0x1b5   : > { %1472 = vrot.lane.b32.xlu1 %v1471_v3, %s3436_s14  ;;  %809 = vst.msk [vmem:[#allocation3 + $0x8] sm:$0xf] %vm711_vm6, %v807_v7 }
 0x1b6   : > { %1175 = vrot.lane.b32.xlu0 %v1173_v8, %s3436_s14 }
 0x1b7   : > { %v1144_v10 = vpop.permute.xlu1 %1143 }
 0x1b8   : > { %1146 = vst.msk [vmem:[#allocation3 + $0x60] sm:$0xf0] %vm747_vm10, %v1144_v10  ;;  %v765_v14 = vpop.permute.xlu0 %764 }
 0x1b9   : > { %1222 = vrot.lane.b32.xlu1 %v1221_v11, %s3434_s28  ;;  %768 = vst.msk [vmem:[#allocation3] sm:$0xf] %vm767_vm9, %v765_v14  ;;  %s323_s28 = sand.u32 1, %s3422_s10  }
 0x1ba   : > { %1360 = vrot.lane.b32.xlu0 %v1358_v15, %s3436_s14  ;;  %s324_s21 = scalar_lea.vmem [#allocation5], %s323_s28  ;;  %s2815_s13 = scalar_lea.sflag [#allocation6], %s323_s28 }
 0x1bb   : > { %v1316_v16 = vpop.permute.xlu1 %1315  ;;  %s2827_s22 = sshll.u32 %s324_s21, 4  ;;  %s4366_s22 = int_to_ptr.vmem [resolvable:$true] %s2827_s22 }
 0x1bc   : > { %1318 = vst.msk [vmem:[#allocation3 + $0x90] sm:$0xf0] %vm719_vm8, %v1316_v16  ;;  %v3919_v19 = vpop.permute.xlu0 %1228  ;;  %s3368_s25 = scalar_lea.vmem %s4366_s22, 16  ;;  %p3375_p0 = scmp.lt.s32.totalorder %s4366_s22, %s3373_s27 }
 0x1bd   : > { %1344 = vst.msk [vmem:[#allocation3 + $0x90] sm:$0xf0] %vm747_vm10, %v3832_v13  ;;  %1182 = vrot.lane.b32.xlu1 %v1181_v17, %s3436_s14  ;;  %v1379_v13 = vrot.slane %v1377_v24, 4  ;;  %p3369_p11 = scmp.ne.s32.totalorder %s4366_s22, %s3368_s25 }
 0x1be   : > { %1373 = vrot.lane.b32.xlu0 %v1371_v20, %s3436_s14 }
 0x1bf   : > { %v827_v21 = vpop.permute.xlu1 %826  ;;  %p3370_p12 = pnand %p3369_p11, %p3528_p5 }
 0x1c0   : > { %829 = vst.msk [vmem:[#allocation3 + $0x20] sm:$0xf0] %vm719_vm8, %v827_v21  ;;  %v1137_v25 = vpop.permute.xlu0 %1136 }
 0x1c1   : > { %1367 = vrot.lane.b32.xlu1 %v1366_v23, %s3436_s14  ;;  %1139 = vst.msk [vmem:[#allocation3 + $0x60] sm:$0xf] %vm739_vm7, %v1137_v25  ;;  %v3295_v25 = vld [vmem:[%s4409_s3 + $0x88] sm:$0xff]   ;;  %p3371_p13 = pneg %p3370_p12 }
 0x1c3   : > { %v3926_v28 = vpop.permute.xlu1 %786 }
 0x1c4   : > { %v1309_v29 = vpop.permute.xlu0 %1308 }
 0x1c5   : > { %1380 = vrot.lane.b32.xlu1 %v1379_v13, %s3436_s14  ;;  %1311 = vst.msk [vmem:[#allocation3 + $0x90] sm:$0xf] %vm711_vm6, %v1309_v29  ;;  %s3374_s14 = scalar_lea.vmem %s3373_s27, 32 }
 0x1c6   : > { %1337 = vst.msk [vmem:[#allocation3 + $0x90] sm:$0xf] %vm739_vm7, %v3846_v22  ;;  %p3376_p1 = scmp.lt.s32.totalorder %s3374_s14, %s3368_s25 }
 0x1c7   : > { %v3932_v30 = vpop.permute.xlu1 %1235 }
 0x1c8   : > { %v814_v31 = vpop.permute.xlu0 %813  ;;  %p3377_p2 = por %p3376_p1, %p3375_p0 }
 0x1c9   : > { %816 = vst.msk [vmem:[#allocation3 + $0x8] sm:$0xf0] %vm719_vm8, %v814_v31 }
 0x1ca   : > { %p3378_p3 = pnand %p3377_p2, %p3371_p13 }
 0x1cb   : > { %v1157_v32 = vpop.permute.xlu1 %1156 }
 0x1cc   : > { %1159 = vst.msk [vmem:[#allocation3 + $0x78] sm:$0xf0] %vm747_vm10, %v1157_v32  ;;  %v780_v33 = vpop.permute.xlu0 %779 }
 0x1cf   : > { %v1329_v34 = vpop.permute.xlu1 %1328 }
 0x1d0   : > { %1331 = vst.msk [vmem:[#allocation3 + $0xa8] sm:$0xf0] %vm719_vm8, %v1329_v34  ;;  %v3939_v35 = vpop.permute.xlu0 %1241 }
 0x1d1   : > { %1357 = vst.msk [vmem:[#allocation3 + $0xa8] sm:$0xf0] %vm747_vm10, %v3897_v57 }
 0x1d3   : > { %v717_v36 = vpop.permute.xlu1 %716 }
 0x1d4   : > { %720 = vst.msk [vmem:[#allocation3] sm:$0xf0] %vm719_vm8, %v717_v36  ;;  %v1150_v22 = vpop.permute.xlu0 %1149 }
 0x1d5   : > { %1152 = vst.msk [vmem:[#allocation3 + $0x78] sm:$0xf] %vm739_vm7, %v1150_v22 }
 0x1d7   : > { %v866_v39 = vpop.permute.xlu1 %865 }
 0x1d8   : > { %v1322_v40 = vpop.permute.xlu0 %1321 }
 0x1d9   : > { %1324 = vst.msk [vmem:[#allocation3 + $0xa8] sm:$0xf] %vm711_vm6, %v1322_v40 }
 0x1da   : > { %1350 = vst.msk [vmem:[#allocation3 + $0xa8] sm:$0xf] %vm739_vm7, %v1348_v2 }
 0x1db   : > { %v1038_v41 = vpop.permute.xlu1 %1037 }
 0x1dc   : > { %1040 = vst.msk [vmem:[#allocation3 + $0x38] sm:$0xf0] %vm747_vm10, %v1038_v41  ;;  %v724_v44 = vpop.permute.xlu0 %723 }
 0x1dd   : > { %726 = vst.msk [vmem:[#allocation3 + $0x18] sm:$0xf] %vm711_vm6, %v724_v44 }
 0x1df   : > { %v946_v45 = vpop.permute.xlu1 %945 }
 0x1e0   : > { %v859_v46 = vpop.permute.xlu0 %858 }
 0x1e3   : > { %v1408_v47 = vpop.permute.xlu1 %1407 }
 0x1e4   : > { %1410 = vst.msk [vmem:[#allocation3 + $0x98] sm:$0xf0] %vm719_vm8, %v1408_v47  ;;  %v1031_v49 = vpop.permute.xlu0 %1030 }
 0x1e5   : > { %1436 = vst.msk [vmem:[#allocation3 + $0x98] sm:$0xf0] %vm747_vm10, %v3885_v50 }
 0x1e6   : > { %1033 = vst.msk [vmem:[#allocation3 + $0x38] sm:$0xf] %vm739_vm7, %v1031_v49  ;;  %v1492_v49 = vld [vmem:[#allocation3 + $0x10] sm:$0xff] }
 0x1e7   : > { %v731_v51 = vpop.permute.xlu1 %730 }
 0x1e8   : > { %733 = vst.msk [vmem:[#allocation3 + $0x18] sm:$0xf0] %vm719_vm8, %v731_v51  ;;  %v952_v52 = vpop.permute.xlu0 %951  ;;  %v1495_v51 = vld [vmem:[#allocation3 + $0x28] sm:$0xff] }
 0x1eb   : > { %v879_v56 = vpop.permute.xlu1 %878 }
 0x1ec   : > { %v1401_v57 = vpop.permute.xlu0 %1400 }
 0x1ed   : > { %1403 = vst.msk [vmem:[#allocation3 + $0x98] sm:$0xf] %vm711_vm6, %v1401_v57 }
 0x1ee   : > { %1429 = vst.msk [vmem:[#allocation3 + $0x98] sm:$0xf] %vm739_vm7, %v3838_v26 }
 0x1ef   : > { %v1051_v58 = vpop.permute.xlu1 %1050 }
 0x1f0   : > { %1053 = vst.msk [vmem:[#allocation3 + $0x50] sm:$0xf0] %vm747_vm10, %v1051_v58  ;;  %v872_v59 = vpop.permute.xlu0 %871  ;;  %v1516_v58 = vpack.c.bf16 %v1495_v51, %v1492_v49  ;;  %v1829_v51 = vlaneseq }
 0x1f2   : > { %vm4102_vm12 = vcmp.lt.s32.totalorder %v1829_v51, 64  ;;  %vm1860_vm13 = vcmp.ge.s32.totalorder %v1829_v51, 64  ;;  %vm1861_vm14 = vcmp.lt.s32.totalorder %v1829_v51, 128 }
 0x1f3   : > { %v3956_v61 = vpop.permute.xlu1 %958  ;;  %vm4192_vm15 = vmand %vm1860_vm13, %vm1861_vm14 }
 0x1f4   : > { %v1044_v50 = vpop.permute.xlu0 %1043 }
 0x1f5   : > { %1046 = vst.msk [vmem:[#allocation3 + $0x50] sm:$0xf] %vm739_vm7, %v1044_v50  ;;  %v1504_v50 = vld [vmem:[#allocation3 + $0x70] sm:$0xff] }
 0x1f7   : > { %v1421_v62 = vpop.permute.xlu1 %1420 }
 0x1f8   : > { %1423 = vst.msk [vmem:[#allocation3 + $0xb0] sm:$0xf0] %vm719_vm8, %v1421_v62  ;;  %v1414_v0 = vpop.permute.xlu0 %1413 }
 0x1f9   : > { %1449 = vst.msk [vmem:[#allocation3 + $0xb0] sm:$0xf0] %vm747_vm10, %v3792_v48 }
 0x1fa   : > { %1416 = vst.msk [vmem:[#allocation3 + $0xb0] sm:$0xf] %vm711_vm6, %v1414_v0  ;;  %v1507_v0 = vld [vmem:[#allocation3 + $0x88] sm:$0xff] }
 0x1fb   : > { %1442 = vst.msk [vmem:[#allocation3 + $0xb0] sm:$0xf] %vm739_vm7, %v3900_v60  ;;  %v840_v26 = vpop.permute.xlu1 %839 }
 0x1fc   : > { %842 = vst.msk [vmem:[#allocation3 + $0x8] sm:$0xf0] %vm747_vm10, %v840_v26  ;;  %v833_v1 = vpop.permute.xlu0 %832  ;;  %v1522_v26 = vpack.c.bf16 %v1507_v0, %v1504_v50 }
 0x1fd   : > { %868 = vst.msk [vmem:[#allocation3 + $0x8] sm:$0xf0] %vm775_vm11, %v866_v39 }
 0x1fe   : > { %835 = vst.msk [vmem:[#allocation3 + $0x8] sm:$0xf] %vm739_vm7, %v833_v1  ;;  %v1510_v1 = vld [vmem:[#allocation3 + $0xa0] sm:$0xff] }
 0x1ff   : > { %861 = vst.msk [vmem:[#allocation3 + $0x8] sm:$0xf] %vm767_vm9, %v859_v46  ;;  %v1460_v2 = vpop.permute.xlu1 %1459 }
 0x200   : > { %1462 = vst.msk [vmem:[#allocation3 + $0x98] sm:$0xf0] %vm775_vm11, %v1460_v2  ;;  %v752_v48 = vpop.permute.xlu0 %751  ;;  %v1513_v2 = vld [vmem:[#allocation3 + $0xb8] sm:$0xff] }
 0x201   : > { %754 = vst.msk [vmem:[#allocation3 + $0x18] sm:$0xf] %vm739_vm7, %v752_v48  ;;  %v1525_v48 = vpack.c.bf16 %v1513_v2, %v1510_v1  ;;  %v4081_v2 = vshrl.u32 %v1829_v51, 7 }
 0x202   : > { %782 = vst.msk [vmem:[#allocation3 + $0x18] sm:$0xf] %vm767_vm9, %v780_v33 }
 0x203   : > { %v745_v3 = vpop.permute.xlu1 %744 }
 0x204   : > { %748 = vst.msk [vmem:[#allocation3] sm:$0xf0] %vm747_vm10, %v745_v3  ;;  %v926_v60 = vpop.permute.xlu0 %925  ;;  %v3296_v3 = vld [vmem:[%s4411_s5 + $0x40] sm:$0xff]  }
 0x205   : > { %776 = vst.msk [vmem:[#allocation3] sm:$0xf0] %vm775_vm11, %v3906_v5  ;;  %3068 = vmatprep.subr.bf16.mxu0 %v3296_v3 }
 0x206   : > { %928 = vst.msk [vmem:[#allocation3 + $0x48] sm:$0xf] %vm711_vm6, %v926_v60  ;;  %v1491_v15 = vld [vmem:[#allocation3 + $0x8] sm:$0xff]  ;;  %v3297_v60 = vld [vmem:[%s4411_s5] sm:$0xff]  }
 0x207   : > { %954 = vst.msk [vmem:[#allocation3 + $0x48] sm:$0xf] %vm739_vm7, %v952_v52  ;;  %v920_v4 = vpop.permute.xlu1 %919  ;;  %3069 = vmatpush3.bf16.msra.mxu0 %v3297_v60 }
 0x208   : > { %980 = vst.msk [vmem:[#allocation3 + $0x48] sm:$0xf] %vm767_vm9, %v3868_v38  ;;  %v1057_v6 = vpop.permute.xlu0 %1056 }
 0x209   : > { %922 = vst.msk [vmem:[#allocation3 + $0x30] sm:$0xf0] %vm719_vm8, %v920_v4  ;;  %v3298_v4 = vld [vmem:[%s4411_s5 + $0x48] sm:$0xff]  }
 0x20a   : > { %948 = vst.msk [vmem:[#allocation3 + $0x30] sm:$0xf0] %vm747_vm10, %v946_v45  ;;  %3070 = vmatprep.subr.bf16.mxu0 %v3298_v4  ;;  %v3310_v4 = vld [vmem:[%s4411_s5 + $0x68] sm:$0xff]  }
 0x20b   : > { %974 = vst.msk [vmem:[#allocation3 + $0x30] sm:$0xf0] %vm775_vm11, %v3810_v63  ;;  %v1064_v5 = vpop.permute.xlu1 %1063 }
 0x20c   : > { %1059 = vst.msk [vmem:[#allocation3 + $0x38] sm:$0xf] %vm767_vm9, %v1057_v6  ;;  %v1203_v7 = vpop.permute.xlu0 %1202  ;;  %v1490_v20 = vld [vmem:[#allocation3] sm:$0xff]  ;;  %v3299_v6 = vld [vmem:[%s4411_s5 + $0x8] sm:$0xff]  }
 0x20d   : > { %1066 = vst.msk [vmem:[#allocation3 + $0x38] sm:$0xf0] %vm775_vm11, %v1064_v5  ;;  %v3305_v5 = vld [vmem:[%s4411_s5 + $0xc0] sm:$0xff]   ;;  %3071 = vmatpush3.bf16.msra.mxu0 %v3299_v6  ;;  %v3311_v6 = vld [vmem:[%s4411_s5 + $0xd0] sm:$0xff]  }
 0x20e   : > { %1205 = vst.msk [vmem:[#allocation3 + $0x68] sm:$0xf] %vm711_vm6, %v1203_v7  ;;  %v3307_v7 = vld [vmem:[%s4411_s5 + $0x80] sm:$0xff]  }
 0x20f   : > { %1231 = vst.msk [vmem:[#allocation3 + $0x68] sm:$0xf] %vm739_vm7, %v3919_v19  ;;  %v1210_v38 = vpop.permute.xlu1 %1209 }
 0x210   : > { %1257 = vst.msk [vmem:[#allocation3 + $0x68] sm:$0xf] %vm767_vm9, %v3823_v9  ;;  %v1163_v63 = vpop.permute.xlu0 %1162 }
 0x211   : > { %1212 = vst.msk [vmem:[#allocation3 + $0x68] sm:$0xf0] %vm719_vm8, %v1210_v38  ;;  %v3300_v38 = vld [vmem:[%s4411_s5 + $0x50] sm:$0xff]  }
 0x212   : > { %1238 = vst.msk [vmem:[#allocation3 + $0x68] sm:$0xf0] %vm747_vm10, %v3932_v30  ;;  %v1496_v33 = vld [vmem:[#allocation3 + $0x30] sm:$0xff]  ;;  %3072 = vmatprep.subr.bf16.mxu0 %v3300_v38 }
 0x213   : > { %1264 = vst.msk [vmem:[#allocation3 + $0x68] sm:$0xf0] %vm775_vm11, %v3877_v42  ;;  %v1170_v8 = vpop.permute.xlu1 %1169 }
 0x214   : > { %1165 = vst.msk [vmem:[#allocation3 + $0x60] sm:$0xf] %vm767_vm9, %v1163_v63  ;;  %v846_v10 = vpop.permute.xlu0 %845  ;;  %v1497_v30 = vld [vmem:[#allocation3 + $0x38] sm:$0xff]  ;;  %v3308_v63 = vld [vmem:[%s4411_s5 + $0xc8] sm:$0xff]  }
 0x215   : > { %1172 = vst.msk [vmem:[#allocation3 + $0x60] sm:$0xf0] %vm775_vm11, %v1170_v8  ;;  %v3309_v8 = vld [vmem:[%s4411_s5 + $0x88] sm:$0xff]  }
 0x216   : > { %848 = vst.msk [vmem:[#allocation3 + $0x20] sm:$0xf] %vm739_vm7, %v846_v10  ;;  %v3301_v10 = vld [vmem:[%s4411_s5 + $0x10] sm:$0xff]  }
 0x217   : > { %874 = vst.msk [vmem:[#allocation3 + $0x20] sm:$0xf] %vm767_vm9, %v872_v59  ;;  %v853_v9 = vpop.permute.xlu1 %852  ;;  %v1498_v59 = vld [vmem:[#allocation3 + $0x40] sm:$0xff]  ;;  %3073 = vmatpush3.bf16.msra.mxu0 %v3301_v10 }
 0x218   : > { %855 = vst.msk [vmem:[#allocation3 + $0x20] sm:$0xf0] %vm747_vm10, %v853_v9  ;;  %v1453_v11 = vpop.permute.xlu0 %1452  ;;  %v3302_v9 = vld [vmem:[%s4411_s5 + $0x58] sm:$0xff]  }
 0x219   : > { %881 = vst.msk [vmem:[#allocation3 + $0x20] sm:$0xf0] %vm775_vm11, %v879_v56  ;;  %3074 = vmatprep.subr.bf16.mxu0 %v3302_v9 }
 0x21a   : > { %1455 = vst.msk [vmem:[#allocation3 + $0x98] sm:$0xf] %vm767_vm9, %v1453_v11  ;;  %v1503_v22 = vld [vmem:[#allocation3 + $0x68] sm:$0xff]  ;;  %v3303_v11 = vld [vmem:[%s4411_s5 + $0x18] sm:$0xff]  }
 0x21b   : > { %v759_v12 = vpop.permute.xlu1 %758  ;;  %3075 = vmatpush3.bf16.msra.mxu0 %v3303_v11 }
 0x21c   : > { %761 = vst.msk [vmem:[#allocation3 + $0x18] sm:$0xf0] %vm747_vm10, %v759_v12  ;;  %v1070_v42 = vpop.permute.xlu0 %1069  ;;  %v1502_v44 = vld [vmem:[#allocation3 + $0x60] sm:$0xff] }
 0x21d   : > { %789 = vst.msk [vmem:[#allocation3 + $0x18] sm:$0xf0] %vm775_vm11, %v3926_v28  ;;  %v3304_v12 = vld [vmem:[%s4411_s5 + $0x60] sm:$0xff]  }
 0x21e   : > { %1072 = vst.msk [vmem:[#allocation3 + $0x50] sm:$0xf] %vm767_vm9, %v1070_v42  ;;  %v3306_v42 = vld [vmem:[%s4411_s5 + $0x20] sm:$0xff]   ;;  %3076 = vmatprep.subr.bf16.mxu0 %v3304_v12  ;;  %v3314_v12 = vld [vmem:[%s4411_s5 + $0xd8] sm:$0xff]  }
 0x21f   : > { %v933_v14 = vpop.permute.xlu1 %932  ;;  %3077 = vmatpush3.bf16.msra.mxu0 %v3306_v42  ;;  %v3315_v42 = vld [vmem:[%s4411_s5 + $0x98] sm:$0xff]  }
 0x220   : > { %935 = vst.msk [vmem:[#allocation3 + $0x48] sm:$0xf0] %vm719_vm8, %v933_v14  ;;  %v1494_v16 = vld [vmem:[#allocation3 + $0x20] sm:$0xff]  ;;  %v1466_v17 = vpop.permute.xlu0 %1465  ;;  %3078 = vmatprep.subr.bf16.mxu0 %v3310_v4  ;;  %v1990_v4 = vsub.s32 1, %v4081_v2 }
 0x221   : > { %961 = vst.msk [vmem:[#allocation3 + $0x48] sm:$0xf0] %vm747_vm10, %v3956_v61  ;;  %v1515_v18 = vpack.c.bf16 %v1494_v16, %v1491_v15  ;;  %v1509_v46 = vld [vmem:[#allocation3 + $0x98] sm:$0xff] }
 0x222   : > { %987 = vst.msk [vmem:[#allocation3 + $0x48] sm:$0xf0] %vm775_vm11, %v3855_v27  ;;  %v1501_v61 = vld [vmem:[#allocation3 + $0x58] sm:$0xff] }
 0x223   : > { %1468 = vst.msk [vmem:[#allocation3 + $0xb0] sm:$0xf] %vm767_vm9, %v1466_v17  ;;  %1714 = vmatprep.mubr.bf16.mxu1 %v1515_v18  ;;  %v1077_v19 = vpop.permute.xlu1 %1076  ;;  %v1519_v62 = vpack.c.bf16 %v1501_v61, %v1498_v59 }
 0x224   : > { %1079 = vst.msk [vmem:[#allocation3 + $0x50] sm:$0xf0] %vm775_vm11, %v1077_v19  ;;  %v1493_v21 = vld [vmem:[#allocation3 + $0x18] sm:$0xff]  ;;  %v1216_v23 = vpop.permute.xlu0 %1215 }
 0x225   : > { %v1514_v24 = vpack.c.bf16 %v1493_v21, %v1490_v20  ;;  %1218 = vst.msk [vmem:[#allocation3 + $0x80] sm:$0xf] %vm711_vm6, %v1216_v23 }
 0x226   : > { %1244 = vst.msk [vmem:[#allocation3 + $0x80] sm:$0xf] %vm739_vm7, %v3939_v35 }
 0x227   : > { %v1473_v27 = vpop.permute.xlu1 %1472  ;;  %1715 = vmatmul.mubr.bf16.vlgmr.msra.gmra.mrb[0].mxu1 %v1514_v24  ;;  %1270 = vst.msk [vmem:[#allocation3 + $0x80] sm:$0xf] %vm767_vm9, %v3893_v55 }
 0x228   : > { %1475 = vst.msk [vmem:[#allocation3 + $0xb0] sm:$0xf0] %vm775_vm11, %v1473_v27  ;;  %3200 = vmatpush3.bf16.msra.mxu1 %v3891_v54  ;;  %v1176_v28 = vpop.permute.xlu0 %1175 }
 0x229   : > { %3201 = vmatprep.subr.bf16.mxu1 %v3295_v25  ;;  %1178 = vst.msk [vmem:[#allocation3 + $0x78] sm:$0xf] %vm767_vm9, %v1176_v28  ;;  %v1499_v13 = vld [vmem:[#allocation3 + $0x48] sm:$0xff] }
 0x22a   : > { %v1517_v34 = vpack.c.bf16 %v1499_v13, %v1496_v33 }
 0x22b   : > { %v1223_v29 = vpop.permute.xlu1 %1222  ;;  %v1500_v31 = vld [vmem:[#allocation3 + $0x50] sm:$0xff] }
 0x22c   : > { %1225 = vst.msk [vmem:[#allocation3 + $0x80] sm:$0xf0] %vm719_vm8, %v1223_v29  ;;  %v1518_v32 = vpack.c.bf16 %v1500_v31, %v1497_v30  ;;  %3202 = vmatpush3.bf16.msra.mxu1 %v3295_v25  ;;  %v1361_v55 = vpop.permute.xlu0 %1360 }
 0x22d   : > { %1251 = vst.msk [vmem:[#allocation3 + $0x80] sm:$0xf0] %vm747_vm10, %v3782_v37  ;;  %3090 = vmatprep.subr.bf16.mxu1 %v3305_v5  ;;  %v3312_v5 = vld [vmem:[%s4411_s5 + $0x28] sm:$0xff]  }
 0x22e   : > { %1277 = vst.msk [vmem:[#allocation3 + $0x80] sm:$0xf0] %vm775_vm11, %v3787_v43  ;;  %1722 = vmatprep.mubr.bf16.mxu1 %v1518_v32  ;;  %3079 = vmatpush3.bf16.msra.mxu0 %v3312_v5  ;;  %v1986_v5 = vsub.s32 0, %v4081_v2 }
 0x22f   : > { %1363 = vst.msk [vmem:[#allocation3 + $0x90] sm:$0xf] %vm767_vm9, %v1361_v55  ;;  %v1183_v54 = vpop.permute.xlu1 %1182  ;;  %1723 = vmatmul.mubr.bf16.gmra.mrb[4].mxu1 %v1517_v34  ;;  %v1512_v40 = vld [vmem:[#allocation3 + $0xb0] sm:$0xff] }
 0x230   : > { %1185 = vst.msk [vmem:[#allocation3 + $0x78] sm:$0xf0] %vm775_vm11, %v1183_v54  ;;  %v1374_v35 = vpop.permute.xlu0 %1373  ;;  %v1524_v47 = vpack.c.bf16 %v1512_v40, %v1509_v46 }
 0x231   : > { %1376 = vst.msk [vmem:[#allocation3 + $0xa8] sm:$0xf] %vm767_vm9, %v1374_v35 }
 0x233   : > { %v1368_v36 = vpop.permute.xlu1 %1367 }
 0x234   : > { %1370 = vst.msk [vmem:[#allocation3 + $0x90] sm:$0xf0] %vm775_vm11, %v1368_v36 }
 0x235   : > { %v1506_v37 = vld [vmem:[#allocation3 + $0x80] sm:$0xff] }
 0x236   : > { %v1521_v39 = vpack.c.bf16 %v1506_v37, %v1503_v22 }
 0x237   : > { %v1381_v41 = vpop.permute.xlu1 %1380  ;;  %v1505_v43 = vld [vmem:[#allocation3 + $0x78] sm:$0xff] }
 0x238   : > { %1383 = vst.msk [vmem:[#allocation3 + $0xa8] sm:$0xf0] %vm775_vm11, %v1381_v41  ;;  %1730 = vmatprep.mubr.bf16.mxu1 %v1521_v39  ;;  %v1520_v45 = vpack.c.bf16 %v1505_v43, %v1502_v44 }
 0x23a   : > { %1731 = vmatmul.mubr.bf16.gmra.mrb[8].mxu1 %v1520_v45 }
 0x23b   : > { %1738 = vmatprep.mubr.bf16.mxu1 %v1524_v47  ;;  %v1508_v52 = vld [vmem:[#allocation3 + $0x90] sm:$0xff] }
 0x23f   : > { %v1511_v56 = vld [vmem:[#allocation3 + $0xa8] sm:$0xff] }
 0x240   : > { %v1523_v57 = vpack.c.bf16 %v1511_v56, %v1508_v52  ;;  %v3437_v52 = vmov 1966171168  }
 0x241   : > { %v1836_v56 = vunpack.c.l.s4 %v3437_v52 }
 0x242   : > { %1739 = vmatmul.mubr.bf16.gmra.mrb[12].mxu1 %v1523_v57 }
 0x243   : > { %3203 = vmatprep.mubr.msk.bf16.mxu1 %vm604_vm3, %v1516_v58  ;;  %v1837_v1 = vunpack.c.0.s8 %v1836_v56 }
 0x24a   : > { %3204 = vmatmul.mubr.msk.bf16.vlgmr.msra.gmra.mrb[16].mxu1 %vm604_vm3, %v1519_v62 }
 0x24b   : > { %3207 = vmatprep.mubr.msk.bf16.mxu1 %vm604_vm3, %v1522_v26  ;;  %3091 = vmatpush3.bf16.msra.mxu1 %v3307_v7 }
 0x24c   : > { %3092 = vmatprep.subr.bf16.mxu1 %v3308_v63  ;;  %v4096_v63 = vsub.s32 %v1837_v1, %v4081_v2 }
 0x24f   : > { %3093 = vmatpush3.bf16.msra.mxu1 %v3309_v8  ;;  %v3313_v8 = vld [vmem:[%s4411_s5 + $0x90] sm:$0xff]  }
 0x250   : > { %3094 = vmatprep.subr.bf16.mxu1 %v3311_v6  ;;  %v1998_v6 = vsub.s32 3, %v4081_v2 }
 0x252   : > { %3208 = vmatmul.mubr.msk.bf16.gmra.mrb[20].mxu1 %vm604_vm3, %v1525_v48  ;;  %v2928_v48 = vld [vmem:[%s4410_s4] ss:$0 sm:$0xff] }
 0x253   : > { %3095 = vmatpush3.bf16.msra.mxu1 %v3313_v8 }
 0x254   : > { %3096 = vmatprep.subr.bf16.mxu1 %v3314_v12 }
 0x257   : > { %3097 = vmatpush3.bf16.msra.mxu1 %v3315_v42 }
 0x2fa   : > { %v3038_v14 = vpop.f32.mrb[0].mxu1 }
 0x2fb   : > { %v3039_v15 = vpop.f32.mrb[1].mxu1 }
 0x2fc   : > { %v3040_v16 = vadd.f32 %v3039_v15, %v3038_v14  ;;  %v3041_v17 = vpop.f32.mrb[2].mxu1 }
 0x2fd   : > { %v3042_v18 = vpop.f32.mrb[3].mxu1 }
 0x2fe   : > { %v3043_v19 = vadd.f32 %v3042_v18, %v3041_v17 }
 0x302   : > { %v3044_v20 = vpop.f32.mrb[4].mxu1 }
 0x303   : > { %v3045_v21 = vpop.f32.mrb[5].mxu1 }
 0x304   : > { %v3046_v23 = vadd.f32 %v3045_v21, %v3044_v20  ;;  %v3047_v24 = vpop.f32.mrb[6].mxu1 }
 0x305   : > { %v3048_v25 = vpop.f32.mrb[7].mxu1 }
 0x306   : > { %v3049_v27 = vadd.f32 %v3048_v25, %v3047_v24  ;;  %v3317_v24 = vld [vmem:[%s4411_s5 + $0xe0] sm:$0xff]   ;;  %v3318_v25 = vld [vmem:[%s4411_s5 + $0x30] sm:$0xff]  }
 0x307   : > { %3098 = vmatprep.subr.bf16.mxu1 %v3317_v24 }
 0x30d   : > { %v3050_v28 = vpop.f32.mrb[8].mxu1 }
 0x30e   : > { %v3051_v13 = vpop.f32.mrb[9].mxu1 }
 0x30f   : > { %v3052_v29 = vadd.f32 %v3051_v13, %v3050_v28  ;;  %v3053_v30 = vpop.f32.mrb[10].mxu1 }
 0x310   : > { %v3054_v31 = vpop.f32.mrb[11].mxu1 }
 0x311   : > { %v3055_v32 = vadd.f32 %v3054_v31, %v3053_v30 }
 0x315   : > { %v3056_v33 = vpop.f32.mrb[12].mxu1 }
 0x316   : > { %v3057_v55 = vpop.f32.mrb[13].mxu1 }
 0x317   : > { %v3058_v34 = vadd.f32 %v3057_v55, %v3056_v33  ;;  %v3059_v54 = vpop.f32.mrb[14].mxu1 }
 0x318   : > { %v3060_v35 = vpop.f32.mrb[15].mxu1 }
 0x319   : > { %v3061_v36 = vadd.f32 %v3060_v35, %v3059_v54 }
 0x31d   : > { %v3205_v22 = vpop.f32.mrb[16].mxu1 }
 0x31e   : > { %v1790_v37 = vadd.f32 %v3205_v22, %v3046_v23  ;;  %v1781_v39 = vpop.f32.mrb[17].mxu1  ;;  %v3316_v23 = vld [vmem:[%s4411_s5 + $0x70] sm:$0xff]   ;;  %v3320_v22 = vld [vmem:[%s4411_s5 + $0xe8] sm:$0xff]  }
 0x31f   : > { %v1782_v40 = vadd.f32 %v3040_v16, %v1781_v39  ;;  %v3206_v41 = vpop.f32.mrb[18].mxu1  ;;  %3080 = vmatprep.subr.bf16.mxu0 %v3316_v23  ;;  %v3322_v39 = vld [vmem:[%s4411_s5 + $0x78] sm:$0xff]   ;;  %v3333_v23 = vld [vmem:[%s4411_s5 + $0x1c8] sm:$0xff]  }
 0x320   : > { %v1793_v44 = vadd.f32 %v3206_v41, %v3049_v27  ;;  %v1784_v43 = vpop.f32.mrb[19].mxu1  ;;  %3081 = vmatpush3.bf16.msra.mxu0 %v3318_v25  ;;  %v3324_v41 = vld [vmem:[%s4411_s5 + $0x38] sm:$0xff]  }
 0x321   : > { %v1812_v45 = vmax.f32 %v1782_v40, %v1790_v37  ;;  %v1785_v46 = vadd.f32 %v3043_v19, %v1784_v43  ;;  %v3321_v37 = vld [vmem:[%s4411_s5 + $0xa8] sm:$0xff]   ;;  %v3323_v40 = vld [vmem:[%s4411_s5 + $0xf0] sm:$0xff]   ;;  %3082 = vmatprep.subr.bf16.mxu0 %v3322_v39 }
 0x322   : > { %v3349_v39 = vld [vmem:[%s4411_s5 + $0x1e8] sm:$0xff]  }
 0x323   : > { %v1813_v47 = vmax.f32 %v1785_v46, %v1793_v44 }
 0x324   : > { %3083 = vmatpush3.bf16.msra.mxu0 %v3324_v41  ;;  %v3351_v41 = vld [vmem:[%s4411_s5 + $0x1a8] sm:$0xff]  }
 0x325   : > { %v3209_v49 = vpop.f32.mrb[20].mxu1 }
 0x326   : > { %v1806_v57 = vadd.f32 %v3209_v49, %v3058_v34  ;;  %v1797_v58 = vpop.f32.mrb[21].mxu1  ;;  %v3326_v49 = vld [vmem:[%s4411_s5 + $0xf8] sm:$0xff]  }
 0x327   : > { %v1798_v59 = vadd.f32 %v3052_v29, %v1797_v58  ;;  %v3210_v61 = vpop.f32.mrb[22].mxu1  ;;  %v3319_v29 = vld [vmem:[%s4411_s5 + $0xa0] sm:$0xff]  }
 0x328   : > { %v1809_v50 = vadd.f32 %v3210_v61, %v3061_v36  ;;  %v1800_v62 = vpop.f32.mrb[23].mxu1  ;;  %3099 = vmatpush3.bf16.msra.mxu1 %v3319_v29  ;;  %v3329_v61 = vld [vmem:[%s4411_s5 + $0x1c0] sm:$0xff]   ;;  %v3337_v29 = vld [vmem:[%s4411_s5 + $0x1d0] sm:$0xff]  }
 0x329   : > { %v1814_v0 = vmax.f32 %v1798_v59, %v1806_v57  ;;  %v1801_v26 = vadd.f32 %v3055_v32, %v1800_v62  ;;  %3100 = vmatprep.subr.bf16.mxu1 %v3320_v22  ;;  %v3327_v57 = vld [vmem:[%s4411_s5 + $0xb8] sm:$0xff]   ;;  %v3328_v59 = vld [vmem:[%s4411_s5 + $0x140] sm:$0xff]  }
 0x32a   : > { %3112 = vmatprep.subr.bf16.mxu0 %v3328_v59  ;;  %v3347_v22 = vld [vmem:[%s4411_s5 + $0x1a0] sm:$0xff]  }
 0x32b   : > { %v1816_v3 = vmax.f32 %v1812_v45, %v1814_v0  ;;  %v1815_v60 = vmax.f32 %v1801_v26, %v1809_v50 }
 0x32c   : > { %3101 = vmatpush3.bf16.msra.mxu1 %v3321_v37  ;;  %v3348_v37 = vld [vmem:[%s4411_s5 + $0x168] sm:$0xff]  }
 0x32d   : > { %v1825_v7 = vadd.f32 %v2928_v48, %v1816_v3  ;;  %v1817_v38 = vmax.f32 %v1813_v47, %v1815_v60  ;;  %v3325_v47 = vld [vmem:[%s4411_s5 + $0xb0] sm:$0xff]   ;;  %3102 = vmatprep.subr.bf16.mxu1 %v3323_v40  ;;  %v3350_v40 = vld [vmem:[%s4411_s5 + $0x128] sm:$0xff]  }
 0x32f   : > { %v1827_v9 = vmax.f32 %v1825_v7, 0.0  ;;  %v1826_v11 = vadd.f32 %v2928_v48, %v1817_v38  ;;  %v1994_v7 = vsub.s32 2, %v4081_v2  ;;  %v2006_v38 = vsub.s32 5, %v4081_v2 }
 0x330   : > { %3103 = vmatpush3.bf16.msra.mxu1 %v3325_v47  ;;  %v3356_v47 = vld [vmem:[%s4411_s5 + $0x178] sm:$0xff]  }
 0x331   : > { %v1872_v14 = vcombine.high %v1827_v9, %v1827_v9  ;;  %v1828_v15 = vmax.f32 %v1826_v11, 0.0  ;;  %v1841_v16 = vrot.slane %v1827_v9, %v4096_v63  ;;  %1833 = vst.msk [vmem:[#allocation4] sm:$0x1] %vm4102_vm12, %v1827_v9  ;;  %3104 = vmatprep.subr.bf16.mxu1 %v3326_v49  ;;  %v3357_v49 = vld [vmem:[%s4411_s5 + $0x1f8] sm:$0xff]  }
 0x333   : > { %v1945_v17 = vcombine.high %v1828_v15, %v1828_v15  ;;  %v1842_v18 = vcombine.high %v1841_v16, %v1841_v16  ;;  %v1879_v19 = vrot.slane %v1872_v14, %v4096_v63  ;;  %v1917_v20 = vrot.slane %v1828_v15, %v4096_v63  ;;  %1909 = vst.msk [vmem:[#allocation4 + $0x4] sm:$0x1] %vm4102_vm12, %v1828_v15 }
 0x334   : > { %v1849_v21 = vrot.slane %v1841_v16, %v4096_v63  ;;  %3105 = vmatpush3.bf16.msra.mxu1 %v3327_v57  ;;  %v3358_v57 = vld [vmem:[%s4411_s5 + $0x138] sm:$0xff]  }
 0x335   : > { %v1856_v27 = vrot.slane %v1842_v18, %v4096_v63  ;;  %v1889_v28 = vcombine.high %v1879_v19, %v1879_v19  ;;  %v1952_v13 = vrot.slane %v1945_v17, %v4096_v63  ;;  %v1886_v31 = vrot.slane %v1879_v19, %v4096_v63  ;;  %3134 = vmatprep.subr.bf16.mxu1 %v3329_v61  ;;  %v3330_v19 = vld [vmem:[%s4411_s5 + $0x100] sm:$0xff]  }
 0x336   : > { %v1864_v30 = vcombine.high %v1849_v21, %v1849_v21  ;;  %v1925_v32 = vrot.slane %v1917_v20, %v4096_v63  ;;  %v1918_v34 = vcombine.high %v1917_v20, %v1917_v20  ;;  %v3331_v20 = vld [vmem:[%s4411_s5 + $0x180] sm:$0xff]   ;;  %v3332_v21 = vld [vmem:[%s4411_s5 + $0x148] sm:$0xff]  }
 0x337   : > { %1857 = vrot.lane.b32.xlu0 %v1856_v27, %s3435_s29  ;;  %v1867_v33 = vcombine.high %v1856_v27, %v1856_v27  ;;  %v1896_v55 = vrot.slane %v1889_v28, %v4096_v63  ;;  %1888 = vst.msk [vmem:[#allocation4 + $0x2] sm:$0x1] %vm4102_vm12, %v1886_v31  ;;  %v1901_v54 = vcombine.high %v1886_v31, %v1886_v31  ;;  %v3334_v27 = vld [vmem:[%s4411_s5 + $0x108] sm:$0xff]   ;;  %v3339_v31 = vld [vmem:[%s4411_s5 + $0x190] sm:$0xff]  }
 0x338   : > { %1866 = vst.msk [vmem:[#allocation4 + $0x1] sm:$0x1] %vm4102_vm12, %v1864_v30  ;;  %v1937_v35 = vcombine.high %v1925_v32, %v1925_v32  ;;  %v1959_v36 = vrot.slane %v1952_v13, %v4096_v63  ;;  %v1932_v45 = vrot.slane %v1918_v34, %v4096_v63  ;;  %v1962_v46 = vcombine.high %v1952_v13, %v1952_v13  ;;  %v3335_v28 = vld [vmem:[%s4411_s5 + $0x188] sm:$0xff]   ;;  %v3336_v13 = vld [vmem:[%s4411_s5 + $0x150] sm:$0xff]   ;;  %v3340_v32 = vld [vmem:[%s4411_s5 + $0x158] sm:$0xff]  }
 0x339   : > { %1868 = vrot.lane.b32.xlu1 %v1867_v33, %s3435_s29  ;;  %1903 = vst.msk [vmem:[#allocation4 + $0x3] sm:$0x1] %vm4102_vm12, %v1901_v54  ;;  %v1904_v43 = vcombine.high %v1896_v55, %v1896_v55  ;;  %v3338_v30 = vld [vmem:[%s4411_s5 + $0x110] sm:$0xff]   ;;  %v3341_v33 = vld [vmem:[%s4411_s5 + $0x1d8] sm:$0xff]   ;;  %v3344_v54 = vld [vmem:[%s4411_s5 + $0x160] sm:$0xff]  }
 0x33a   : > { %1939 = vst.msk [vmem:[#allocation4 + $0x5] sm:$0x1] %vm4102_vm12, %v1937_v35  ;;  %1961 = vst.msk [vmem:[#allocation4 + $0x6] sm:$0x1] %vm4102_vm12, %v1959_v36  ;;  %v1974_v44 = vcombine.high %v1959_v36, %v1959_v36  ;;  %v1940_v52 = vcombine.high %v1932_v45, %v1932_v45  ;;  %v1969_v56 = vrot.slane %v1962_v46, %v4096_v63  ;;  %v2014_v63 = vsub.s32 7, %v4081_v2  ;;  %v3343_v34 = vld [vmem:[%s4411_s5 + $0x198] sm:$0xff]  }
 0x33b   : > { %1897 = vrot.lane.b32.xlu0 %v1896_v55, %s3435_s29  ;;  %v3342_v55 = vld [vmem:[%s4411_s5 + $0x118] sm:$0xff]   ;;  %v3345_v35 = vld [vmem:[%s4411_s5 + $0x1e0] sm:$0xff]   ;;  %v3355_v46 = vld [vmem:[%s4411_s5 + $0x1b0] sm:$0xff]  }
 0x33c   : > { %1976 = vst.msk [vmem:[#allocation4 + $0x7] sm:$0x1] %vm4102_vm12, %v1974_v44  ;;  %v1977_v58 = vcombine.high %v1969_v56, %v1969_v56  ;;  %v3346_v36 = vld [vmem:[%s4411_s5 + $0x120] sm:$0xff]   ;;  %v3352_v44 = vld [vmem:[%s4411_s5 + $0x170] sm:$0xff]  }
 0x33d   : > { %1905 = vrot.lane.b32.xlu1 %v1904_v43, %s3435_s29  ;;  %v3353_v43 = vld [vmem:[%s4411_s5 + $0x1f0] sm:$0xff]  }
 0x33f   : > { %1933 = vrot.lane.b32.xlu0 %v1932_v45, %s3435_s29  ;;  %v3354_v45 = vld [vmem:[%s4411_s5 + $0x130] sm:$0xff]  }
 0x341   : > { %1941 = vrot.lane.b32.xlu1 %v1940_v52, %s3435_s29  ;;  %v2002_v52 = vsub.s32 4, %v4081_v2 }
 0x343   : > { %1970 = vrot.lane.b32.xlu0 %v1969_v56, %s3435_s29  ;;  %v2010_v56 = vsub.s32 6, %v4081_v2 }
 0x345   : > { %1978 = vrot.lane.b32.xlu1 %v1977_v58, %s3435_s29  ;;  %v3359_v58 = vld [vmem:[%s4411_s5 + $0x1b8] sm:$0xff]  }
 0x3a9   : > { %v1858_v62 = vpop.permute.xlu0 %1857 }
 0x3aa   : > { %1863 = vst.msk [vmem:[#allocation4] sm:$0x1] %vm4192_vm15, %v1858_v62  ;;  %v3360_v62 = vld [vmem:[%s4413_s7] sm:$0xff]  }
 0x3ab   : > { %v1869_v0 = vpop.permute.xlu1 %1868 }
 0x3ac   : > { %1871 = vst.msk [vmem:[#allocation4 + $0x1] sm:$0x1] %vm4192_vm15, %v1869_v0  ;;  %v3361_v0 = vld [vmem:[%s4413_s7 + $0x8] sm:$0xff]  }
 0x3ad   : > { %v1898_v26 = vpop.permute.xlu0 %1897 }
 0x3ae   : > { %1900 = vst.msk [vmem:[#allocation4 + $0x2] sm:$0x1] %vm4192_vm15, %v1898_v26  ;;  %v3362_v26 = vld [vmem:[%s4413_s7 + $0x10] sm:$0xff]  }
 0x3af   : > { %v1906_v1 = vpop.permute.xlu1 %1905 }
 0x3b0   : > { %1908 = vst.msk [vmem:[#allocation4 + $0x3] sm:$0x1] %vm4192_vm15, %v1906_v1  ;;  %v3363_v1 = vld [vmem:[%s4413_s7 + $0x18] sm:$0xff]  }
 0x3b1   : > { %v1934_v51 = vpop.permute.xlu0 %1933 }
 0x3b2   : > { %1936 = vst.msk [vmem:[#allocation4 + $0x4] sm:$0x1] %vm4192_vm15, %v1934_v51  ;;  %v3364_v51 = vld [vmem:[%s4413_s7 + $0x20] sm:$0xff]  }
 0x3b3   : > { %v1942_v48 = vpop.permute.xlu1 %1941 }
 0x3b4   : > { %1944 = vst.msk [vmem:[#allocation4 + $0x5] sm:$0x1] %vm4192_vm15, %v1942_v48  ;;  %v3365_v48 = vld [vmem:[%s4413_s7 + $0x28] sm:$0xff]  }
 0x3b5   : > { %v1971_v3 = vpop.permute.xlu0 %1970 }
 0x3b6   : > { %1973 = vst.msk [vmem:[#allocation4 + $0x6] sm:$0x1] %vm4192_vm15, %v1971_v3  ;;  %v3366_v3 = vld [vmem:[%s4413_s7 + $0x30] sm:$0xff]  }
 0x3b7   : > { %v1979_v60 = vpop.permute.xlu1 %1978 }
 0x3b8   : > { %1981 = vst.msk [vmem:[#allocation4 + $0x7] sm:$0x1] %vm4192_vm15, %v1979_v60  ;;  %v3367_v60 = vld [vmem:[%s4413_s7 + $0x38] sm:$0xff]  }
 0x3bf   : > { %v4218_v8 = vld [vmem:[#allocation4] sm:$0xff] }
 0x3c0   : > { %v1991_v10 = vrot.slane %v4218_v8, %v1990_v4  ;;  %v1999_v9 = vrot.slane %v4218_v8, %v1998_v6  ;;  %v1987_v11 = vrot.slane %v4218_v8, %v1986_v5  ;;  %v1995_v12 = vrot.slane %v4218_v8, %v1994_v7  ;;  %v2160_v5 = vld [vmem:[%s4412_s6] sm:$0x1] }
 0x3c1   : > { %v2007_v42 = vrot.slane %v4218_v8, %v2006_v38  ;;  %v2015_v14 = vrot.slane %v4218_v8, %v2014_v63  ;;  %v2003_v59 = vrot.slane %v4218_v8, %v2002_v52  ;;  %v2011_v61 = vrot.slane %v4218_v8, %v2010_v56 }
 0x3c2   : > { %v2025_v15 = vpack.c.bf16 %v1991_v10, %v1991_v10  ;;  %v2027_v16 = vpack.c.bf16 %v1999_v9, %v1999_v9  ;;  %v2024_v17 = vpack.c.bf16 %v1987_v11, %v1987_v11  ;;  %v2026_v18 = vpack.c.bf16 %v1995_v12, %v1995_v12 }
 0x3c3   : > { %v2029_v24 = vpack.c.bf16 %v2007_v42, %v2007_v42  ;;  %v2031_v25 = vpack.c.bf16 %v2015_v14, %v2015_v14  ;;  %v2028_v50 = vpack.c.bf16 %v2003_v59, %v2003_v59  ;;  %v2030_v2 = vpack.c.bf16 %v2011_v61, %v2011_v61 }
 0x3c4   : > { %2577 = vmatprep.mubr.bf16.mxu0 %v2025_v15  ;;  %2617 = vmatprep.mubr.bf16.mxu1 %v2027_v16 }
 0x3c5   : > { %2578 = vmatmul.mubr.bf16.vlgmr.msra.gmra.mrb[32].mxu0 %v2024_v17  ;;  %2618 = vmatmul.mubr.bf16.vlgmr.msra.gmra.mrb[24].mxu1 %v2026_v18 }
 0x3c6   : > { %3113 = vmatpush3.bf16.msra.mxu0 %v3330_v19  ;;  %3135 = vmatpush3.bf16.msra.mxu1 %v3331_v20 }
 0x3c7   : > { %2657 = vmatprep.mubr.bf16.mxu0 %v2029_v24  ;;  %2697 = vmatprep.mubr.bf16.mxu1 %v2031_v25 }
 0x3c8   : > { %3114 = vmatprep.subr.bf16.mxu0 %v3332_v21  ;;  %3136 = vmatprep.subr.bf16.mxu1 %v3333_v23 }
 0x3ca   : > { %3115 = vmatpush3.bf16.msra.mxu0 %v3334_v27  ;;  %3137 = vmatpush3.bf16.msra.mxu1 %v3335_v28 }
 0x3cb   : > { %3116 = vmatprep.subr.bf16.mxu0 %v3336_v13  ;;  %3138 = vmatprep.subr.bf16.mxu1 %v3337_v29  ;;  %v2723_v29 = vld [vmem:[%s4414_s8] sm:$0x1] }
 0x3ce   : > { %3117 = vmatpush3.bf16.msra.mxu0 %v3338_v30  ;;  %3139 = vmatpush3.bf16.msra.mxu1 %v3339_v31 }
 0x3cf   : > { %3118 = vmatprep.subr.bf16.mxu0 %v3340_v32  ;;  %3140 = vmatprep.subr.bf16.mxu1 %v3341_v33 }
 0x3d2   : > { %3119 = vmatpush3.bf16.msra.mxu0 %v3342_v55  ;;  %3141 = vmatpush3.bf16.msra.mxu1 %v3343_v34 }
 0x3d3   : > { %3120 = vmatprep.subr.bf16.mxu0 %v3344_v54  ;;  %3142 = vmatprep.subr.bf16.mxu1 %v3345_v35 }
 0x3d6   : > { %3121 = vmatpush3.bf16.msra.mxu0 %v3346_v36  ;;  %3143 = vmatpush3.bf16.msra.mxu1 %v3347_v22 }
 0x3d7   : > { %3122 = vmatprep.subr.bf16.mxu0 %v3348_v37  ;;  %3144 = vmatprep.subr.bf16.mxu1 %v3349_v39 }
 0x3da   : > { %3123 = vmatpush3.bf16.msra.mxu0 %v3350_v40  ;;  %3145 = vmatpush3.bf16.msra.mxu1 %v3351_v41 }
 0x3db   : > { %3124 = vmatprep.subr.bf16.mxu0 %v3352_v44  ;;  %3146 = vmatprep.subr.bf16.mxu1 %v3353_v43 }
 0x3de   : > { %3125 = vmatpush3.bf16.msra.mxu0 %v3354_v45  ;;  %3147 = vmatpush3.bf16.msra.mxu1 %v3355_v46 }
 0x3df   : > { %3126 = vmatprep.subr.bf16.mxu0 %v3356_v47  ;;  %3148 = vmatprep.subr.bf16.mxu1 %v3357_v49 }
 0x3e2   : > { %3127 = vmatpush3.bf16.msra.mxu0 %v3358_v57  ;;  %3149 = vmatpush3.bf16.msra.mxu1 %v3359_v58 }
 0x3e3   : > { %3211 = vmatprep.subr.bf16.mxu0 %v3433_v53 }
 0x3e5   : > { %2658 = vmatmul.mubr.bf16.vlgmr.msra.gmra.mrb[36].mxu0 %v2028_v50  ;;  %2698 = vmatmul.mubr.bf16.vlgmr.msra.gmra.mrb[28].mxu1 %v2030_v2 }
 0x3e6   : > { %3212 = vmatpush3.bf16.msra.mxu0 %v3360_v62  ;;  %3227 = vmatprep.mubr.msk.bf16.mxu0 %vm3438_vm0, %v3433_v53 }
 0x3e7   : > { %3213 = vmatprep.subr.bf16.mxu0 %v3433_v53 }
 0x3ea   : > { %3214 = vmatpush3.bf16.msra.mxu0 %v3361_v0 }
 0x3eb   : > { %3215 = vmatprep.subr.bf16.mxu0 %v3433_v53 }
 0x3ee   : > { %3216 = vmatpush3.bf16.msra.mxu0 %v3362_v26 }
 0x3ef   : > { %3217 = vmatprep.subr.bf16.mxu0 %v3433_v53 }
 0x3f2   : > { %3218 = vmatpush3.bf16.msra.mxu0 %v3363_v1 }
 0x3f3   : > { %3219 = vmatprep.subr.bf16.mxu0 %v3433_v53 }
 0x3f6   : > { %3220 = vmatpush3.bf16.msra.mxu0 %v3364_v51 }
 0x3f7   : > { %3221 = vmatprep.subr.bf16.mxu0 %v3433_v53 }
 0x3fa   : > { %3222 = vmatpush3.bf16.msra.mxu0 %v3365_v48 }
 0x3fb   : > { %3223 = vmatprep.subr.bf16.mxu0 %v3433_v53 }
 0x3fe   : > { %3224 = vmatpush3.bf16.msra.mxu0 %v3366_v3 }
 0x3ff   : > { %3225 = vmatprep.subr.bf16.mxu0 %v3433_v53 }
 0x402   : > { %3226 = vmatpush3.bf16.msra.mxu0 %v3367_v60 }
 0x498   : > { %v3084_v4 = vpop.f32.mrb[32].mxu0  ;;  %v3106_v6 = vpop.f32.mrb[24].mxu1 }
 0x499   : > { %v3085_v7 = vpop.f32.mrb[33].mxu0  ;;  %v3107_v38 = vpop.f32.mrb[25].mxu1 }
 0x49a   : > { %v3086_v63 = vadd.f32 %v3085_v7, %v3084_v4  ;;  %v3108_v8 = vadd.f32 %v3107_v38, %v3106_v6  ;;  %v3087_v10 = vpop.f32.mrb[34].mxu0  ;;  %v3109_v9 = vpop.f32.mrb[26].mxu1 }
 0x49b   : > { %v3088_v11 = vpop.f32.mrb[35].mxu0  ;;  %v3110_v12 = vpop.f32.mrb[27].mxu1 }
 0x49c   : > { %v2580_v42 = vadd.f32 %v3086_v63, %v2160_v5 }
 0x49e   : > { %v2620_v14 = vadd.f32 %v3108_v8, %v2580_v42 }
 0x4b8   : > { %v3128_v15 = vpop.f32.mrb[36].mxu0  ;;  %v3150_v53 = vpop.f32.mrb[28].mxu1 }
 0x4b9   : > { %v3129_v16 = vpop.f32.mrb[37].mxu0  ;;  %v3151_v17 = vpop.f32.mrb[29].mxu1 }
 0x4ba   : > { %v3130_v18 = vadd.f32 %v3129_v16, %v3128_v15  ;;  %v3152_v19 = vadd.f32 %v3151_v17, %v3150_v53  ;;  %v3131_v20 = vpop.f32.mrb[38].mxu0  ;;  %v3153_v21 = vpop.f32.mrb[30].mxu1 }
 0x4bb   : > { %v3132_v23 = vpop.f32.mrb[39].mxu0  ;;  %v3154_v24 = vpop.f32.mrb[31].mxu1 }
 0x4bc   : > { %v2660_v25 = vadd.f32 %v3130_v18, %v2620_v14 }
 0x4be   : > { %v2700_v27 = vadd.f32 %v3152_v19, %v2660_v25 }
 0x4c0   : > { %v2705_v28 = vmax.f32 %v2700_v27, 0.0 }
 0x4c2   : > { %v2706_v13 = vpack.c.bf16 %v2705_v28, %v2705_v28 }
 0x4c4   : > { %3228 = vmatmul.mubr.bf16.vlgmr.msra.gmra.mrb[40].mxu0 %v2706_v13 }
 0x597   : > { %v2806_v30 = vpop.f32.mrb[40].mxu0 }
 0x598   : > { %v2807_v31 = vadd.f32 %v2806_v30, %v2723_v29  ;;  %v3229_v32 = vpop.f32.mrb[41].mxu0 }
 0x599   : > { %v2809_v33 = vpop.f32.mrb[42].mxu0 }
 0x59a   : > { %v3230_v55 = vpop.f32.mrb[43].mxu0  ;;  %2813 = vst.msk [vmem:[%s324_s21] sm:$0x1] %vm2812_vm1, %v2807_v31 }
 0x59b   : > { %3381 = shalt.err (!%p3378_p3)
}
 0x59c   : > { %s3382_s28 = scalar_lea.hbm %s4364_s24, 16  ;;  %s3386_s21 = scalar_lea.hbm %s4415_s9, 32 }
 0x59d   : > { %p3383_p4 = scmp.ne.s32.totalorder %s4364_s24, %s3382_s28  ;;  %p3387_p9 = scmp.lt.u32.totalorder %s4364_s24, %s4415_s9 }
 0x59e   : > { %p3388_p10 = scmp.lt.u32.totalorder %s3386_s21, %s3382_s28  ;;  %p3390_p12 = scmp.lt.u32.totalorder %s3382_s28, %s4364_s24 }
 0x59f   : > { %p3384_p7 = pnand %p3383_p4, %p3528_p5 }
 0x5a0   : > { %p3389_p11 = por %p3388_p10, %p3387_p9 }
 0x5a1   : > { %p3385_p8 = pneg %p3384_p7 }
 0x5a2   : > { %p3391_p13 = por %p3390_p12, %p3389_p11 }
 0x5a4   : > { %p3392_p0 = pnand %p3391_p13, %p3385_p8 }
 0x5a6   : > { %3395 = shalt.err (!%p3392_p0)
}
 0x5a7   : > { %3231 = dma.vmem_to_hbm [thread:$0]  (%p3528_p5), %s4366_s22, 16, %s4364_s24, %s2815_s13  }
 0x5a8 PF: > { %p3237_p1 = scmp.ge.s32.totalorder %s3430_s12, 2  ;;  %s2839_s25 = sand.u32 1, %s3418_s30  }
 0x5a9   : > { %s2840_s26 = scalar_lea.sflag [#allocation6], %s2839_s25 }
 0x5aa   : > { %p3234_p2 = pnand %p3237_p1, %p3532_p6 }
 0x5ac   : > { %3413 = dma.done.wait (!%p3234_p2), %s2840_s26, 16  }
 0x5ad   : > { %3415 = vsyncadd (!%p3234_p2), %s2840_s26, 4294967280  ;;  %p19_p3 = scmp.ge.s32.totalorder %s3515_s15, 4   ;;  %s4422_s30 = smov %s3422_s10 }
 0x5ae   : > { %s4423_s10 = smov %s3426_s11  ;;  %s4424_s11 = smov %s3526_s18 }
 0x5af   : > { %s4425_s12 = smov %s3515_s15  ;;  %21 = sbr.rel (!%p19_p3) target bundleno = 3 (0x3), region = 94 }
 0x5b6   :  { %2844 = vsyncpa [#allocation6], 1 }
 0x5b7   :  { %2846 = vsyncpa [#allocation6 + $0x1], 1 }

</bundles_post_ra>
